<compile_context>
chip_gen: v7x
topology: tpu7x:2x2x1
jax: 0.10.0
libtpu: 0.0.40
codegen_flags: <defaults>
</compile_context>

<pallas_src>
import functools

import jax
import jax.numpy as jnp
from jax.experimental import pallas as pl
from jax.experimental.pallas import tpu as pltpu

IMAGENET_MEAN = (0.485, 0.456, 0.406)
IMAGENET_STD = (0.229, 0.224, 0.225)


# ------------------------- generation-dependent config ----------------------

def _vmem_capacity_bytes():
    try:
        return int(pltpu.get_tpu_info().vmem_capacity_bytes)
    except Exception:
        pass
    try:
        kind = jax.devices()[0].device_kind.lower()
        if "v5" in kind or "v6" in kind:
            return 128 << 20
    except Exception:
        pass
    return 64 << 20                       # conservative: assume v7x-sized VMEM


_VMEM_CAP = _vmem_capacity_bytes()
if _VMEM_CAP >= (96 << 20):               # v5e / v6e: 128 MiB physical VMEM
    VMEM_LIMIT = 96 << 20
    D3_TN = 8192                          # int8 weight tile 2048x8192 = 16 MiB
else:                                     # v7x: 64 MiB physical VMEM
    VMEM_LIMIT = 48 << 20
    D3_TN = 4096                          # int8 weight tile 2048x4096 = 8 MiB


# ----------------------------- Pallas kernels ------------------------------

def _int8_linear_kernel(x_ref, w_ref, scale_ref, b_ref, o_ref, *, relu):
    """y = (x @ dequant(w_int8)) * scale + b.  Weight-streaming bound at M<=2."""
    x = x_ref[...].astype(jnp.bfloat16)
    w = w_ref[...].astype(jnp.bfloat16)            # int8 values exact in bf16
    acc = jnp.dot(x, w, preferred_element_type=jnp.float32)
    acc = acc * scale_ref[...] + b_ref[...]        # per-output-channel scale
    if relu:
        acc = jnp.maximum(acc, 0.0)
    o_ref[...] = acc.astype(o_ref.dtype)


def pallas_linear_int8(x, w_q, scale, b, *, relu=False, tn=None):
    """y = x @ (w_q * scale) + b.  x:(M,K) f32, w_q:(K,N) int8, scale/b:(N,)."""
    M, K = x.shape
    Kw, N = w_q.shape
    assert K == Kw
    if tn is None:
        tn = N if N <= D3_TN else D3_TN
    assert N % tn == 0
    grid = (N // tn,)
    cost = pl.CostEstimate(
        flops=2 * M * K * N,
        transcendentals=0,
        bytes_accessed=(M * K * 4 + K * N * 1 + N * 8 + M * N * 4))
    return pl.pallas_call(
        functools.partial(_int8_linear_kernel, relu=relu),
        out_shape=jax.ShapeDtypeStruct((M, N), jnp.float32),
        grid=grid,
        in_specs=[
            # x / scale / bias index_maps are constant across the grid, so the
            # pipeline keeps them resident; only the weight tile streams.
            pl.BlockSpec((M, K), lambda j: (0, 0)),
            pl.BlockSpec((K, tn), lambda j: (0, j)),
            pl.BlockSpec((1, tn), lambda j: (0, j)),
            pl.BlockSpec((1, tn), lambda j: (0, j)),
        ],
        out_specs=pl.BlockSpec((M, tn), lambda j: (0, j)),
        compiler_params=pltpu.CompilerParams(
            dimension_semantics=("parallel",),
            vmem_limit_bytes=VMEM_LIMIT),
        cost_estimate=cost,
    )(x, w_q, scale.reshape(1, N), b.reshape(1, N))


def _matmul_rowbias_kernel(a_ref, b_ref, bias_ref, o_ref, *, relu):
    """o = a @ b + bias (bias broadcast along lanes).  Lane-dense (Cout,P) out."""
    acc = jnp.dot(a_ref[...], b_ref[...], preferred_element_type=jnp.float32)
    acc = acc + bias_ref[...]
    if relu:
        acc = jnp.maximum(acc, 0.0)
    o_ref[...] = acc.astype(o_ref.dtype)


def pallas_conv_matmul(w2d, cols, bias, *, relu):
    """(Cout,K) @ (K,P) + bias(Cout,1) -> (Cout,P); P padded to 128 multiple."""
    cout, K = w2d.shape
    K2, P = cols.shape
    assert K == K2
    Pp = ((P + 127) // 128) * 128          # lane-dense output (no masked vst)
    if Pp != P:
        cols = jnp.pad(cols, ((0, 0), (0, Pp - P)))
    y = pl.pallas_call(
        functools.partial(_matmul_rowbias_kernel, relu=relu),
        out_shape=jax.ShapeDtypeStruct((cout, Pp), jnp.float32),
        grid=(1,),
        in_specs=[
            pl.BlockSpec((cout, K), lambda i: (0, 0)),
            pl.BlockSpec((K, Pp), lambda i: (0, 0)),
            pl.BlockSpec((cout, 1), lambda i: (0, 0)),
        ],
        out_specs=pl.BlockSpec((cout, Pp), lambda i: (0, 0)),
        compiler_params=pltpu.CompilerParams(vmem_limit_bytes=VMEM_LIMIT),
    )(w2d, cols, bias.reshape(cout, 1))
    return y[:, :P] if Pp != P else y


def _fused_decoder_kernel(xn_ref, imgw_ref, imgb_ref,
                          flat_ref, pew_ref, peb_ref,
                          d1w_ref, d1b_ref, d2w_ref, d2b_ref,
                          o_ref, *, split):
    """img-proj + points Linear(4000,512) + fused concat+d1(ReLU) + d2(ReLU)."""
    # image feature: (B,3) @ (3,512) + b
    img = jnp.dot(xn_ref[...], imgw_ref[...],
                  preferred_element_type=jnp.float32) + imgb_ref[...]
    # points encoder final linear: (1,4000) @ (4000,512) + b
    pe = jnp.dot(flat_ref[...].astype(jnp.bfloat16), pew_ref[...],
                 preferred_element_type=jnp.float32) + peb_ref[...]
    # d1: ReLU(hstack(img, tile(pe,B)) @ W1 + b1) without materializing concat
    d1w = d1w_ref[...]
    h = jnp.dot(img.astype(jnp.bfloat16), d1w[:split, :],
                preferred_element_type=jnp.float32)
    h = h + jnp.dot(pe.astype(jnp.bfloat16), d1w[split:, :],
                    preferred_element_type=jnp.float32)
    h = jnp.maximum(h + d1b_ref[...], 0.0)
    # d2: ReLU(h @ W2 + b2)
    h2 = jnp.dot(h.astype(jnp.bfloat16), d2w_ref[...],
                 preferred_element_type=jnp.float32) + d2b_ref[...]
    o_ref[...] = jnp.maximum(h2, 0.0).astype(o_ref.dtype)


def pallas_fused_decoder(xn, flat, params):
    """One pallas_call for img-proj -> pe -> d1(concat) -> d2.  Out: (B,2048)."""
    B = xn.shape[0]
    img_w, img_b = params['img_w'], params['img_b']
    pe_w, pe_b = params['pe_w'], params['pe_b']
    d1_w, d1_b = params['d1_w'], params['d1_b']
    d2_w, d2_b = params['d2_w'], params['d2_b']
    Kpe = pe_w.shape[0]
    N1 = d1_w.shape[1]
    N2 = d2_w.shape[1]
    return pl.pallas_call(
        functools.partial(_fused_decoder_kernel, split=img_w.shape[1]),
        out_shape=jax.ShapeDtypeStruct((B, N2), jnp.float32),
        grid=(1,),
        in_specs=[
            pl.BlockSpec((B, 3), lambda i: (0, 0)),
            pl.BlockSpec((3, 512), lambda i: (0, 0)),
            pl.BlockSpec((1, 512), lambda i: (0, 0)),
            pl.BlockSpec((1, Kpe), lambda i: (0, 0)),
            pl.BlockSpec((Kpe, 512), lambda i: (0, 0)),
            pl.BlockSpec((1, 512), lambda i: (0, 0)),
            pl.BlockSpec((1024, N1), lambda i: (0, 0)),
            pl.BlockSpec((1, N1), lambda i: (0, 0)),
            pl.BlockSpec((1024, N2), lambda i: (0, 0)),
            pl.BlockSpec((1, N2), lambda i: (0, 0)),
        ],
        out_specs=pl.BlockSpec((B, N2), lambda i: (0, 0)),
        compiler_params=pltpu.CompilerParams(vmem_limit_bytes=VMEM_LIMIT),
    )(xn, img_w, img_b.reshape(1, 512), flat, pe_w, pe_b.reshape(1, 512),
      d1_w, d1_b.reshape(1, N1), d2_w, d2_b.reshape(1, N2))


# ------------------------------- glue (JAX) --------------------------------

def im2col3d(x, k, stride):
    """x: (C, D, H, W) -> (C*k^3, P) with feature order (C, kd, kh, kw)."""
    C, D, H, W = x.shape
    od = (D - k) // stride + 1
    oh = (H - k) // stride + 1
    ow = (W - k) // stride + 1
    cols = []
    for kd in range(k):
        for kh in range(k):
            for kw in range(k):
                sl = jax.lax.slice(
                    x,
                    (0, kd, kh, kw),
                    (C,
                     kd + stride * (od - 1) + 1,
                     kh + stride * (oh - 1) + 1,
                     kw + stride * (ow - 1) + 1),
                    (1, stride, stride, stride))
                cols.append(sl)                                # (C,od,oh,ow)
    p = jnp.stack(cols, axis=1)                                # (C,k^3,od,oh,ow)
    p = p.reshape(C * k ** 3, od * oh * ow)                    # (K, P) lane-dense
    return p, (od, oh, ow)


def conv3d_stride2(x_cdhw, w, b, relu):
    """Conv3d(kernel=5, stride=2) via im2col + transposed Pallas matmul."""
    cols, (od, oh, ow) = im2col3d(x_cdhw, 5, 2)                # (K, P)
    cout = w.shape[0]
    w2d = w.reshape(cout, -1)                                  # (Cout, K)
    K = cols.shape[0]
    Kp = ((K + 127) // 128) * 128                              # 375->384, 2000->2048
    if Kp != K:
        cols = jnp.pad(cols, ((0, Kp - K), (0, 0)))
        w2d = jnp.pad(w2d, ((0, 0), (0, Kp - K)))
    y = pallas_conv_matmul(w2d, cols, b, relu=relu)            # (Cout, P)
    return y.reshape(cout, od, oh, ow)


def quantize_int8(w):
    """Per-output-channel symmetric int8 quantization of a (K, N) weight."""
    scale = jnp.maximum(jnp.max(jnp.abs(w), axis=0) / 127.0, 1e-8)  # (N,)
    w_q = jnp.clip(jnp.round(w / scale), -127, 127).astype(jnp.int8)
    return w_q, scale.astype(jnp.float32)


def init_params(key):
    """Deterministic PyTorch-default-style init (uniform +/- 1/sqrt(fan_in))."""
    ks = jax.random.split(key, 16)

    def lin(kw, kb, fan_in, shape_w, shape_b, w_dtype=jnp.float32):
        bound = 1.0 / (fan_in ** 0.5)
        w = jax.random.uniform(kw, shape_w, jnp.float32, -bound, bound)
        b = jax.random.uniform(kb, shape_b, jnp.float32, -bound, bound)
        return w.astype(w_dtype), b

    p = {}
    p['img_w'], p['img_b'] = lin(ks[0], ks[1], 3, (3, 512), (512,))
    p['c1_w'], p['c1_b'] = lin(ks[2], ks[3], 3 * 125, (16, 3, 5, 5, 5), (16,))
    p['c2_w'], p['c2_b'] = lin(ks[4], ks[5], 16 * 125, (32, 16, 5, 5, 5), (32,))
    # pe/d1/d2 stay bf16 (VMEM-resident in the fused kernel, streamed once).
    p['pe_w'], p['pe_b'] = lin(ks[6], ks[7], 4000, (4000, 512), (512,), jnp.bfloat16)
    p['d1_w'], p['d1_b'] = lin(ks[8], ks[9], 1024, (1024, 1024), (1024,), jnp.bfloat16)
    p['d2_w'], p['d2_b'] = lin(ks[10], ks[11], 1024, (1024, 2048), (2048,), jnp.bfloat16)
    # d3 is the dominant weight-streaming layer -> int8 + per-channel scales.
    d3_w, p['d3_b'] = lin(ks[12], ks[13], 2048, (2048, 32 * 32 * 32), (32 * 32 * 32,))
    p['d3_wq'], p['d3_scale'] = quantize_int8(d3_w)
    return p


def implicit_model_forward(images, points, params):
    """images: (B, H, W, 3) f32; points: (1, D, H, W, 3) f32 with D=H=W=29."""
    B = images.shape[0]

    # --- image branch: permute(0,3,1,2) + Normalize + global-avg-pool --------
    # Pool first (commutes with the per-channel affine Normalize), in plain XLA;
    # the 3->512 projection is folded into the fused decoder kernel below.
    mean = jnp.asarray(IMAGENET_MEAN, jnp.float32)
    std = jnp.asarray(IMAGENET_STD, jnp.float32)
    pooled = jnp.mean(images, axis=(1, 2))                        # (B, 3)
    xn = (pooled - mean) / std                                    # (B, 3)

    # --- points branch: permute(0,4,1,2,3) -> Conv3d/ReLU x2 -----------------
    assert points.shape[0] == 1
    pts = jnp.transpose(points, (0, 4, 1, 2, 3))[0]               # (3, 29, 29, 29)
    x1 = conv3d_stride2(pts, params['c1_w'], params['c1_b'], relu=True)   # (16,13,13,13)
    x2 = conv3d_stride2(x1, params['c2_w'], params['c2_b'], relu=True)    # (32,5,5,5)
    flat = x2.reshape(1, 32 * 5 * 5 * 5)                          # Reshape((-1, 4000))

    # --- fused: img proj + pe Linear + tile/hstack + d1(ReLU) + d2(ReLU) -----
    h = pallas_fused_decoder(xn, flat, params)                    # (B, 2048)

    # --- d3: int8 weight streaming, N-tiled + "parallel" grid axis -----------
    h = pallas_linear_int8(h, params['d3_wq'], params['d3_scale'],
                           params['d3_b'])                        # (B, 32768)
    return h.reshape(-1, 1, 32, 32, 32)                           # Reshape((-1,1,32,32,32))


if __name__ == "__main__":
    key = jax.random.PRNGKey(0)
    k_img, k_pts = jax.random.split(key)

    B, H, W = 2, 64, 64
    # points must be 29^3 so that two stride-2 k=5 convs give 5^3 (as the
    # module's Reshape((-1, 5*5*5*32)) requires).
    images = jax.random.uniform(k_img, (B, H, W, 3), jnp.float32)
    points = jax.random.uniform(k_pts, (1, 29, 29, 29, 3), jnp.float32)

    params = init_params(jax.random.PRNGKey(42))

    preds = implicit_model_forward(images, points, params)
    preds = jax.block_until_ready(preds)
    assert preds.shape == (B, 1, 32, 32, 32)
    assert preds.dtype == jnp.float32
    print("KERNEL_OK")
</pallas_src>

<mosaic_0001>
module attributes {stable_mosaic.version = 11 : i64} {
  func.func @_matmul_rowbias_kernel(%arg0: i32, %arg1: memref<16x384xf32, #tpu.memory_space<vmem>>, %arg2: memref<384x2304xf32, #tpu.memory_space<vmem>>, %arg3: memref<16x1xf32, #tpu.memory_space<vmem>>, %arg4: memref<16x2304xf32, #tpu.memory_space<vmem>>) attributes {dimension_semantics = [#tpu.dimension_semantics<arbitrary>], iteration_bounds = array<i64: 1>, scalar_prefetch = 0 : i64, scratch_operands = 0 : i64, tpu.core_type = #tpu.core_type<tc>, window_params = [{pipeline_mode = #tpu.pipeline_mode<synchronous>, transform_indices = @transform_0, window_bounds = array<i64: 16, 384>}, {pipeline_mode = #tpu.pipeline_mode<synchronous>, transform_indices = @transform_1, window_bounds = array<i64: 384, 2304>}, {pipeline_mode = #tpu.pipeline_mode<synchronous>, transform_indices = @transform_2, window_bounds = array<i64: 16, 1>}, {pipeline_mode = #tpu.pipeline_mode<synchronous>, transform_indices = @transform_3, window_bounds = array<i64: 16, 2304>}]} {
    %c0 = arith.constant 0 : index
    %c0_0 = arith.constant 0 : index
    %0 = vector.load %arg1[%c0, %c0_0] : memref<16x384xf32, #tpu.memory_space<vmem>>, vector<16x384xf32>
    %c0_1 = arith.constant 0 : index
    %c0_2 = arith.constant 0 : index
    %1 = vector.load %arg2[%c0_1, %c0_2] : memref<384x2304xf32, #tpu.memory_space<vmem>>, vector<384x2304xf32>
    %cst = arith.constant dense<0.000000e+00> : vector<16x2304xf32>
    %2 = tpu.matmul %0, %1, %cst {dimension_numbers = #tpu.dot_dimension_numbers<[1], [0], [0], [1], [0, 0, 1, 1], [], []>} : vector<16x384xf32>, vector<384x2304xf32>, vector<16x2304xf32> -> vector<16x2304xf32>
    %c0_3 = arith.constant 0 : index
    %c0_4 = arith.constant 0 : index
    %3 = vector.load %arg3[%c0_3, %c0_4] : memref<16x1xf32, #tpu.memory_space<vmem>>, vector<16x1xf32>
    %4 = vector.broadcast %3 : vector<16x1xf32> to vector<16x2304xf32>
    %5 = arith.addf %2, %4 : vector<16x2304xf32>
    %cst_5 = arith.constant 0.000000e+00 : f32
    %6 = vector.broadcast %cst_5 : f32 to vector<16x2304xf32>
    %7 = arith.maximumf %5, %6 : vector<16x2304xf32>
    %c0_6 = arith.constant 0 : index
    %c0_7 = arith.constant 0 : index
    %8 = vector.load %arg4[%c0_6, %c0_7] : memref<16x2304xf32, #tpu.memory_space<vmem>>, vector<16x2304xf32>
    tpu.vector_store %arg4[%c0_6, %c0_7], %7 {strides = array<i32>} : memref<16x2304xf32, #tpu.memory_space<vmem>>, vector<16x2304xf32>,
    return
  }
  func.func @transform_0(%arg0: i32) -> (i32, i32) {
    %c0_i32 = arith.constant 0 : i32
    %c0_i32_0 = arith.constant 0 : i32
    %c0_i32_1 = arith.constant 0 : i32
    return %c0_i32, %c0_i32_0 : i32, i32
  }
  func.func @transform_1(%arg0: i32) -> (i32, i32) {
    %c0_i32 = arith.constant 0 : i32
    %c0_i32_0 = arith.constant 0 : i32
    %c0_i32_1 = arith.constant 0 : i32
    return %c0_i32, %c0_i32_0 : i32, i32
  }
  func.func @transform_2(%arg0: i32) -> (i32, i32) {
    %c0_i32 = arith.constant 0 : i32
    %c0_i32_0 = arith.constant 0 : i32
    %c0_i32_1 = arith.constant 0 : i32
    return %c0_i32, %c0_i32_0 : i32, i32
  }
  func.func @transform_3(%arg0: i32) -> (i32, i32) {
    %c0_i32 = arith.constant 0 : i32
    %c0_i32_0 = arith.constant 0 : i32
    %c0_i32_1 = arith.constant 0 : i32
    return %c0_i32, %c0_i32_0 : i32, i32
  }
}

</mosaic_0001>

<bundles_post_ra>
// kernel: tpu_custom_call.1
= control target key start
LH: loop header
LB: loop body
LE: loop exit
PB: predicated region body
PF: predicated region fallthrough
CT: control target
= control target key end

     0   :  { %8 = vsyncpa [#allocation3], 0  ;;  %s3668_s0 = inlined_call_operand.hbm [shape: f32[16,384], index: 0, kind: input, shape index: {}]   ;;  %s3669_s1 = inlined_call_operand.hbm [shape: f32[384,2304], index: 1, kind: input, shape index: {}]   ;;  %s3670_s2 = inlined_call_operand.vmem [shape: f32[16,1], index: 2, kind: input, shape index: {}]   ;;  %s3671_s3 = inlined_call_operand.hbm [shape: f32[16,2304], index: 3, kind: output, shape index: {}]  }
   0x1   :  { %9 = vsyncpa [#allocation6], 0 }
   0x2   :  { %10 = vsyncpa [#allocation4], 0  ;;  %s3431_s12 = smov [#allocation2]   ;;  %s3359_s16 = scalar_lea.hbm %s3668_s0, 768 }
   0x3   :  { %s16_s13 = sshll.u32 %s3431_s12, 4  ;;  %p3360_p0 = scmp.ne.s32.totalorder %s3668_s0, %s3359_s16  ;;  %s17_s13 = int_to_ptr.vmem [resolvable:$true] %s16_s13 }
   0x4   :  { %p3363_p1 = scmp.lt.u32.totalorder %s3359_s16, %s3668_s0 }
   0x6   :  { %p3365_p2 = pnand %p3363_p1, %p3360_p0 }
   0x8   :  { %3368 = shalt.err (!%p3365_p2)
}
   0x9   :  { %s3369_s21 = scalar_lea.vmem %s17_s13, 768  ;;  %p3374_p4 = scmp.lt.s32.totalorder %s17_s13, %s17_s13 }
   0xa   :  { %p3370_p3 = scmp.ne.s32.totalorder %s17_s13, %s3369_s21  ;;  %p3375_p5 = scmp.lt.s32.totalorder %s3369_s21, %s3369_s21 }
   0xc   :  { %p3376_p6 = por %p3375_p5, %p3374_p4 }
   0xe   :  { %p3377_p7 = pnand %p3376_p6, %p3370_p3 }
  0x10   :  { %3380 = shalt.err (!%p3377_p7)
}
  0x11   :  { %s3432_s22 = smov 384   ;;  %s3433_s23 = smov 24  }
  0x12   :  { %22 = dma.hbm_to_vmem [thread:$0]  %s3668_s0, 768, %s17_s13, [#allocation3], %s3432_s22, %s3432_s22, %s3433_s23  }
  0x13   :  { %s3434_s26 = smov [#allocation5]   ;;  %s3381_s30 = scalar_lea.hbm %s3669_s1, 110592 }
  0x14   :  { %s28_s27 = sshll.u32 %s3434_s26, 4  ;;  %p3382_p8 = scmp.ne.s32.totalorder %s3669_s1, %s3381_s30  ;;  %s29_s27 = int_to_ptr.vmem [resolvable:$true] %s28_s27 }
  0x15   :  { %p3385_p9 = scmp.lt.u32.totalorder %s3381_s30, %s3669_s1 }
  0x17   :  { %p3387_p10 = pnand %p3385_p9, %p3382_p8 }
  0x19   :  { %3390 = shalt.err (!%p3387_p10)
}
  0x1a   :  { %s3391_s8 = scalar_lea.vmem %s29_s27, 110592  ;;  %p3396_p12 = scmp.lt.s32.totalorder %s29_s27, %s29_s27 }
  0x1b   :  { %p3392_p11 = scmp.ne.s32.totalorder %s29_s27, %s3391_s8  ;;  %p3397_p13 = scmp.lt.s32.totalorder %s3391_s8, %s3391_s8 }
  0x1d   :  { %p3398_p0 = por %p3397_p13, %p3396_p12 }
  0x1f   :  { %p3399_p1 = pnand %p3398_p0, %p3392_p11 }
  0x21   :  { %3402 = shalt.err (!%p3399_p1)
}
  0x22   :  { %s3435_s0 = smov 2304   ;;  %s3436_s9 = smov 144  }
  0x23   :  { %34 = dma.hbm_to_vmem [thread:$0]  %s3669_s1, 110592, %s29_s27, [#allocation6], %s3435_s0, %s3435_s0, %s3436_s9  }
  0x24   :  { %3425 = dma.done.wait [#allocation3], 768  }
  0x25   :  { %3426 = vsyncadd [#allocation3], 4294966528 }
  0x26   :  { %3427 = dma.done.wait [#allocation6], 110592  }
  0x27   :  { %3428 = vsyncadd [#allocation6], 4294856704  ;;  %v3437_v0 = vmov 0.0   ;;  %v50_v1 = vld [vmem:[#allocation5 + $0x8] sm:$0xff]  ;;  %v68_v2 = vld [vmem:[#allocation5 + $0x98] sm:$0xff] }
  0x28   :  { %1066 = vmatprep.mubr.f32.mxu0 %v3437_v0  ;;  %v626_v3 = vld [vmem:[#allocation5 + $0x1208] sm:$0xff]  ;;  %v2401_v4 = vpack.c.bf16 %v68_v2, %v50_v1  ;;  %v644_v5 = vld [vmem:[#allocation5 + $0x1298] sm:$0xff]  ;;  %v49_v6 = vld [vmem:[#allocation5] sm:$0xff] }
  0x29   :  { %v67_v7 = vld [vmem:[#allocation5 + $0x90] sm:$0xff]  ;;  %v2465_v8 = vpack.c.bf16 %v644_v5, %v626_v3  ;;  %v625_v10 = vld [vmem:[#allocation5 + $0x1200] sm:$0xff]  ;;  %v86_v12 = vld [vmem:[#allocation5 + $0x128] sm:$0xff] }
  0x2a   :  { %v2403_v9 = vpack.c.bf16 %v67_v7, %v49_v6  ;;  %v643_v11 = vld [vmem:[#allocation5 + $0x1290] sm:$0xff]  ;;  %2402 = vmatprep.subr.bf16.mxu1 %v2401_v4  ;;  %v104_v14 = vld [vmem:[#allocation5 + $0x1b8] sm:$0xff]  ;;  %v662_v15 = vld [vmem:[#allocation5 + $0x1328] sm:$0xff] }
  0x2b   :  { %v2467_v13 = vpack.c.bf16 %v643_v11, %v625_v10  ;;  %v680_v16 = vld [vmem:[#allocation5 + $0x13b8] sm:$0xff]  ;;  %2466 = vmatprep.subr.bf16.mxu0 %v2465_v8  ;;  %v2405_v17 = vpack.c.bf16 %v104_v14, %v86_v12  ;;  %v85_v19 = vld [vmem:[#allocation5 + $0x120] sm:$0xff]  ;;  %v103_v20 = vld [vmem:[#allocation5 + $0x1b0] sm:$0xff] }
  0x2c   :  { %2404 = vmatpush1.bf16.msra.mxu1 %v2403_v9  ;;  %v2469_v18 = vpack.c.bf16 %v680_v16, %v662_v15  ;;  %v661_v21 = vld [vmem:[#allocation5 + $0x1320] sm:$0xff]  ;;  %v2407_v22 = vpack.c.bf16 %v103_v20, %v85_v19  ;;  %v679_v23 = vld [vmem:[#allocation5 + $0x13b0] sm:$0xff]  ;;  %v122_v24 = vld [vmem:[#allocation5 + $0x248] sm:$0xff] }
  0x2d   :  { %2468 = vmatpush1.bf16.msra.mxu0 %v2467_v13  ;;  %v140_v25 = vld [vmem:[#allocation5 + $0x2d8] sm:$0xff]  ;;  %2406 = vmatprep.subr.bf16.mxu1 %v2405_v17  ;;  %v2471_v26 = vpack.c.bf16 %v679_v23, %v661_v21  ;;  %v698_v28 = vld [vmem:[#allocation5 + $0x1448] sm:$0xff]  ;;  %v121_v30 = vld [vmem:[#allocation5 + $0x240] sm:$0xff] }
  0x2e   :  { %2470 = vmatprep.subr.bf16.mxu0 %v2469_v18  ;;  %v2409_v27 = vpack.c.bf16 %v140_v25, %v122_v24  ;;  %v716_v29 = vld [vmem:[#allocation5 + $0x14d8] sm:$0xff]  ;;  %v139_v32 = vld [vmem:[#allocation5 + $0x2d0] sm:$0xff]  ;;  %v697_v33 = vld [vmem:[#allocation5 + $0x1440] sm:$0xff] }
  0x2f   :  { %v2473_v31 = vpack.c.bf16 %v716_v29, %v698_v28  ;;  %v715_v34 = vld [vmem:[#allocation5 + $0x14d0] sm:$0xff]  ;;  %v2411_v35 = vpack.c.bf16 %v139_v32, %v121_v30  ;;  %v158_v36 = vld [vmem:[#allocation5 + $0x368] sm:$0xff]  ;;  %v176_v37 = vld [vmem:[#allocation5 + $0x3f8] sm:$0xff] }
  0x30   :  { %2408 = vmatpush1.bf16.msra.mxu1 %v2407_v22  ;;  %v734_v38 = vld [vmem:[#allocation5 + $0x1568] sm:$0xff]  ;;  %v2475_v39 = vpack.c.bf16 %v715_v34, %v697_v33  ;;  %v2413_v40 = vpack.c.bf16 %v176_v37, %v158_v36  ;;  %v752_v41 = vld [vmem:[#allocation5 + $0x15f8] sm:$0xff]  ;;  %v157_v42 = vld [vmem:[#allocation5 + $0x360] sm:$0xff]  ;;  %v3438_v22 = vmov 0  }
  0x31   :  { %2472 = vmatpush1.bf16.msra.mxu0 %v2471_v26  ;;  %2410 = vmatprep.subr.bf16.mxu1 %v2409_v27  ;;  %v175_v43 = vld [vmem:[#allocation5 + $0x3f0] sm:$0xff]  ;;  %v2477_v44 = vpack.c.bf16 %v752_v41, %v734_v38  ;;  %v733_v45 = vld [vmem:[#allocation5 + $0x1560] sm:$0xff]  ;;  %v194_v47 = vld [vmem:[#allocation5 + $0x488] sm:$0xff] }
  0x32   :  { %2474 = vmatprep.subr.bf16.mxu0 %v2473_v31  ;;  %v751_v46 = vld [vmem:[#allocation5 + $0x15f0] sm:$0xff]  ;;  %v212_v48 = vld [vmem:[#allocation5 + $0x518] sm:$0xff]  ;;  %v770_v49 = vld [vmem:[#allocation5 + $0x1688] sm:$0xff]  ;;  %v2415_v51 = vpack.c.bf16 %v175_v43, %v157_v42  ;;  %3346 = vset.pattern.permute.xlu0 %v3438_v22 }
  0x33   :  { %v788_v50 = vld [vmem:[#allocation5 + $0x1718] sm:$0xff]  ;;  %v2479_v52 = vpack.c.bf16 %v751_v46, %v733_v45  ;;  %v2417_v53 = vpack.c.bf16 %v212_v48, %v194_v47  ;;  %v193_v54 = vld [vmem:[#allocation5 + $0x480] sm:$0xff]  ;;  %v211_v55 = vld [vmem:[#allocation5 + $0x510] sm:$0xff] }
  0x34   :  { %2412 = vmatpush1.bf16.msra.mxu1 %v2411_v35  ;;  %v769_v56 = vld [vmem:[#allocation5 + $0x1680] sm:$0xff]  ;;  %v2481_v57 = vpack.c.bf16 %v788_v50, %v770_v49  ;;  %v787_v58 = vld [vmem:[#allocation5 + $0x1710] sm:$0xff]  ;;  %v230_v59 = vld [vmem:[#allocation5 + $0x5a8] sm:$0xff]  ;;  %v2419_v63 = vpack.c.bf16 %v211_v55, %v193_v54 }
  0x35   :  { %2476 = vmatpush1.bf16.msra.mxu0 %v2475_v39  ;;  %2414 = vmatprep.subr.bf16.mxu1 %v2413_v40  ;;  %v248_v60 = vld [vmem:[#allocation5 + $0x638] sm:$0xff]  ;;  %v806_v61 = vld [vmem:[#allocation5 + $0x17a8] sm:$0xff]  ;;  %v2483_v1 = vpack.c.bf16 %v787_v58, %v769_v56  ;;  %v229_v3 = vld [vmem:[#allocation5 + $0x5a0] sm:$0xff] }
  0x36   :  { %2478 = vmatprep.subr.bf16.mxu0 %v2477_v44  ;;  %v824_v62 = vld [vmem:[#allocation5 + $0x1838] sm:$0xff]  ;;  %v2421_v2 = vpack.c.bf16 %v248_v60, %v230_v59  ;;  %v247_v4 = vld [vmem:[#allocation5 + $0x630] sm:$0xff]  ;;  %v805_v5 = vld [vmem:[#allocation5 + $0x17a0] sm:$0xff] }
  0x37   :  { %v2485_v6 = vpack.c.bf16 %v824_v62, %v806_v61  ;;  %v823_v7 = vld [vmem:[#allocation5 + $0x1830] sm:$0xff]  ;;  %v266_v8 = vld [vmem:[#allocation5 + $0x6c8] sm:$0xff]  ;;  %v284_v9 = vld [vmem:[#allocation5 + $0x758] sm:$0xff]  ;;  %v2423_v12 = vpack.c.bf16 %v247_v4, %v229_v3 }
  0x38   :  { %2416 = vmatpush1.bf16.msra.mxu1 %v2415_v51  ;;  %v842_v10 = vld [vmem:[#allocation5 + $0x18c8] sm:$0xff]  ;;  %v860_v11 = vld [vmem:[#allocation5 + $0x1958] sm:$0xff]  ;;  %v2487_v13 = vpack.c.bf16 %v823_v7, %v805_v5  ;;  %v2425_v14 = vpack.c.bf16 %v284_v9, %v266_v8  ;;  %v265_v15 = vld [vmem:[#allocation5 + $0x6c0] sm:$0xff] }
  0x39   :  { %2480 = vmatpush1.bf16.msra.mxu0 %v2479_v52  ;;  %2418 = vmatprep.subr.bf16.mxu1 %v2417_v53  ;;  %v283_v16 = vld [vmem:[#allocation5 + $0x750] sm:$0xff]  ;;  %v841_v17 = vld [vmem:[#allocation5 + $0x18c0] sm:$0xff]  ;;  %v2489_v18 = vpack.c.bf16 %v860_v11, %v842_v10  ;;  %v302_v20 = vld [vmem:[#allocation5 + $0x7e8] sm:$0xff] }
  0x3a   :  { %2482 = vmatprep.subr.bf16.mxu0 %v2481_v57  ;;  %v859_v19 = vld [vmem:[#allocation5 + $0x1950] sm:$0xff]  ;;  %v320_v21 = vld [vmem:[#allocation5 + $0x878] sm:$0xff]  ;;  %v878_v23 = vld [vmem:[#allocation5 + $0x19e8] sm:$0xff]  ;;  %v2427_v25 = vpack.c.bf16 %v283_v16, %v265_v15 }
  0x3b   :  { %v896_v24 = vld [vmem:[#allocation5 + $0x1a78] sm:$0xff]  ;;  %v2491_v26 = vpack.c.bf16 %v859_v19, %v841_v17  ;;  %v2429_v27 = vpack.c.bf16 %v320_v21, %v302_v20  ;;  %v301_v28 = vld [vmem:[#allocation5 + $0x7e0] sm:$0xff]  ;;  %v319_v29 = vld [vmem:[#allocation5 + $0x870] sm:$0xff] }
  0x3c   :  { %2420 = vmatpush1.bf16.msra.mxu1 %v2419_v63  ;;  %v877_v30 = vld [vmem:[#allocation5 + $0x19e0] sm:$0xff]  ;;  %v2493_v31 = vpack.c.bf16 %v896_v24, %v878_v23  ;;  %v895_v32 = vld [vmem:[#allocation5 + $0x1a70] sm:$0xff]  ;;  %v338_v33 = vld [vmem:[#allocation5 + $0x908] sm:$0xff]  ;;  %v2431_v37 = vpack.c.bf16 %v319_v29, %v301_v28 }
  0x3d   :  { %2484 = vmatpush1.bf16.msra.mxu0 %v2483_v1  ;;  %2422 = vmatprep.subr.bf16.mxu1 %v2421_v2  ;;  %v356_v34 = vld [vmem:[#allocation5 + $0x998] sm:$0xff]  ;;  %v54_v35 = vld [vmem:[#allocation5 + $0x28] sm:$0xff]  ;;  %v2495_v38 = vpack.c.bf16 %v895_v32, %v877_v30  ;;  %v337_v40 = vld [vmem:[#allocation5 + $0x900] sm:$0xff] }
  0x3e   :  { %2486 = vmatprep.subr.bf16.mxu0 %v2485_v6  ;;  %v72_v36 = vld [vmem:[#allocation5 + $0xb8] sm:$0xff]  ;;  %v2433_v39 = vpack.c.bf16 %v356_v34, %v338_v33  ;;  %v355_v41 = vld [vmem:[#allocation5 + $0x990] sm:$0xff]  ;;  %v53_v42 = vld [vmem:[#allocation5 + $0x20] sm:$0xff] }
  0x3f   :  { %v2593_v43 = vpack.c.bf16 %v72_v36, %v54_v35  ;;  %v71_v44 = vld [vmem:[#allocation5 + $0xb0] sm:$0xff]  ;;  %v374_v45 = vld [vmem:[#allocation5 + $0xa28] sm:$0xff]  ;;  %v392_v46 = vld [vmem:[#allocation5 + $0xab8] sm:$0xff]  ;;  %v2435_v49 = vpack.c.bf16 %v355_v41, %v337_v40 }
  0x40   :  { %2424 = vmatpush1.bf16.msra.mxu1 %v2423_v12  ;;  %v90_v47 = vld [vmem:[#allocation5 + $0x148] sm:$0xff]  ;;  %v108_v48 = vld [vmem:[#allocation5 + $0x1d8] sm:$0xff]  ;;  %v3488_v50 = vld [vmem:[#allocation2 + $0x10] sm:$0xff]  ;;  %v2595_v51 = vpack.c.bf16 %v71_v44, %v53_v42  ;;  %v2437_v52 = vpack.c.bf16 %v392_v46, %v374_v45 }
  0x41   :  { %2488 = vmatpush1.bf16.msra.mxu0 %v2487_v13  ;;  %2426 = vmatprep.subr.bf16.mxu1 %v2425_v14  ;;  %v373_v53 = vld [vmem:[#allocation5 + $0xa20] sm:$0xff]  ;;  %v391_v54 = vld [vmem:[#allocation5 + $0xab0] sm:$0xff]  ;;  %v2597_v56 = vpack.c.bf16 %v108_v48, %v90_v47  ;;  %v410_v58 = vld [vmem:[#allocation5 + $0xb48] sm:$0xff] }
  0x42   :  { %2490 = vmatprep.subr.bf16.mxu0 %v2489_v18  ;;  %v89_v55 = vld [vmem:[#allocation5 + $0x140] sm:$0xff]  ;;  %v107_v57 = vld [vmem:[#allocation5 + $0x1d0] sm:$0xff]  ;;  %v428_v59 = vld [vmem:[#allocation5 + $0xbd8] sm:$0xff]  ;;  %v2439_v62 = vpack.c.bf16 %v391_v54, %v373_v53 }
  0x43   :  { %v126_v60 = vld [vmem:[#allocation5 + $0x268] sm:$0xff]  ;;  %v144_v61 = vld [vmem:[#allocation5 + $0x2f8] sm:$0xff]  ;;  %v2599_v63 = vpack.c.bf16 %v107_v57, %v89_v55  ;;  %v2441_v1 = vpack.c.bf16 %v428_v59, %v410_v58  ;;  %v409_v2 = vld [vmem:[#allocation5 + $0xb40] sm:$0xff] }
  0x44   :  { %2428 = vmatpush1.bf16.msra.mxu1 %v2427_v25  ;;  %v427_v3 = vld [vmem:[#allocation5 + $0xbd0] sm:$0xff]  ;;  %v125_v4 = vld [vmem:[#allocation5 + $0x260] sm:$0xff]  ;;  %v2601_v5 = vpack.c.bf16 %v144_v61, %v126_v60  ;;  %v446_v7 = vld [vmem:[#allocation5 + $0xc68] sm:$0xff] }
  0x45   :  { %2492 = vmatpush1.bf16.msra.mxu0 %v2491_v26  ;;  %2430 = vmatprep.subr.bf16.mxu1 %v2429_v27  ;;  %v143_v6 = vld [vmem:[#allocation5 + $0x2f0] sm:$0xff]  ;;  %v464_v8 = vld [vmem:[#allocation5 + $0xcf8] sm:$0xff]  ;;  %v162_v9 = vld [vmem:[#allocation5 + $0x388] sm:$0xff]  ;;  %v2443_v11 = vpack.c.bf16 %v427_v3, %v409_v2 }
  0x46   :  { %2494 = vmatprep.subr.bf16.mxu0 %v2493_v31  ;;  %v180_v10 = vld [vmem:[#allocation5 + $0x418] sm:$0xff]  ;;  %v2603_v12 = vpack.c.bf16 %v143_v6, %v125_v4  ;;  %v2445_v13 = vpack.c.bf16 %v464_v8, %v446_v7  ;;  %v445_v14 = vld [vmem:[#allocation5 + $0xc60] sm:$0xff]  ;;  %v463_v15 = vld [vmem:[#allocation5 + $0xcf0] sm:$0xff] }
  0x47   :  { %v161_v16 = vld [vmem:[#allocation5 + $0x380] sm:$0xff]  ;;  %v2605_v17 = vpack.c.bf16 %v180_v10, %v162_v9  ;;  %v179_v18 = vld [vmem:[#allocation5 + $0x410] sm:$0xff]  ;;  %v482_v19 = vld [vmem:[#allocation5 + $0xd88] sm:$0xff]  ;;  %v2447_v24 = vpack.c.bf16 %v463_v15, %v445_v14 }
  0x48   :  { %2432 = vmatpush1.bf16.msra.mxu1 %v2431_v37  ;;  %v500_v20 = vld [vmem:[#allocation5 + $0xe18] sm:$0xff]  ;;  %v198_v21 = vld [vmem:[#allocation5 + $0x4a8] sm:$0xff]  ;;  %v2607_v25 = vpack.c.bf16 %v179_v18, %v161_v16  ;;  %v481_v27 = vld [vmem:[#allocation5 + $0xd80] sm:$0xff] }
  0x49   :  { %2496 = vmatpush1.bf16.msra.mxu0 %v2495_v38  ;;  %2434 = vmatprep.subr.bf16.mxu1 %v2433_v39  ;;  %v216_v22 = vld [vmem:[#allocation5 + $0x538] sm:$0xff]  ;;  %v2449_v26 = vpack.c.bf16 %v500_v20, %v482_v19  ;;  %v499_v28 = vld [vmem:[#allocation5 + $0xe10] sm:$0xff]  ;;  %v197_v29 = vld [vmem:[#allocation5 + $0x4a0] sm:$0xff] }
  0x4a   :  { %2594 = vmatprep.subr.bf16.mxu0 %v2593_v43  ;;  %v3492_v23 = vld [vmem:[#allocation2 + $0x8] sm:$0xff]  ;;  %v2609_v30 = vpack.c.bf16 %v216_v22, %v198_v21  ;;  %v215_v31 = vld [vmem:[#allocation5 + $0x530] sm:$0xff]  ;;  %v518_v32 = vld [vmem:[#allocation5 + $0xea8] sm:$0xff]  ;;  %v2451_v36 = vpack.c.bf16 %v499_v28, %v481_v27 }
  0x4b   :  { %989 = vmatprep.mubr.f32.mxu1 %v3492_v23  ;;  %v536_v33 = vld [vmem:[#allocation5 + $0xf38] sm:$0xff]  ;;  %v234_v34 = vld [vmem:[#allocation5 + $0x5c8] sm:$0xff]  ;;  %v2611_v37 = vpack.c.bf16 %v215_v31, %v197_v29  ;;  %v517_v39 = vld [vmem:[#allocation5 + $0xea0] sm:$0xff] }
  0x4c   :  { %2436 = vmatpush1.bf16.msra.mxu1 %v2435_v49  ;;  %1067 = vmatmul.mubr.f32.vlgmr.msra.gmra.mrb[0].mxu0 %v3488_v50  ;;  %v252_v35 = vld [vmem:[#allocation5 + $0x658] sm:$0xff]  ;;  %v2453_v38 = vpack.c.bf16 %v536_v33, %v518_v32  ;;  %v535_v40 = vld [vmem:[#allocation5 + $0xf30] sm:$0xff]  ;;  %v233_v41 = vld [vmem:[#allocation5 + $0x5c0] sm:$0xff] }
  0x4d   :  { %2596 = vmatpush1.bf16.msra.mxu0 %v2595_v51  ;;  %2438 = vmatprep.subr.bf16.mxu1 %v2437_v52  ;;  %v2613_v42 = vpack.c.bf16 %v252_v35, %v234_v34  ;;  %v251_v43 = vld [vmem:[#allocation5 + $0x650] sm:$0xff]  ;;  %v554_v44 = vld [vmem:[#allocation5 + $0xfc8] sm:$0xff]  ;;  %v572_v45 = vld [vmem:[#allocation5 + $0x1058] sm:$0xff]  ;;  %v2455_v48 = vpack.c.bf16 %v535_v40, %v517_v39 }
  0x4e   :  { %2598 = vmatprep.subr.bf16.mxu0 %v2597_v56  ;;  %1072 = vmatprep.mubr.f32.mxu0 %v3437_v0  ;;  %v270_v46 = vld [vmem:[#allocation5 + $0x6e8] sm:$0xff]  ;;  %v288_v47 = vld [vmem:[#allocation5 + $0x778] sm:$0xff]  ;;  %v2615_v49 = vpack.c.bf16 %v251_v43, %v233_v41  ;;  %v2457_v51 = vpack.c.bf16 %v572_v45, %v554_v44  ;;  %v553_v52 = vld [vmem:[#allocation5 + $0xfc0] sm:$0xff] }
  0x4f   :  { %v571_v53 = vld [vmem:[#allocation5 + $0x1050] sm:$0xff]  ;;  %v269_v54 = vld [vmem:[#allocation5 + $0x6e0] sm:$0xff]  ;;  %v2617_v55 = vpack.c.bf16 %v288_v47, %v270_v46  ;;  %v590_v57 = vld [vmem:[#allocation5 + $0x10e8] sm:$0xff] }
  0x50   :  { %2440 = vmatpush1.bf16.msra.mxu1 %v2439_v62  ;;  %v287_v56 = vld [vmem:[#allocation5 + $0x770] sm:$0xff]  ;;  %v608_v58 = vld [vmem:[#allocation5 + $0x1178] sm:$0xff]  ;;  %v306_v59 = vld [vmem:[#allocation5 + $0x808] sm:$0xff]  ;;  %v2459_v61 = vpack.c.bf16 %v571_v53, %v553_v52 }
  0x51   :  { %2600 = vmatpush1.bf16.msra.mxu0 %v2599_v63  ;;  %2442 = vmatprep.subr.bf16.mxu1 %v2441_v1  ;;  %v324_v60 = vld [vmem:[#allocation5 + $0x898] sm:$0xff]  ;;  %v2619_v62 = vpack.c.bf16 %v287_v56, %v269_v54  ;;  %v2461_v63 = vpack.c.bf16 %v608_v58, %v590_v57  ;;  %v589_v1 = vld [vmem:[#allocation5 + $0x10e0] sm:$0xff]  ;;  %v607_v2 = vld [vmem:[#allocation5 + $0x1170] sm:$0xff] }
  0x52   :  { %2602 = vmatprep.subr.bf16.mxu0 %v2601_v5  ;;  %v305_v3 = vld [vmem:[#allocation5 + $0x800] sm:$0xff]  ;;  %v2621_v4 = vpack.c.bf16 %v324_v60, %v306_v59  ;;  %v323_v5 = vld [vmem:[#allocation5 + $0x890] sm:$0xff]  ;;  %v52_v6 = vld [vmem:[#allocation5 + $0x18] sm:$0xff]  ;;  %v2463_v10 = vpack.c.bf16 %v607_v2, %v589_v1 }
  0x53   :  { %v70_v7 = vld [vmem:[#allocation5 + $0xa8] sm:$0xff]  ;;  %v360_v9 = vld [vmem:[#allocation5 + $0x9b8] sm:$0xff]  ;;  %v69_v14 = vld [vmem:[#allocation5 + $0xa0] sm:$0xff] }
  0x54   :  { %2444 = vmatpush1.bf16.msra.mxu1 %v2443_v11  ;;  %v342_v8 = vld [vmem:[#allocation5 + $0x928] sm:$0xff]  ;;  %v2623_v11 = vpack.c.bf16 %v323_v5, %v305_v3  ;;  %v341_v15 = vld [vmem:[#allocation5 + $0x920] sm:$0xff]  ;;  %v88_v18 = vld [vmem:[#allocation5 + $0x138] sm:$0xff] }
  0x55   :  { %2604 = vmatpush1.bf16.msra.mxu0 %v2603_v12  ;;  %2446 = vmatprep.subr.bf16.mxu1 %v2445_v13  ;;  %v2497_v12 = vpack.c.bf16 %v70_v7, %v52_v6  ;;  %v51_v13 = vld [vmem:[#allocation5 + $0x10] sm:$0xff]  ;;  %v2625_v16 = vpack.c.bf16 %v360_v9, %v342_v8  ;;  %v106_v19 = vld [vmem:[#allocation5 + $0x1c8] sm:$0xff]  ;;  %v396_v21 = vld [vmem:[#allocation5 + $0xad8] sm:$0xff] }
  0x56   :  { %2606 = vmatprep.subr.bf16.mxu0 %v2605_v17  ;;  %v359_v17 = vld [vmem:[#allocation5 + $0x9b0] sm:$0xff]  ;;  %v378_v20 = vld [vmem:[#allocation5 + $0xa48] sm:$0xff]  ;;  %v3495_v22 = vld [vmem:[#allocation2 + $0x28] sm:$0xff]  ;;  %v2501_v27 = vpack.c.bf16 %v106_v19, %v88_v18 }
  0x57   :  { %1073 = vmatmul.mubr.f32.gmra.mrb[2].mxu0 %v3495_v22  ;;  %v87_v28 = vld [vmem:[#allocation5 + $0x130] sm:$0xff]  ;;  %v105_v29 = vld [vmem:[#allocation5 + $0x1c0] sm:$0xff]  ;;  %v2629_v31 = vpack.c.bf16 %v396_v21, %v378_v20  ;;  %v124_v33 = vld [vmem:[#allocation5 + $0x258] sm:$0xff] }
  0x58   :  { %2448 = vmatpush1.bf16.msra.mxu1 %v2447_v24  ;;  %v3497_v24 = vld [vmem:[#allocation2] sm:$0xff]  ;;  %v142_v34 = vld [vmem:[#allocation5 + $0x2e8] sm:$0xff]  ;;  %1297 = vmatprep.mubr.f32.mxu0 %v3492_v23  ;;  %v141_v41 = vld [vmem:[#allocation5 + $0x2e0] sm:$0xff] }
  0x59   :  { %2608 = vmatpush1.bf16.msra.mxu0 %v2607_v25  ;;  %2450 = vmatprep.subr.bf16.mxu1 %v2449_v26  ;;  %v2499_v25 = vpack.c.bf16 %v69_v14, %v51_v13  ;;  %v2627_v26 = vpack.c.bf16 %v359_v17, %v341_v15  ;;  %v395_v32 = vld [vmem:[#allocation5 + $0xad0] sm:$0xff]  ;;  %v414_v35 = vld [vmem:[#allocation5 + $0xb68] sm:$0xff]  ;;  %v2505_v39 = vpack.c.bf16 %v142_v34, %v124_v33  ;;  %v160_v45 = vld [vmem:[#allocation5 + $0x378] sm:$0xff] }
  0x5a   :  { %2610 = vmatprep.subr.bf16.mxu0 %v2609_v30  ;;  %v377_v30 = vld [vmem:[#allocation5 + $0xa40] sm:$0xff]  ;;  %v123_v40 = vld [vmem:[#allocation5 + $0x250] sm:$0xff]  ;;  %v178_v46 = vld [vmem:[#allocation5 + $0x408] sm:$0xff] }
  0x5b   :  { %v431_v44 = vld [vmem:[#allocation5 + $0xbf0] sm:$0xff]  ;;  %v450_v47 = vld [vmem:[#allocation5 + $0xc88] sm:$0xff]  ;;  %v2509_v52 = vpack.c.bf16 %v178_v46, %v160_v45  ;;  %v177_v54 = vld [vmem:[#allocation5 + $0x400] sm:$0xff] }
  0x5c   :  { %2452 = vmatpush1.bf16.msra.mxu1 %v2451_v36  ;;  %v432_v36 = vld [vmem:[#allocation5 + $0xbf8] sm:$0xff]  ;;  %v159_v53 = vld [vmem:[#allocation5 + $0x370] sm:$0xff]  ;;  %v214_v59 = vld [vmem:[#allocation5 + $0x528] sm:$0xff] }
  0x5d   :  { %2612 = vmatpush1.bf16.msra.mxu0 %v2611_v37  ;;  %2454 = vmatprep.subr.bf16.mxu1 %v2453_v38  ;;  %v2503_v37 = vpack.c.bf16 %v105_v29, %v87_v28  ;;  %v2631_v38 = vpack.c.bf16 %v395_v32, %v377_v30  ;;  %v2633_v43 = vpack.c.bf16 %v432_v36, %v414_v35  ;;  %v467_v57 = vld [vmem:[#allocation5 + $0xd10] sm:$0xff]  ;;  %v196_v58 = vld [vmem:[#allocation5 + $0x498] sm:$0xff]  ;;  %v486_v60 = vld [vmem:[#allocation5 + $0xda8] sm:$0xff] }
  0x5e   :  { %2614 = vmatprep.subr.bf16.mxu0 %v2613_v42  ;;  %v413_v42 = vld [vmem:[#allocation5 + $0xb60] sm:$0xff]  ;;  %v2513_v1 = vpack.c.bf16 %v214_v59, %v196_v58  ;;  %v195_v2 = vld [vmem:[#allocation5 + $0x490] sm:$0xff]  ;;  %v232_v7 = vld [vmem:[#allocation5 + $0x5b8] sm:$0xff] }
  0x5f   :  { %v213_v3 = vld [vmem:[#allocation5 + $0x520] sm:$0xff]  ;;  %v503_v6 = vld [vmem:[#allocation5 + $0xe30] sm:$0xff]  ;;  %v250_v8 = vld [vmem:[#allocation5 + $0x648] sm:$0xff] }
  0x60   :  { %2456 = vmatpush1.bf16.msra.mxu1 %v2455_v48  ;;  %v468_v48 = vld [vmem:[#allocation5 + $0xd18] sm:$0xff]  ;;  %v522_v9 = vld [vmem:[#allocation5 + $0xec8] sm:$0xff]  ;;  %v2517_v14 = vpack.c.bf16 %v250_v8, %v232_v7  ;;  %v249_v15 = vld [vmem:[#allocation5 + $0x640] sm:$0xff] }
  0x61   :  { %2616 = vmatpush1.bf16.msra.mxu0 %v2615_v49  ;;  %2458 = vmatprep.subr.bf16.mxu1 %v2457_v51  ;;  %v2507_v49 = vpack.c.bf16 %v141_v41, %v123_v40  ;;  %v2635_v51 = vpack.c.bf16 %v431_v44, %v413_v42  ;;  %v2637_v56 = vpack.c.bf16 %v468_v48, %v450_v47  ;;  %v539_v17 = vld [vmem:[#allocation5 + $0xf50] sm:$0xff]  ;;  %v268_v19 = vld [vmem:[#allocation5 + $0x6d8] sm:$0xff]  ;;  %v286_v20 = vld [vmem:[#allocation5 + $0x768] sm:$0xff] }
  0x62   :  { %2618 = vmatprep.subr.bf16.mxu0 %v2617_v55  ;;  %v449_v55 = vld [vmem:[#allocation5 + $0xc80] sm:$0xff]  ;;  %v3502_v21 = vld [vmem:[#allocation2 + $0x20] sm:$0xff]  ;;  %v3505_v28 = vld [vmem:[#allocation2 + $0x18] sm:$0xff]  ;;  %v2521_v30 = vpack.c.bf16 %v286_v20, %v268_v19 }
  0x63   :  { %v285_v32 = vld [vmem:[#allocation5 + $0x760] sm:$0xff]  ;;  %v575_v35 = vld [vmem:[#allocation5 + $0x1070] sm:$0xff]  ;;  %v304_v36 = vld [vmem:[#allocation5 + $0x7f8] sm:$0xff] }
  0x64   :  { %2460 = vmatpush1.bf16.msra.mxu1 %v2459_v61  ;;  %v504_v61 = vld [vmem:[#allocation5 + $0xe38] sm:$0xff]  ;;  %v557_v33 = vld [vmem:[#allocation5 + $0xfe0] sm:$0xff]  ;;  %v611_v47 = vld [vmem:[#allocation5 + $0x1190] sm:$0xff] }
  0x65   :  { %2620 = vmatpush1.bf16.msra.mxu0 %v2619_v62  ;;  %2462 = vmatprep.subr.bf16.mxu1 %v2461_v63  ;;  %v2511_v62 = vpack.c.bf16 %v177_v54, %v159_v53  ;;  %v2639_v63 = vpack.c.bf16 %v467_v57, %v449_v55  ;;  %v2641_v5 = vpack.c.bf16 %v504_v61, %v486_v60  ;;  %v321_v44 = vld [vmem:[#allocation5 + $0x880] sm:$0xff]  ;;  %v340_v48 = vld [vmem:[#allocation5 + $0x918] sm:$0xff]  ;;  %v647_v60 = vld [vmem:[#allocation5 + $0x12b0] sm:$0xff] }
  0x66   :  { %2622 = vmatprep.subr.bf16.mxu0 %v2621_v4  ;;  %v485_v4 = vld [vmem:[#allocation5 + $0xda0] sm:$0xff]  ;;  %v2651_v41 = vpack.c.bf16 %v575_v35, %v557_v33  ;;  %v376_v61 = vld [vmem:[#allocation5 + $0xa38] sm:$0xff]  ;;  %v447_v35 = vld [vmem:[#allocation5 + $0xc70] sm:$0xff] }
  0x67   :  { %v2643_v13 = vpack.c.bf16 %v503_v6, %v485_v4  ;;  %v593_v45 = vld [vmem:[#allocation5 + $0x1100] sm:$0xff] }
  0x68   :  { %2464 = vmatpush1.bf16.msra.mxu1 %v2463_v10  ;;  %v540_v10 = vld [vmem:[#allocation5 + $0xf58] sm:$0xff]  ;;  %v2655_v54 = vpack.c.bf16 %v611_v47, %v593_v45  ;;  %v357_v57 = vld [vmem:[#allocation5 + $0x9a0] sm:$0xff]  ;;  %v483_v47 = vld [vmem:[#allocation5 + $0xd90] sm:$0xff] }
  0x69   :  { %2624 = vmatpush1.bf16.msra.mxu0 %v2623_v11  ;;  %2498 = vmatprep.subr.bf16.mxu1 %v2497_v12  ;;  %v2515_v11 = vpack.c.bf16 %v213_v3, %v195_v2  ;;  %v231_v12 = vld [vmem:[#allocation5 + $0x5b0] sm:$0xff]  ;;  %v2645_v18 = vpack.c.bf16 %v540_v10, %v522_v9  ;;  %v629_v58 = vld [vmem:[#allocation5 + $0x1220] sm:$0xff]  ;;  %v412_v10 = vld [vmem:[#allocation5 + $0xb58] sm:$0xff] }
  0x6a   :  { %2626 = vmatprep.subr.bf16.mxu0 %v2625_v16  ;;  %v521_v16 = vld [vmem:[#allocation5 + $0xec0] sm:$0xff]  ;;  %v2659_v3 = vpack.c.bf16 %v647_v60, %v629_v58  ;;  %v683_v9 = vld [vmem:[#allocation5 + $0x13d0] sm:$0xff] }
  0x6b   :  { %990 = vmatmul.mubr.f32.vlgmr.msra.gmra.mrb[0].mxu1 %v3497_v24  ;;  %v2647_v29 = vpack.c.bf16 %v539_v17, %v521_v16  ;;  %v393_v6 = vld [vmem:[#allocation5 + $0xac0] sm:$0xff]  ;;  %v519_v60 = vld [vmem:[#allocation5 + $0xeb0] sm:$0xff] }
  0x6c   :  { %2500 = vmatpush1.bf16.msra.mxu1 %v2499_v25  ;;  %v558_v25 = vld [vmem:[#allocation5 + $0xfe8] sm:$0xff]  ;;  %995 = vmatprep.mubr.f32.mxu1 %v3502_v21  ;;  %v665_v7 = vld [vmem:[#allocation5 + $0x1340] sm:$0xff] }
  0x6d   :  { %2628 = vmatpush1.bf16.msra.mxu0 %v2627_v26  ;;  %2502 = vmatprep.subr.bf16.mxu1 %v2501_v27  ;;  %v576_v26 = vld [vmem:[#allocation5 + $0x1078] sm:$0xff]  ;;  %v2519_v27 = vpack.c.bf16 %v249_v15, %v231_v12  ;;  %v702_v12 = vld [vmem:[#allocation5 + $0x1468] sm:$0xff]  ;;  %v913_v15 = vld [vmem:[%s3670_s2] sm:$0xff]  ;;  %v2663_v16 = vpack.c.bf16 %v683_v9, %v665_v7 }
  0x6e   :  { %2630 = vmatprep.subr.bf16.mxu0 %v2629_v31  ;;  %v267_v31 = vld [vmem:[#allocation5 + $0x6d0] sm:$0xff]  ;;  %v2649_v34 = vpack.c.bf16 %v576_v26, %v558_v25  ;;  %v429_v19 = vld [vmem:[#allocation5 + $0xbe0] sm:$0xff]  ;;  %917 = vperm.xlu0 %3346, %v913_v15   ;;  %v610_v15 = vld [vmem:[#allocation5 + $0x1188] sm:$0xff] }
  0x6f   :  { %996 = vmatmul.mubr.f32.gmra.mrb[2].mxu1 %v3505_v28  ;;  %v2523_v40 = vpack.c.bf16 %v285_v32, %v267_v31  ;;  %v701_v20 = vld [vmem:[#allocation5 + $0x1460] sm:$0xff]  ;;  %v719_v26 = vld [vmem:[#allocation5 + $0x14f0] sm:$0xff]  ;;  %v756_v31 = vld [vmem:[#allocation5 + $0x1618] sm:$0xff] }
  0x70   :  { %2504 = vmatpush1.bf16.msra.mxu1 %v2503_v37  ;;  %v322_v37 = vld [vmem:[#allocation5 + $0x888] sm:$0xff]  ;;  %1143 = vmatprep.mubr.f32.mxu1 %v3492_v23  ;;  %v2667_v33 = vpack.c.bf16 %v719_v26, %v701_v20  ;;  %v555_v9 = vld [vmem:[#allocation5 + $0xfd0] sm:$0xff]  ;;  %v609_v26 = vld [vmem:[#allocation5 + $0x1180] sm:$0xff] }
  0x71   :  { %2632 = vmatpush1.bf16.msra.mxu0 %v2631_v38  ;;  %2506 = vmatprep.subr.bf16.mxu1 %v2505_v39  ;;  %v594_v38 = vld [vmem:[#allocation5 + $0x1108] sm:$0xff]  ;;  %v612_v39 = vld [vmem:[#allocation5 + $0x1198] sm:$0xff]  ;;  %v2525_v42 = vpack.c.bf16 %v322_v37, %v304_v36  ;;  %v465_v36 = vld [vmem:[#allocation5 + $0xd00] sm:$0xff] }
  0x72   :  { %2634 = vmatprep.subr.bf16.mxu0 %v2633_v43  ;;  %v303_v43 = vld [vmem:[#allocation5 + $0x7f0] sm:$0xff]  ;;  %v2653_v46 = vpack.c.bf16 %v612_v39, %v594_v38  ;;  %v737_v37 = vld [vmem:[#allocation5 + $0x1580] sm:$0xff] }
  0x73   :  { %v2527_v53 = vpack.c.bf16 %v321_v44, %v303_v43  ;;  %v755_v39 = vld [vmem:[#allocation5 + $0x1610] sm:$0xff]  ;;  %v792_v43 = vld [vmem:[#allocation5 + $0x1738] sm:$0xff]  ;;  %v2543_v44 = vpack.c.bf16 %v465_v36, %v447_v35 }
  0x74   :  { %2508 = vmatpush1.bf16.msra.mxu1 %v2507_v49  ;;  %v358_v49 = vld [vmem:[#allocation5 + $0x9a8] sm:$0xff]  ;;  %v2671_v45 = vpack.c.bf16 %v755_v39, %v737_v37  ;;  %v645_v39 = vld [vmem:[#allocation5 + $0x12a0] sm:$0xff] }
  0x75   :  { %2636 = vmatpush1.bf16.msra.mxu0 %v2635_v51  ;;  %2510 = vmatprep.subr.bf16.mxu1 %v2509_v52  ;;  %v630_v51 = vld [vmem:[#allocation5 + $0x1228] sm:$0xff]  ;;  %v648_v52 = vld [vmem:[#allocation5 + $0x12b8] sm:$0xff]  ;;  %v2529_v55 = vpack.c.bf16 %v358_v49, %v340_v48  ;;  %v501_v48 = vld [vmem:[#allocation5 + $0xe20] sm:$0xff] }
  0x76   :  { %2638 = vmatprep.subr.bf16.mxu0 %v2637_v56  ;;  %v339_v56 = vld [vmem:[#allocation5 + $0x910] sm:$0xff]  ;;  %v2657_v59 = vpack.c.bf16 %v648_v52, %v630_v51  ;;  %v773_v49 = vld [vmem:[#allocation5 + $0x16a0] sm:$0xff] }
  0x77   :  { %v2531_v2 = vpack.c.bf16 %v357_v57, %v339_v56  ;;  %v791_v52 = vld [vmem:[#allocation5 + $0x1730] sm:$0xff]  ;;  %v828_v56 = vld [vmem:[#allocation5 + $0x1858] sm:$0xff]  ;;  %v2547_v57 = vpack.c.bf16 %v501_v48, %v483_v47 }
  0x78   :  { %2512 = vmatpush1.bf16.msra.mxu1 %v2511_v62  ;;  %v394_v62 = vld [vmem:[#allocation5 + $0xac8] sm:$0xff]  ;;  %v2675_v58 = vpack.c.bf16 %v791_v52, %v773_v49  ;;  %v681_v52 = vld [vmem:[#allocation5 + $0x13c0] sm:$0xff] }
  0x79   :  { %2640 = vmatpush1.bf16.msra.mxu0 %v2639_v63  ;;  %2514 = vmatprep.subr.bf16.mxu1 %v2513_v1  ;;  %v666_v63 = vld [vmem:[#allocation5 + $0x1348] sm:$0xff]  ;;  %v684_v1 = vld [vmem:[#allocation5 + $0x13d8] sm:$0xff]  ;;  %v2533_v4 = vpack.c.bf16 %v394_v62, %v376_v61  ;;  %v537_v61 = vld [vmem:[#allocation5 + $0xf40] sm:$0xff] }
  0x7a   :  { %2642 = vmatprep.subr.bf16.mxu0 %v2641_v5  ;;  %v375_v5 = vld [vmem:[#allocation5 + $0xa30] sm:$0xff]  ;;  %v2661_v8 = vpack.c.bf16 %v684_v1, %v666_v63  ;;  %v809_v62 = vld [vmem:[#allocation5 + $0x17c0] sm:$0xff] }
  0x7b   :  { %v827_v1 = vld [vmem:[#allocation5 + $0x1850] sm:$0xff] }
  0x7c   :  { %2516 = vmatpush1.bf16.msra.mxu1 %v2515_v11  ;;  %v430_v11 = vld [vmem:[#allocation5 + $0xbe8] sm:$0xff]  ;;  %v2679_v7 = vpack.c.bf16 %v827_v1, %v809_v62  ;;  %v717_v1 = vld [vmem:[#allocation5 + $0x14e0] sm:$0xff] }
  0x7d   :  { %2644 = vmatpush1.bf16.msra.mxu0 %v2643_v13  ;;  %2518 = vmatprep.subr.bf16.mxu1 %v2517_v14  ;;  %v720_v13 = vld [vmem:[#allocation5 + $0x14f8] sm:$0xff]  ;;  %v2535_v14 = vpack.c.bf16 %v393_v6, %v375_v5  ;;  %v2537_v17 = vpack.c.bf16 %v430_v11, %v412_v10  ;;  %v2551_v6 = vpack.c.bf16 %v537_v61, %v519_v60  ;;  %v573_v10 = vld [vmem:[#allocation5 + $0x1060] sm:$0xff] }
  0x7e   :  { %2646 = vmatprep.subr.bf16.mxu0 %v2645_v18  ;;  %v411_v18 = vld [vmem:[#allocation5 + $0xb50] sm:$0xff]  ;;  %v2665_v25 = vpack.c.bf16 %v720_v13, %v702_v12  ;;  %v864_v5 = vld [vmem:[#allocation5 + $0x1978] sm:$0xff]  ;;  %v845_v11 = vld [vmem:[#allocation5 + $0x18e0] sm:$0xff] }
  0x7f   :  { %v2539_v32 = vpack.c.bf16 %v429_v19, %v411_v18  ;;  %v863_v13 = vld [vmem:[#allocation5 + $0x1970] sm:$0xff]  ;;  %v2555_v18 = vpack.c.bf16 %v573_v10, %v555_v9 }
  0x80   :  { %2520 = vmatpush1.bf16.msra.mxu1 %v2519_v27  ;;  %v448_v27 = vld [vmem:[#allocation5 + $0xc78] sm:$0xff]  ;;  %v2683_v19 = vpack.c.bf16 %v863_v13, %v845_v11  ;;  %v735_v10 = vld [vmem:[#allocation5 + $0x1570] sm:$0xff]  ;;  %v753_v11 = vld [vmem:[#allocation5 + $0x1600] sm:$0xff] }
  0x81   :  { %2648 = vmatpush1.bf16.msra.mxu0 %v2647_v29  ;;  %2522 = vmatprep.subr.bf16.mxu1 %v2521_v30  ;;  %v466_v29 = vld [vmem:[#allocation5 + $0xd08] sm:$0xff] }
  0x82   :  { %2650 = vmatprep.subr.bf16.mxu0 %v2649_v34  ;;  %v738_v30 = vld [vmem:[#allocation5 + $0x1588] sm:$0xff]  ;;  %v2541_v34 = vpack.c.bf16 %v466_v29, %v448_v27  ;;  %v881_v27 = vld [vmem:[#allocation5 + $0x1a00] sm:$0xff] }
  0x83   :  { %v2669_v38 = vpack.c.bf16 %v756_v31, %v738_v30  ;;  %v899_v30 = vld [vmem:[#allocation5 + $0x1a90] sm:$0xff]  ;;  %v628_v31 = vld [vmem:[#allocation5 + $0x1218] sm:$0xff] }
  0x84   :  { %2524 = vmatpush1.bf16.msra.mxu1 %v2523_v40  ;;  %v484_v40 = vld [vmem:[#allocation5 + $0xd98] sm:$0xff]  ;;  %v2687_v36 = vpack.c.bf16 %v899_v30, %v881_v27  ;;  %v789_v27 = vld [vmem:[#allocation5 + $0x1720] sm:$0xff] }
  0x85   :  { %2652 = vmatpush1.bf16.msra.mxu0 %v2651_v41  ;;  %2526 = vmatprep.subr.bf16.mxu1 %v2525_v42  ;;  %v502_v41 = vld [vmem:[#allocation5 + $0xe28] sm:$0xff]  ;;  %v914_v30 = vld [vmem:[%s3670_s2 + $0x8] sm:$0xff]  ;;  %s3439_s2 = smov [#allocation7]  }
  0x86   :  { %2654 = vmatprep.subr.bf16.mxu0 %v2653_v46  ;;  %v774_v42 = vld [vmem:[#allocation5 + $0x16a8] sm:$0xff]  ;;  %v2545_v46 = vpack.c.bf16 %v502_v41, %v484_v40  ;;  %v57_v40 = vld [vmem:[#allocation5 + $0x40] sm:$0xff]  ;;  %922 = vperm.xlu0 %3346, %v914_v30   ;;  %s2388_s15 = sshll.u32 %s3439_s2, 4  ;;  %s2389_s15 = int_to_ptr.vmem [resolvable:$true] %s2388_s15 }
  0x87   :  { %v2673_v51 = vpack.c.bf16 %v792_v43, %v774_v42  ;;  %v75_v42 = vld [vmem:[#allocation5 + $0xd0] sm:$0xff]  ;;  %v664_v43 = vld [vmem:[#allocation5 + $0x1338] sm:$0xff]  ;;  %v381_v30 = vld [vmem:[#allocation5 + $0xa60] sm:$0xff]  ;;  %s3403_s16 = scalar_lea.vmem %s2389_s15, 4608  ;;  %p3408_p3 = scmp.lt.s32.totalorder %s2389_s15, %s2389_s15 }
  0x88   :  { %2528 = vmatpush1.bf16.msra.mxu1 %v2527_v53  ;;  %v520_v53 = vld [vmem:[#allocation5 + $0xeb8] sm:$0xff]  ;;  %v2787_v48 = vpack.c.bf16 %v75_v42, %v57_v40  ;;  %v825_v40 = vld [vmem:[#allocation5 + $0x1840] sm:$0xff]  ;;  %p3404_p2 = scmp.ne.s32.totalorder %s2389_s15, %s3403_s16  ;;  %p3409_p4 = scmp.lt.s32.totalorder %s3403_s16, %s3403_s16 }
  0x89   :  { %2656 = vmatpush1.bf16.msra.mxu0 %v2655_v54  ;;  %2530 = vmatprep.subr.bf16.mxu1 %v2529_v55  ;;  %v538_v54 = vld [vmem:[#allocation5 + $0xf48] sm:$0xff] }
  0x8a   :  { %2658 = vmatprep.subr.bf16.mxu0 %v2657_v59  ;;  %v810_v55 = vld [vmem:[#allocation5 + $0x17c8] sm:$0xff]  ;;  %v2549_v59 = vpack.c.bf16 %v538_v54, %v520_v53  ;;  %v93_v53 = vld [vmem:[#allocation5 + $0x160] sm:$0xff]  ;;  %p3410_p5 = por %p3409_p4, %p3408_p3 }
  0x8b   :  { %v2677_v63 = vpack.c.bf16 %v828_v56, %v810_v55  ;;  %v111_v55 = vld [vmem:[#allocation5 + $0x1f0] sm:$0xff]  ;;  %v700_v56 = vld [vmem:[#allocation5 + $0x1458] sm:$0xff] }
  0x8c   :  { %2532 = vmatpush1.bf16.msra.mxu1 %v2531_v2  ;;  %1298 = vmatmul.mubr.f32.vlgmr.msra.gmra.mrb[4].mxu0 %v3497_v24  ;;  %v556_v2 = vld [vmem:[#allocation5 + $0xfd8] sm:$0xff]  ;;  %v2791_v61 = vpack.c.bf16 %v111_v55, %v93_v53  ;;  %v861_v53 = vld [vmem:[#allocation5 + $0x1960] sm:$0xff]  ;;  %p3411_p6 = pnand %p3410_p5, %p3404_p2 }
  0x8d   :  { %2660 = vmatpush1.bf16.msra.mxu0 %v2659_v3  ;;  %2534 = vmatprep.subr.bf16.mxu1 %v2533_v4  ;;  %v574_v3 = vld [vmem:[#allocation5 + $0x1068] sm:$0xff] }
  0x8e   :  { %2662 = vmatprep.subr.bf16.mxu0 %v2661_v8  ;;  %1303 = vmatprep.mubr.f32.mxu0 %v3502_v21  ;;  %v846_v4 = vld [vmem:[#allocation5 + $0x18e8] sm:$0xff]  ;;  %v2553_v8 = vpack.c.bf16 %v574_v3, %v556_v2  ;;  %v129_v2 = vld [vmem:[#allocation5 + $0x280] sm:$0xff] }
  0x8f   :  { %v2681_v12 = vpack.c.bf16 %v864_v5, %v846_v4  ;;  %v147_v4 = vld [vmem:[#allocation5 + $0x310] sm:$0xff]  ;;  %v736_v5 = vld [vmem:[#allocation5 + $0x1578] sm:$0xff] }
  0x90   :  { %2536 = vmatpush1.bf16.msra.mxu1 %v2535_v14  ;;  %1304 = vmatmul.mubr.f32.gmra.mrb[6].mxu0 %v3505_v28  ;;  %v592_v14 = vld [vmem:[#allocation5 + $0x10f8] sm:$0xff] }
  0x91   :  { %2664 = vmatpush1.bf16.msra.mxu0 %v2663_v16  ;;  %2538 = vmatprep.subr.bf16.mxu1 %v2537_v17  ;;  %v882_v16 = vld [vmem:[#allocation5 + $0x1a08] sm:$0xff]  ;;  %v900_v17 = vld [vmem:[#allocation5 + $0x1a98] sm:$0xff]  ;;  %v2557_v20 = vpack.c.bf16 %v610_v15, %v592_v14  ;;  %v183_v14 = vld [vmem:[#allocation5 + $0x430] sm:$0xff] }
  0x92   :  { %2666 = vmatprep.subr.bf16.mxu0 %v2665_v25  ;;  %1374 = vmatprep.mubr.f32.mxu0 %v3437_v0  ;;  %v591_v25 = vld [vmem:[#allocation5 + $0x10f0] sm:$0xff]  ;;  %v2685_v29 = vpack.c.bf16 %v900_v17, %v882_v16  ;;  %v772_v15 = vld [vmem:[#allocation5 + $0x1698] sm:$0xff]  ;;  %v790_v16 = vld [vmem:[#allocation5 + $0x1728] sm:$0xff] }
  0x93   :  { %v2559_v35 = vpack.c.bf16 %v609_v26, %v591_v25  ;;  %v202_v17 = vld [vmem:[#allocation5 + $0x4c8] sm:$0xff]  ;;  %v2577_v26 = vpack.c.bf16 %v790_v16, %v772_v15  ;;  %v363_v15 = vld [vmem:[#allocation5 + $0x9d0] sm:$0xff]  ;;  %v92_v16 = vld [vmem:[#allocation5 + $0x158] sm:$0xff] }
  0x94   :  { %2540 = vmatpush1.bf16.msra.mxu1 %v2539_v32  ;;  %v646_v32 = vld [vmem:[#allocation5 + $0x12a8] sm:$0xff] }
  0x95   :  { %2668 = vmatpush1.bf16.msra.mxu0 %v2667_v33  ;;  %2542 = vmatprep.subr.bf16.mxu1 %v2541_v34  ;;  %v58_v33 = vld [vmem:[#allocation5 + $0x48] sm:$0xff]  ;;  %v76_v34 = vld [vmem:[#allocation5 + $0xd8] sm:$0xff]  ;;  %v2561_v37 = vpack.c.bf16 %v646_v32, %v628_v31  ;;  %v219_v32 = vld [vmem:[#allocation5 + $0x550] sm:$0xff] }
  0x96   :  { %2670 = vmatprep.subr.bf16.mxu0 %v2669_v38  ;;  %v627_v38 = vld [vmem:[#allocation5 + $0x1210] sm:$0xff]  ;;  %v2785_v41 = vpack.c.bf16 %v76_v34, %v58_v33  ;;  %v808_v33 = vld [vmem:[#allocation5 + $0x17b8] sm:$0xff]  ;;  %v826_v34 = vld [vmem:[#allocation5 + $0x1848] sm:$0xff] }
  0x97   :  { %v2563_v47 = vpack.c.bf16 %v645_v39, %v627_v38  ;;  %v2581_v38 = vpack.c.bf16 %v826_v34, %v808_v33  ;;  %v807_v39 = vld [vmem:[#allocation5 + $0x17b0] sm:$0xff]  ;;  %v128_v33 = vld [vmem:[#allocation5 + $0x278] sm:$0xff]  ;;  %v146_v34 = vld [vmem:[#allocation5 + $0x308] sm:$0xff] }
  0x98   :  { %2544 = vmatpush1.bf16.msra.mxu1 %v2543_v44  ;;  %v682_v44 = vld [vmem:[#allocation5 + $0x13c8] sm:$0xff] }
  0x99   :  { %2672 = vmatpush1.bf16.msra.mxu0 %v2671_v45  ;;  %2546 = vmatprep.subr.bf16.mxu1 %v2545_v46  ;;  %v94_v45 = vld [vmem:[#allocation5 + $0x168] sm:$0xff]  ;;  %v112_v46 = vld [vmem:[#allocation5 + $0x1f8] sm:$0xff]  ;;  %v2565_v49 = vpack.c.bf16 %v682_v44, %v664_v43  ;;  %v255_v43 = vld [vmem:[#allocation5 + $0x670] sm:$0xff] }
  0x9a   :  { %2674 = vmatprep.subr.bf16.mxu0 %v2673_v51  ;;  %v663_v51 = vld [vmem:[#allocation5 + $0x1330] sm:$0xff]  ;;  %v2789_v54 = vpack.c.bf16 %v112_v46, %v94_v45  ;;  %v844_v44 = vld [vmem:[#allocation5 + $0x18d8] sm:$0xff]  ;;  %v862_v45 = vld [vmem:[#allocation5 + $0x1968] sm:$0xff] }
  0x9b   :  { %v2567_v60 = vpack.c.bf16 %v681_v52, %v663_v51  ;;  %v274_v46 = vld [vmem:[#allocation5 + $0x708] sm:$0xff]  ;;  %v2585_v51 = vpack.c.bf16 %v862_v45, %v844_v44  ;;  %v843_v52 = vld [vmem:[#allocation5 + $0x18d0] sm:$0xff]  ;;  %v164_v45 = vld [vmem:[#allocation5 + $0x398] sm:$0xff] }
  0x9c   :  { %2548 = vmatpush1.bf16.msra.mxu1 %v2547_v57  ;;  %v718_v57 = vld [vmem:[#allocation5 + $0x14e8] sm:$0xff]  ;;  %v435_v44 = vld [vmem:[#allocation5 + $0xc10] sm:$0xff] }
  0x9d   :  { %2676 = vmatpush1.bf16.msra.mxu0 %v2675_v58  ;;  %2550 = vmatprep.subr.bf16.mxu1 %v2549_v59  ;;  %v130_v58 = vld [vmem:[#allocation5 + $0x288] sm:$0xff]  ;;  %v148_v59 = vld [vmem:[#allocation5 + $0x318] sm:$0xff]  ;;  %v2569_v62 = vpack.c.bf16 %v718_v57, %v700_v56  ;;  %v291_v56 = vld [vmem:[#allocation5 + $0x790] sm:$0xff] }
  0x9e   :  { %2678 = vmatprep.subr.bf16.mxu0 %v2677_v63  ;;  %v699_v63 = vld [vmem:[#allocation5 + $0x1450] sm:$0xff]  ;;  %v2793_v3 = vpack.c.bf16 %v148_v59, %v130_v58  ;;  %v880_v57 = vld [vmem:[#allocation5 + $0x19f8] sm:$0xff]  ;;  %v898_v58 = vld [vmem:[#allocation5 + $0x1a88] sm:$0xff] }
  0x9f   :  { %v310_v59 = vld [vmem:[#allocation5 + $0x828] sm:$0xff] }
  0xa0   :  { %2552 = vmatpush1.bf16.msra.mxu1 %v2551_v6  ;;  %v754_v6 = vld [vmem:[#allocation5 + $0x1608] sm:$0xff] }
  0xa1   :  { %2680 = vmatpush1.bf16.msra.mxu0 %v2679_v7  ;;  %2554 = vmatprep.subr.bf16.mxu1 %v2553_v8  ;;  %v184_v7 = vld [vmem:[#allocation5 + $0x438] sm:$0xff]  ;;  %v2795_v8 = vpack.c.bf16 %v147_v4, %v129_v2  ;;  %v2573_v9 = vpack.c.bf16 %v754_v6, %v736_v5  ;;  %v897_v2 = vld [vmem:[#allocation5 + $0x1a80] sm:$0xff]  ;;  %v327_v5 = vld [vmem:[#allocation5 + $0x8b0] sm:$0xff] }
  0xa2   :  { %2682 = vmatprep.subr.bf16.mxu0 %v2681_v12  ;;  %v165_v12 = vld [vmem:[#allocation5 + $0x3a0] sm:$0xff]  ;;  %v56_v6 = vld [vmem:[#allocation5 + $0x38] sm:$0xff] }
  0xa3   :  { %v2799_v25 = vpack.c.bf16 %v183_v14, %v165_v12  ;;  %v73_v12 = vld [vmem:[#allocation5 + $0xc0] sm:$0xff] }
  0xa4   :  { %2556 = vmatpush1.bf16.msra.mxu1 %v2555_v18  ;;  %v220_v18 = vld [vmem:[#allocation5 + $0x558] sm:$0xff] }
  0xa5   :  { %2684 = vmatpush1.bf16.msra.mxu0 %v2683_v19  ;;  %2558 = vmatprep.subr.bf16.mxu1 %v2557_v20  ;;  %v2575_v19 = vpack.c.bf16 %v753_v11, %v735_v10  ;;  %v771_v20 = vld [vmem:[#allocation5 + $0x1690] sm:$0xff]  ;;  %v2801_v31 = vpack.c.bf16 %v220_v18, %v202_v17  ;;  %v110_v17 = vld [vmem:[#allocation5 + $0x1e8] sm:$0xff] }
  0xa6   :  { %2686 = vmatprep.subr.bf16.mxu0 %v2685_v29  ;;  %v201_v29 = vld [vmem:[#allocation5 + $0x4c0] sm:$0xff]  ;;  %v55_v11 = vld [vmem:[#allocation5 + $0x30] sm:$0xff]  ;;  %v382_v18 = vld [vmem:[#allocation5 + $0xa68] sm:$0xff] }
  0xa8   :  { %2560 = vmatpush1.bf16.msra.mxu1 %v2559_v35  ;;  %v256_v35 = vld [vmem:[#allocation5 + $0x678] sm:$0xff] }
  0xa9   :  { %2688 = vmatpush1.bf16.msra.mxu0 %v2687_v36  ;;  %2562 = vmatprep.subr.bf16.mxu1 %v2561_v37  ;;  %v2579_v36 = vpack.c.bf16 %v789_v27, %v771_v20  ;;  %v2803_v37 = vpack.c.bf16 %v219_v32, %v201_v29  ;;  %v2691_v20 = vpack.c.bf16 %v73_v12, %v55_v11  ;;  %v91_v27 = vld [vmem:[#allocation5 + $0x150] sm:$0xff]  ;;  %v109_v29 = vld [vmem:[#allocation5 + $0x1e0] sm:$0xff] }
  0xaa   :  { %2786 = vmatprep.subr.bf16.mxu0 %v2785_v41  ;;  %v237_v41 = vld [vmem:[#allocation5 + $0x5e0] sm:$0xff]  ;;  %v399_v32 = vld [vmem:[#allocation5 + $0xaf0] sm:$0xff] }
  0xab   :  { %1144 = vmatmul.mubr.f32.vlgmr.msra.gmra.mrb[4].mxu1 %v3497_v24  ;;  %v166_v24 = vld [vmem:[#allocation5 + $0x3a8] sm:$0xff]  ;;  %v235_v12 = vld [vmem:[#allocation5 + $0x5d0] sm:$0xff] }
  0xac   :  { %1375 = vmatmul.mubr.f32.vlgmr.msra.gmra.mrb[4].mxu0 %v3488_v50  ;;  %2564 = vmatpush1.bf16.msra.mxu1 %v2563_v47  ;;  %v2571_v50 = vpack.c.bf16 %v717_v1, %v699_v63  ;;  %v2797_v13 = vpack.c.bf16 %v184_v7, %v166_v24  ;;  %v292_v47 = vld [vmem:[#allocation5 + $0x798] sm:$0xff]  ;;  %v2589_v63 = vpack.c.bf16 %v898_v58, %v880_v57  ;;  %v879_v1 = vld [vmem:[#allocation5 + $0x19f0] sm:$0xff]  ;;  %v74_v24 = vld [vmem:[#allocation5 + $0xc8] sm:$0xff] }
  0xad   :  { %2788 = vmatpush1.bf16.msra.mxu0 %v2787_v48  ;;  %2566 = vmatprep.subr.bf16.mxu1 %v2565_v49  ;;  %v2583_v48 = vpack.c.bf16 %v825_v40, %v807_v39  ;;  %v2807_v49 = vpack.c.bf16 %v255_v43, %v237_v41  ;;  %v2809_v55 = vpack.c.bf16 %v292_v47, %v274_v46  ;;  %v346_v7 = vld [vmem:[#allocation5 + $0x948] sm:$0xff]  ;;  %v127_v40 = vld [vmem:[#allocation5 + $0x270] sm:$0xff]  ;;  %v145_v41 = vld [vmem:[#allocation5 + $0x300] sm:$0xff] }
  0xae   :  { %2790 = vmatprep.subr.bf16.mxu0 %v2789_v54  ;;  %1149 = vmatprep.mubr.f32.mxu1 %v3502_v21  ;;  %v273_v54 = vld [vmem:[#allocation5 + $0x700] sm:$0xff]  ;;  %v2689_v10 = vpack.c.bf16 %v74_v24, %v56_v6  ;;  %v2697_v39 = vpack.c.bf16 %v146_v34, %v128_v33  ;;  %v182_v46 = vld [vmem:[#allocation5 + $0x428] sm:$0xff]  ;;  %v471_v58 = vld [vmem:[#allocation5 + $0xd30] sm:$0xff] }
  0xaf   :  { %1380 = vmatprep.mubr.f32.mxu0 %v3437_v0  ;;  %1150 = vmatmul.mubr.f32.gmra.mrb[6].mxu1 %v3505_v28  ;;  %v454_v47 = vld [vmem:[#allocation5 + $0xca8] sm:$0xff]  ;;  %v507_v6 = vld [vmem:[#allocation5 + $0xe50] sm:$0xff]  ;;  %v236_v24 = vld [vmem:[#allocation5 + $0x5d8] sm:$0xff] }
  0xb0   :  { %2568 = vmatpush1.bf16.msra.mxu1 %v2567_v60  ;;  %1381 = vmatmul.mubr.f32.gmra.mrb[6].mxu0 %v3495_v22  ;;  %v328_v60 = vld [vmem:[#allocation5 + $0x8b8] sm:$0xff]  ;;  %v579_v33 = vld [vmem:[#allocation5 + $0x1090] sm:$0xff] }
  0xb1   :  { %2792 = vmatpush1.bf16.msra.mxu0 %v2791_v61  ;;  %2570 = vmatprep.subr.bf16.mxu1 %v2569_v62  ;;  %v2587_v61 = vpack.c.bf16 %v861_v53, %v843_v52  ;;  %v2811_v62 = vpack.c.bf16 %v291_v56, %v273_v54  ;;  %v2813_v4 = vpack.c.bf16 %v328_v60, %v310_v59  ;;  %v163_v54 = vld [vmem:[#allocation5 + $0x390] sm:$0xff]  ;;  %v453_v56 = vld [vmem:[#allocation5 + $0xca0] sm:$0xff]  ;;  %v200_v59 = vld [vmem:[#allocation5 + $0x4b8] sm:$0xff] }
  0xb2   :  { %2794 = vmatprep.subr.bf16.mxu0 %v2793_v3  ;;  %1220 = vmatprep.mubr.f32.mxu1 %v3437_v0  ;;  %v309_v3 = vld [vmem:[#allocation5 + $0x820] sm:$0xff]  ;;  %v2701_v53 = vpack.c.bf16 %v182_v46, %v164_v45  ;;  %v490_v60 = vld [vmem:[#allocation5 + $0xdc8] sm:$0xff]  ;;  %v308_v34 = vld [vmem:[#allocation5 + $0x818] sm:$0xff] }
  0xb3   :  { %1605 = vmatprep.mubr.f32.mxu0 %v3492_v23  ;;  %v238_v23 = vld [vmem:[#allocation5 + $0x5e8] sm:$0xff]  ;;  %v615_v45 = vld [vmem:[#allocation5 + $0x11b0] sm:$0xff]  ;;  %v344_v46 = vld [vmem:[#allocation5 + $0x938] sm:$0xff] }
  0xb4   :  { %2572 = vmatpush1.bf16.msra.mxu1 %v2571_v50  ;;  %v2805_v42 = vpack.c.bf16 %v256_v35, %v238_v23  ;;  %v364_v50 = vld [vmem:[#allocation5 + $0x9d8] sm:$0xff]  ;;  %v3527_v23 = vld [vmem:[#allocation2 + $0x10] sm:$0xff]  ;;  %v418_v35 = vld [vmem:[#allocation5 + $0xb88] sm:$0xff] }
  0xb5   :  { %2796 = vmatpush1.bf16.msra.mxu0 %v2795_v8  ;;  %2574 = vmatprep.subr.bf16.mxu1 %v2573_v9  ;;  %v2591_v8 = vpack.c.bf16 %v897_v2, %v879_v1  ;;  %v2815_v9 = vpack.c.bf16 %v327_v5, %v309_v3  ;;  %v2817_v14 = vpack.c.bf16 %v364_v50, %v346_v7  ;;  %v199_v2 = vld [vmem:[#allocation5 + $0x4b0] sm:$0xff]  ;;  %v217_v3 = vld [vmem:[#allocation5 + $0x540] sm:$0xff]  ;;  %v254_v7 = vld [vmem:[#allocation5 + $0x668] sm:$0xff] }
  0xb6   :  { %2798 = vmatprep.subr.bf16.mxu0 %v2797_v13  ;;  %v345_v13 = vld [vmem:[#allocation5 + $0x940] sm:$0xff]  ;;  %v526_v50 = vld [vmem:[#allocation5 + $0xee8] sm:$0xff]  ;;  %v2709_v11 = vpack.c.bf16 %v254_v7, %v236_v24  ;;  %v687_v24 = vld [vmem:[#allocation5 + $0x13f0] sm:$0xff] }
  0xb7   :  { %v416_v7 = vld [vmem:[#allocation5 + $0xb78] sm:$0xff] }
  0xb8   :  { %2576 = vmatpush1.bf16.msra.mxu1 %v2575_v19  ;;  %v400_v19 = vld [vmem:[#allocation5 + $0xaf8] sm:$0xff] }
  0xb9   :  { %2800 = vmatpush1.bf16.msra.mxu0 %v2799_v25  ;;  %2578 = vmatprep.subr.bf16.mxu1 %v2577_v26  ;;  %v2819_v25 = vpack.c.bf16 %v363_v15, %v345_v13  ;;  %v2693_v26 = vpack.c.bf16 %v110_v17, %v92_v16  ;;  %v253_v13 = vld [vmem:[#allocation5 + $0x660] sm:$0xff]  ;;  %v543_v16 = vld [vmem:[#allocation5 + $0xf70] sm:$0xff]  ;;  %v272_v17 = vld [vmem:[#allocation5 + $0x6f8] sm:$0xff] }
  0xba   :  { %2802 = vmatprep.subr.bf16.mxu0 %v2801_v31  ;;  %v2821_v31 = vpack.c.bf16 %v400_v19, %v382_v18  ;;  %v290_v18 = vld [vmem:[#allocation5 + $0x788] sm:$0xff] }
  0xbb   :  { %v562_v19 = vld [vmem:[#allocation5 + $0x1008] sm:$0xff] }
  0xbc   :  { %2580 = vmatpush1.bf16.msra.mxu1 %v2579_v36  ;;  %v436_v36 = vld [vmem:[#allocation5 + $0xc18] sm:$0xff] }
  0xbd   :  { %2804 = vmatpush1.bf16.msra.mxu0 %v2803_v37  ;;  %2582 = vmatprep.subr.bf16.mxu1 %v2581_v38  ;;  %v2695_v37 = vpack.c.bf16 %v109_v29, %v91_v27  ;;  %v2823_v38 = vpack.c.bf16 %v399_v32, %v381_v30  ;;  %v2825_v43 = vpack.c.bf16 %v436_v36, %v418_v35  ;;  %v271_v29 = vld [vmem:[#allocation5 + $0x6f0] sm:$0xff]  ;;  %v289_v30 = vld [vmem:[#allocation5 + $0x780] sm:$0xff]  ;;  %v326_v35 = vld [vmem:[#allocation5 + $0x8a8] sm:$0xff] }
  0xbe   :  { %2806 = vmatprep.subr.bf16.mxu0 %v2805_v42  ;;  %v417_v42 = vld [vmem:[#allocation5 + $0xb80] sm:$0xff]  ;;  %v2713_v27 = vpack.c.bf16 %v290_v18, %v272_v17  ;;  %v598_v36 = vld [vmem:[#allocation5 + $0x1128] sm:$0xff]  ;;  %v723_v18 = vld [vmem:[#allocation5 + $0x1510] sm:$0xff] }
  0xbf   :  { %v2827_v52 = vpack.c.bf16 %v435_v44, %v417_v42  ;;  %v325_v42 = vld [vmem:[#allocation5 + $0x8a0] sm:$0xff] }
  0xc0   :  { %2584 = vmatpush1.bf16.msra.mxu1 %v2583_v48  ;;  %v472_v48 = vld [vmem:[#allocation5 + $0xd38] sm:$0xff] }
  0xc1   :  { %2808 = vmatpush1.bf16.msra.mxu0 %v2807_v49  ;;  %2586 = vmatprep.subr.bf16.mxu1 %v2585_v51  ;;  %v2699_v49 = vpack.c.bf16 %v145_v41, %v127_v40  ;;  %v3532_v51 = vld [vmem:[#allocation2 + $0x8] sm:$0xff]  ;;  %v2829_v57 = vpack.c.bf16 %v472_v48, %v454_v47  ;;  %v2717_v40 = vpack.c.bf16 %v326_v35, %v308_v34  ;;  %v307_v41 = vld [vmem:[#allocation5 + $0x810] sm:$0xff]  ;;  %v362_v47 = vld [vmem:[#allocation5 + $0x9c8] sm:$0xff] }
  0xc2   :  { %2810 = vmatprep.subr.bf16.mxu0 %v2809_v55  ;;  %v181_v55 = vld [vmem:[#allocation5 + $0x420] sm:$0xff]  ;;  %v634_v48 = vld [vmem:[#allocation5 + $0x1248] sm:$0xff]  ;;  %v759_v35 = vld [vmem:[#allocation5 + $0x1630] sm:$0xff] }
  0xc4   :  { %2588 = vmatpush1.bf16.msra.mxu1 %v2587_v61  ;;  %v508_v61 = vld [vmem:[#allocation5 + $0xe58] sm:$0xff] }
  0xc5   :  { %2812 = vmatpush1.bf16.msra.mxu0 %v2811_v62  ;;  %2590 = vmatprep.subr.bf16.mxu1 %v2589_v63  ;;  %v2703_v62 = vpack.c.bf16 %v181_v55, %v163_v54  ;;  %v2831_v63 = vpack.c.bf16 %v471_v58, %v453_v56  ;;  %v2833_v5 = vpack.c.bf16 %v508_v61, %v490_v60  ;;  %v343_v55 = vld [vmem:[#allocation5 + $0x930] sm:$0xff]  ;;  %v361_v56 = vld [vmem:[#allocation5 + $0x9c0] sm:$0xff]  ;;  %v398_v60 = vld [vmem:[#allocation5 + $0xae8] sm:$0xff] }
  0xc6   :  { %2814 = vmatprep.subr.bf16.mxu0 %v2813_v4  ;;  %v489_v4 = vld [vmem:[#allocation5 + $0xdc0] sm:$0xff]  ;;  %v2721_v54 = vpack.c.bf16 %v362_v47, %v344_v46  ;;  %v670_v61 = vld [vmem:[#allocation5 + $0x1368] sm:$0xff]  ;;  %v524_v46 = vld [vmem:[#allocation5 + $0xed8] sm:$0xff] }
  0xc7   :  { %v542_v47 = vld [vmem:[#allocation5 + $0xf68] sm:$0xff] }
  0xc8   :  { %2592 = vmatpush1.bf16.msra.mxu1 %v2591_v8  ;;  %v544_v8 = vld [vmem:[#allocation5 + $0xf78] sm:$0xff] }
  0xc9   :  { %2816 = vmatpush1.bf16.msra.mxu0 %v2815_v9  ;;  %2690 = vmatprep.subr.bf16.mxu1 %v2689_v10  ;;  %v2707_v9 = vpack.c.bf16 %v217_v3, %v199_v2  ;;  %v2835_v10 = vpack.c.bf16 %v507_v6, %v489_v4  ;;  %v2837_v15 = vpack.c.bf16 %v544_v8, %v526_v50  ;;  %v379_v3 = vld [vmem:[#allocation5 + $0xa50] sm:$0xff]  ;;  %v397_v4 = vld [vmem:[#allocation5 + $0xae0] sm:$0xff]  ;;  %v434_v50 = vld [vmem:[#allocation5 + $0xc08] sm:$0xff] }
  0xca   :  { %2818 = vmatprep.subr.bf16.mxu0 %v2817_v14  ;;  %v525_v14 = vld [vmem:[#allocation5 + $0xee0] sm:$0xff]  ;;  %v706_v8 = vld [vmem:[#allocation5 + $0x1488] sm:$0xff] }
  0xcb   :  { %1221 = vmatmul.mubr.f32.vlgmr.msra.gmra.mrb[4].mxu1 %v3527_v23 }
  0xcc   :  { %2692 = vmatpush1.bf16.msra.mxu1 %v2691_v20  ;;  %1226 = vmatprep.mubr.f32.mxu1 %v3437_v0  ;;  %v580_v20 = vld [vmem:[#allocation5 + $0x1098] sm:$0xff] }
  0xcd   :  { %2820 = vmatpush1.bf16.msra.mxu0 %v2819_v25  ;;  %2694 = vmatprep.subr.bf16.mxu1 %v2693_v26  ;;  %v2711_v25 = vpack.c.bf16 %v253_v13, %v235_v12  ;;  %v2839_v26 = vpack.c.bf16 %v543_v16, %v525_v14  ;;  %v2841_v32 = vpack.c.bf16 %v580_v20, %v562_v19  ;;  %v415_v14 = vld [vmem:[#allocation5 + $0xb70] sm:$0xff]  ;;  %v705_v16 = vld [vmem:[#allocation5 + $0x1480] sm:$0xff]  ;;  %v452_v19 = vld [vmem:[#allocation5 + $0xc98] sm:$0xff] }
  0xce   :  { %2822 = vmatprep.subr.bf16.mxu0 %v2821_v31  ;;  %v561_v31 = vld [vmem:[#allocation5 + $0x1000] sm:$0xff]  ;;  %v2729_v13 = vpack.c.bf16 %v434_v50, %v416_v7  ;;  %v470_v20 = vld [vmem:[#allocation5 + $0xd28] sm:$0xff]  ;;  %v596_v7 = vld [vmem:[#allocation5 + $0x1118] sm:$0xff] }
  0xcf   :  { %1227 = vmatmul.mubr.f32.gmra.mrb[6].mxu1 %v3495_v22  ;;  %v218_v22 = vld [vmem:[#allocation5 + $0x548] sm:$0xff] }
  0xd0   :  { %2696 = vmatpush1.bf16.msra.mxu1 %v2695_v37  ;;  %1451 = vmatprep.mubr.f32.mxu1 %v3532_v51  ;;  %v2705_v1 = vpack.c.bf16 %v218_v22, %v200_v59  ;;  %v616_v37 = vld [vmem:[#allocation5 + $0x11b8] sm:$0xff]  ;;  %v651_v59 = vld [vmem:[#allocation5 + $0x12d0] sm:$0xff]  ;;  %v614_v50 = vld [vmem:[#allocation5 + $0x11a8] sm:$0xff] }
  0xd1   :  { %2824 = vmatpush1.bf16.msra.mxu0 %v2823_v38  ;;  %2698 = vmatprep.subr.bf16.mxu1 %v2697_v39  ;;  %v2715_v38 = vpack.c.bf16 %v289_v30, %v271_v29  ;;  %v2843_v39 = vpack.c.bf16 %v579_v33, %v561_v31  ;;  %v2845_v44 = vpack.c.bf16 %v616_v37, %v598_v36  ;;  %v380_v22 = vld [vmem:[#allocation5 + $0xa58] sm:$0xff]  ;;  %v451_v31 = vld [vmem:[#allocation5 + $0xc90] sm:$0xff]  ;;  %v741_v33 = vld [vmem:[#allocation5 + $0x15a0] sm:$0xff] }
  0xd2   :  { %2826 = vmatprep.subr.bf16.mxu0 %v2825_v43  ;;  %v597_v43 = vld [vmem:[#allocation5 + $0x1120] sm:$0xff]  ;;  %v2725_v2 = vpack.c.bf16 %v398_v60, %v380_v22  ;;  %v2859_v29 = vpack.c.bf16 %v723_v18, %v705_v16  ;;  %v2733_v30 = vpack.c.bf16 %v470_v20, %v452_v19  ;;  %v488_v36 = vld [vmem:[#allocation5 + $0xdb8] sm:$0xff]  ;;  %v506_v37 = vld [vmem:[#allocation5 + $0xe48] sm:$0xff] }
  0xd3   :  { %v560_v22 = vld [vmem:[#allocation5 + $0xff8] sm:$0xff]  ;;  %v578_v60 = vld [vmem:[#allocation5 + $0x1088] sm:$0xff]  ;;  %v885_v16 = vld [vmem:[#allocation5 + $0x1a20] sm:$0xff] }
  0xd4   :  { %2700 = vmatpush1.bf16.msra.mxu1 %v2699_v49  ;;  %v652_v49 = vld [vmem:[#allocation5 + $0x12d8] sm:$0xff]  ;;  %v903_v18 = vld [vmem:[#allocation5 + $0x1ab0] sm:$0xff]  ;;  %v650_v20 = vld [vmem:[#allocation5 + $0x12c8] sm:$0xff] }
  0xd5   :  { %2828 = vmatpush1.bf16.msra.mxu0 %v2827_v52  ;;  %2702 = vmatprep.subr.bf16.mxu1 %v2701_v53  ;;  %v2719_v52 = vpack.c.bf16 %v325_v42, %v307_v41  ;;  %v2847_v53 = vpack.c.bf16 %v615_v45, %v597_v43  ;;  %v2849_v58 = vpack.c.bf16 %v652_v49, %v634_v48  ;;  %v487_v41 = vld [vmem:[#allocation5 + $0xdb0] sm:$0xff]  ;;  %v505_v42 = vld [vmem:[#allocation5 + $0xe40] sm:$0xff]  ;;  %v814_v48 = vld [vmem:[#allocation5 + $0x17e8] sm:$0xff] }
  0xd6   :  { %2830 = vmatprep.subr.bf16.mxu0 %v2829_v57  ;;  %v633_v57 = vld [vmem:[#allocation5 + $0x1240] sm:$0xff]  ;;  %v795_v45 = vld [vmem:[#allocation5 + $0x1750] sm:$0xff]  ;;  %v832_v49 = vld [vmem:[#allocation5 + $0x1878] sm:$0xff] }
  0xd7   :  { %v777_v43 = vld [vmem:[#allocation5 + $0x16c0] sm:$0xff]  ;;  %v632_v19 = vld [vmem:[#allocation5 + $0x1238] sm:$0xff] }
  0xd8   :  { %2704 = vmatpush1.bf16.msra.mxu1 %v2703_v62  ;;  %v688_v62 = vld [vmem:[#allocation5 + $0x13f8] sm:$0xff] }
  0xd9   :  { %2832 = vmatpush1.bf16.msra.mxu0 %v2831_v63  ;;  %2706 = vmatprep.subr.bf16.mxu1 %v2705_v1  ;;  %v2723_v63 = vpack.c.bf16 %v361_v56, %v343_v55  ;;  %v2851_v1 = vpack.c.bf16 %v651_v59, %v633_v57  ;;  %v2853_v6 = vpack.c.bf16 %v688_v62, %v670_v61  ;;  %v523_v55 = vld [vmem:[#allocation5 + $0xed0] sm:$0xff]  ;;  %v541_v56 = vld [vmem:[#allocation5 + $0xf60] sm:$0xff]  ;;  %v850_v61 = vld [vmem:[#allocation5 + $0x1908] sm:$0xff] }
  0xda   :  { %2834 = vmatprep.subr.bf16.mxu0 %v2833_v5  ;;  %v669_v5 = vld [vmem:[#allocation5 + $0x1360] sm:$0xff]  ;;  %v831_v59 = vld [vmem:[#allocation5 + $0x1870] sm:$0xff]  ;;  %v868_v62 = vld [vmem:[#allocation5 + $0x1998] sm:$0xff] }
  0xdb   :  { %v2855_v12 = vpack.c.bf16 %v687_v24, %v669_v5  ;;  %v813_v57 = vld [vmem:[#allocation5 + $0x17e0] sm:$0xff]  ;;  %v867_v24 = vld [vmem:[#allocation5 + $0x1990] sm:$0xff] }
  0xdc   :  { %2708 = vmatpush1.bf16.msra.mxu1 %v2707_v9  ;;  %v724_v9 = vld [vmem:[#allocation5 + $0x1518] sm:$0xff]  ;;  %v849_v5 = vld [vmem:[#allocation5 + $0x1900] sm:$0xff] }
  0xdd   :  { %2836 = vmatpush1.bf16.msra.mxu0 %v2835_v10  ;;  %2710 = vmatprep.subr.bf16.mxu1 %v2709_v11  ;;  %v3535_v10 = vld [vmem:[#allocation2] sm:$0xff]  ;;  %v2727_v11 = vpack.c.bf16 %v397_v4, %v379_v3  ;;  %v2857_v17 = vpack.c.bf16 %v724_v9, %v706_v8  ;;  %v577_v4 = vld [vmem:[#allocation5 + $0x1080] sm:$0xff]  ;;  %v886_v8 = vld [vmem:[#allocation5 + $0x1a28] sm:$0xff] }
  0xde   :  { %2838 = vmatprep.subr.bf16.mxu0 %v2837_v15  ;;  %v433_v15 = vld [vmem:[#allocation5 + $0xc00] sm:$0xff]  ;;  %v559_v3 = vld [vmem:[#allocation5 + $0xff0] sm:$0xff]  ;;  %v904_v9 = vld [vmem:[#allocation5 + $0x1ab8] sm:$0xff] }
  0xe0   :  { %2712 = vmatpush1.bf16.msra.mxu1 %v2711_v25  ;;  %v742_v25 = vld [vmem:[#allocation5 + $0x15a8] sm:$0xff] }
  0xe1   :  { %2840 = vmatpush1.bf16.msra.mxu0 %v2839_v26  ;;  %2714 = vmatprep.subr.bf16.mxu1 %v2713_v27  ;;  %v760_v26 = vld [vmem:[#allocation5 + $0x1638] sm:$0xff]  ;;  %v2731_v27 = vpack.c.bf16 %v433_v15, %v415_v14  ;;  %v595_v14 = vld [vmem:[#allocation5 + $0x1110] sm:$0xff]  ;;  %v613_v15 = vld [vmem:[#allocation5 + $0x11a0] sm:$0xff] }
  0xe2   :  { %2842 = vmatprep.subr.bf16.mxu0 %v2841_v32  ;;  %v469_v32 = vld [vmem:[#allocation5 + $0xd20] sm:$0xff]  ;;  %v2861_v34 = vpack.c.bf16 %v760_v26, %v742_v25  ;;  %v62_v25 = vld [vmem:[#allocation5 + $0x68] sm:$0xff]  ;;  %v80_v26 = vld [vmem:[#allocation5 + $0xf8] sm:$0xff] }
  0xe4   :  { %2716 = vmatpush1.bf16.msra.mxu1 %v2715_v38  ;;  %v796_v38 = vld [vmem:[#allocation5 + $0x1758] sm:$0xff] }
  0xe5   :  { %2844 = vmatpush1.bf16.msra.mxu0 %v2843_v39  ;;  %2718 = vmatprep.subr.bf16.mxu1 %v2717_v40  ;;  %v2735_v39 = vpack.c.bf16 %v469_v32, %v451_v31  ;;  %v2737_v40 = vpack.c.bf16 %v506_v37, %v488_v36  ;;  %v631_v31 = vld [vmem:[#allocation5 + $0x1230] sm:$0xff]  ;;  %v649_v32 = vld [vmem:[#allocation5 + $0x12c0] sm:$0xff]  ;;  %v668_v36 = vld [vmem:[#allocation5 + $0x1358] sm:$0xff] }
  0xe6   :  { %2846 = vmatprep.subr.bf16.mxu0 %v2845_v44  ;;  %v686_v37 = vld [vmem:[#allocation5 + $0x13e8] sm:$0xff] }
  0xe8   :  { %2720 = vmatpush1.bf16.msra.mxu1 %v2719_v52  ;;  %v2739_v52 = vpack.c.bf16 %v505_v42, %v487_v41  ;;  %v667_v41 = vld [vmem:[#allocation5 + $0x1350] sm:$0xff]  ;;  %v685_v42 = vld [vmem:[#allocation5 + $0x13e0] sm:$0xff] }
  0xe9   :  { %2848 = vmatpush1.bf16.msra.mxu0 %v2847_v53  ;;  %2722 = vmatprep.subr.bf16.mxu1 %v2721_v54  ;;  %v2867_v53 = vpack.c.bf16 %v795_v45, %v777_v43  ;;  %v2741_v54 = vpack.c.bf16 %v542_v47, %v524_v46  ;;  %v97_v43 = vld [vmem:[#allocation5 + $0x180] sm:$0xff]  ;;  %v115_v45 = vld [vmem:[#allocation5 + $0x210] sm:$0xff]  ;;  %v704_v46 = vld [vmem:[#allocation5 + $0x1478] sm:$0xff] }
  0xea   :  { %2850 = vmatprep.subr.bf16.mxu0 %v2849_v58  ;;  %v2869_v58 = vpack.c.bf16 %v832_v49, %v814_v48  ;;  %v722_v47 = vld [vmem:[#allocation5 + $0x1508] sm:$0xff]  ;;  %v152_v49 = vld [vmem:[#allocation5 + $0x338] sm:$0xff] }
  0xeb   :  { %v134_v48 = vld [vmem:[#allocation5 + $0x2a8] sm:$0xff] }
  0xec   :  { %2724 = vmatpush1.bf16.msra.mxu1 %v2723_v63  ;;  %1606 = vmatmul.mubr.f32.vlgmr.msra.gmra.mrb[8].mxu0 %v3535_v10  ;;  %v2743_v63 = vpack.c.bf16 %v541_v56, %v523_v55  ;;  %v703_v55 = vld [vmem:[#allocation5 + $0x1470] sm:$0xff]  ;;  %v721_v56 = vld [vmem:[#allocation5 + $0x1500] sm:$0xff] }
  0xed   :  { %2852 = vmatpush1.bf16.msra.mxu0 %v2851_v1  ;;  %2726 = vmatprep.subr.bf16.mxu1 %v2725_v2  ;;  %v2871_v1 = vpack.c.bf16 %v831_v59, %v813_v57  ;;  %v2745_v2 = vpack.c.bf16 %v578_v60, %v560_v22  ;;  %v133_v57 = vld [vmem:[#allocation5 + $0x2a0] sm:$0xff]  ;;  %v151_v59 = vld [vmem:[#allocation5 + $0x330] sm:$0xff]  ;;  %v740_v22 = vld [vmem:[#allocation5 + $0x1598] sm:$0xff] }
  0xee   :  { %2854 = vmatprep.subr.bf16.mxu0 %v2853_v6  ;;  %1611 = vmatprep.mubr.f32.mxu0 %v3502_v21  ;;  %v778_v21 = vld [vmem:[#allocation5 + $0x16c8] sm:$0xff]  ;;  %v2873_v6 = vpack.c.bf16 %v868_v62, %v850_v61  ;;  %v3543_v61 = vld [vmem:[#allocation2 + $0x20] sm:$0xff] }
  0xef   :  { %v2865_v44 = vpack.c.bf16 %v796_v38, %v778_v21  ;;  %v98_v21 = vld [vmem:[#allocation5 + $0x188] sm:$0xff]  ;;  %v116_v38 = vld [vmem:[#allocation5 + $0x218] sm:$0xff] }
  0xf0   :  { %2728 = vmatpush1.bf16.msra.mxu1 %v2727_v11  ;;  %1612 = vmatmul.mubr.f32.gmra.mrb[10].mxu0 %v3505_v28  ;;  %v2863_v28 = vpack.c.bf16 %v759_v35, %v741_v33  ;;  %v2747_v11 = vpack.c.bf16 %v577_v4, %v559_v3  ;;  %v61_v33 = vld [vmem:[#allocation5 + $0x60] sm:$0xff]  ;;  %v79_v35 = vld [vmem:[#allocation5 + $0xf0] sm:$0xff]  ;;  %v758_v60 = vld [vmem:[#allocation5 + $0x1628] sm:$0xff]  ;;  %v2987_v4 = vpack.c.bf16 %v151_v59, %v133_v57 }
  0xf1   :  { %2856 = vmatpush1.bf16.msra.mxu0 %v2855_v12  ;;  %2730 = vmatprep.subr.bf16.mxu1 %v2729_v13  ;;  %v2875_v12 = vpack.c.bf16 %v867_v24, %v849_v5  ;;  %v2749_v13 = vpack.c.bf16 %v614_v50, %v596_v7  ;;  %v170_v62 = vld [vmem:[#allocation5 + $0x3c8] sm:$0xff]  ;;  %v3550_v3 = vld [vmem:[#allocation2 + $0x28] sm:$0xff]  ;;  %v2765_v5 = vpack.c.bf16 %v758_v60, %v740_v22  ;;  %v757_v24 = vld [vmem:[#allocation5 + $0x1620] sm:$0xff] }
  0xf2   :  { %2858 = vmatprep.subr.bf16.mxu0 %v2857_v17  ;;  %1682 = vmatprep.mubr.f32.mxu0 %v3437_v0  ;;  %v2877_v17 = vpack.c.bf16 %v904_v9, %v886_v8  ;;  %v169_v7 = vld [vmem:[#allocation5 + $0x3c0] sm:$0xff]  ;;  %v187_v8 = vld [vmem:[#allocation5 + $0x450] sm:$0xff]  ;;  %v776_v9 = vld [vmem:[#allocation5 + $0x16b8] sm:$0xff] }
  0xf3   :  { %v883_v22 = vld [vmem:[#allocation5 + $0x1a10] sm:$0xff]  ;;  %v901_v60 = vld [vmem:[#allocation5 + $0x1aa0] sm:$0xff] }
  0xf4   :  { %2732 = vmatpush1.bf16.msra.mxu1 %v2731_v27  ;;  %v2751_v27 = vpack.c.bf16 %v613_v15, %v595_v14  ;;  %v2991_v15 = vpack.c.bf16 %v187_v8, %v169_v7  ;;  %v2783_v7 = vpack.c.bf16 %v901_v60, %v883_v22  ;;  %v512_v22 = vld [vmem:[#allocation5 + $0xe78] sm:$0xff] }
  0xf5   :  { %2860 = vmatpush1.bf16.msra.mxu0 %v2859_v29  ;;  %2734 = vmatprep.subr.bf16.mxu1 %v2733_v30  ;;  %v2879_v29 = vpack.c.bf16 %v903_v18, %v885_v16  ;;  %v2753_v30 = vpack.c.bf16 %v650_v20, %v632_v19  ;;  %v793_v18 = vld [vmem:[#allocation5 + $0x1740] sm:$0xff] }
  0xf6   :  { %2862 = vmatprep.subr.bf16.mxu0 %v2861_v34  ;;  %v2977_v34 = vpack.c.bf16 %v80_v26, %v62_v25  ;;  %v205_v19 = vld [vmem:[#allocation5 + $0x4e0] sm:$0xff]  ;;  %v223_v25 = vld [vmem:[#allocation5 + $0x570] sm:$0xff]  ;;  %v812_v26 = vld [vmem:[#allocation5 + $0x17d8] sm:$0xff] }
  0xf8   :  { %2736 = vmatpush1.bf16.msra.mxu1 %v2735_v39  ;;  %v2755_v39 = vpack.c.bf16 %v649_v32, %v631_v31  ;;  %v2995_v32 = vpack.c.bf16 %v223_v25, %v205_v19 }
  0xf9   :  { %2864 = vmatpush1.bf16.msra.mxu0 %v2863_v28  ;;  %2738 = vmatprep.subr.bf16.mxu1 %v2737_v40  ;;  %v2979_v28 = vpack.c.bf16 %v79_v35, %v61_v33  ;;  %v2757_v40 = vpack.c.bf16 %v686_v37, %v668_v36  ;;  %v829_v35 = vld [vmem:[#allocation5 + $0x1860] sm:$0xff] }
  0xfa   :  { %2866 = vmatprep.subr.bf16.mxu0 %v2865_v44  ;;  %v2981_v44 = vpack.c.bf16 %v116_v38, %v98_v21  ;;  %v241_v36 = vld [vmem:[#allocation5 + $0x600] sm:$0xff]  ;;  %v259_v21 = vld [vmem:[#allocation5 + $0x690] sm:$0xff]  ;;  %v848_v38 = vld [vmem:[#allocation5 + $0x18f8] sm:$0xff] }
  0xfc   :  { %2740 = vmatpush1.bf16.msra.mxu1 %v2739_v52  ;;  %v2759_v52 = vpack.c.bf16 %v685_v42, %v667_v41  ;;  %v2999_v42 = vpack.c.bf16 %v259_v21, %v241_v36 }
  0xfd   :  { %2868 = vmatpush1.bf16.msra.mxu0 %v2867_v53  ;;  %2742 = vmatprep.subr.bf16.mxu1 %v2741_v54  ;;  %v2983_v53 = vpack.c.bf16 %v115_v45, %v97_v43  ;;  %v2761_v54 = vpack.c.bf16 %v722_v47, %v704_v46  ;;  %v865_v45 = vld [vmem:[#allocation5 + $0x1980] sm:$0xff] }
  0xfe   :  { %2870 = vmatprep.subr.bf16.mxu0 %v2869_v58  ;;  %v2985_v58 = vpack.c.bf16 %v152_v49, %v134_v48  ;;  %v277_v46 = vld [vmem:[#allocation5 + $0x720] sm:$0xff]  ;;  %v295_v48 = vld [vmem:[#allocation5 + $0x7b0] sm:$0xff]  ;;  %v884_v49 = vld [vmem:[#allocation5 + $0x1a18] sm:$0xff] }
 0x100   :  { %2744 = vmatpush1.bf16.msra.mxu1 %v2743_v63  ;;  %v188_v63 = vld [vmem:[#allocation5 + $0x458] sm:$0xff] }
 0x101   :  { %2872 = vmatpush1.bf16.msra.mxu0 %v2871_v1  ;;  %2746 = vmatprep.subr.bf16.mxu1 %v2745_v2  ;;  %v3547_v1 = vld [vmem:[#allocation2 + $0x18] sm:$0xff]  ;;  %v2763_v2 = vpack.c.bf16 %v721_v56, %v703_v55  ;;  %v2989_v50 = vpack.c.bf16 %v188_v63, %v170_v62  ;;  %v313_v62 = vld [vmem:[#allocation5 + $0x840] sm:$0xff] }
 0x102   :  { %2874 = vmatprep.subr.bf16.mxu0 %v2873_v6  ;;  %v739_v6 = vld [vmem:[#allocation5 + $0x1590] sm:$0xff] }
 0x103   :  { %v2767_v14 = vpack.c.bf16 %v757_v24, %v739_v6  ;;  %v350_v6 = vld [vmem:[#allocation5 + $0x968] sm:$0xff]  ;;  %v368_v24 = vld [vmem:[#allocation5 + $0x9f8] sm:$0xff] }
 0x104   :  { %2748 = vmatpush1.bf16.msra.mxu1 %v2747_v11  ;;  %v794_v11 = vld [vmem:[#allocation5 + $0x1748] sm:$0xff] }
 0x105   :  { %2876 = vmatpush1.bf16.msra.mxu0 %v2875_v12  ;;  %2750 = vmatprep.subr.bf16.mxu1 %v2749_v13  ;;  %v206_v12 = vld [vmem:[#allocation5 + $0x4e8] sm:$0xff]  ;;  %v224_v13 = vld [vmem:[#allocation5 + $0x578] sm:$0xff]  ;;  %v2769_v16 = vpack.c.bf16 %v794_v11, %v776_v9  ;;  %v59_v9 = vld [vmem:[#allocation5 + $0x50] sm:$0xff] }
 0x106   :  { %2878 = vmatprep.subr.bf16.mxu0 %v2877_v17  ;;  %v775_v17 = vld [vmem:[#allocation5 + $0x16b0] sm:$0xff]  ;;  %v2993_v20 = vpack.c.bf16 %v224_v13, %v206_v12  ;;  %v77_v11 = vld [vmem:[#allocation5 + $0xe0] sm:$0xff]  ;;  %v3009_v13 = vpack.c.bf16 %v368_v24, %v350_v6  ;;  %v240_v24 = vld [vmem:[#allocation5 + $0x5f8] sm:$0xff] }
 0x107   :  { %v2771_v31 = vpack.c.bf16 %v793_v18, %v775_v17  ;;  %v349_v12 = vld [vmem:[#allocation5 + $0x960] sm:$0xff]  ;;  %v386_v17 = vld [vmem:[#allocation5 + $0xa88] sm:$0xff]  ;;  %v404_v18 = vld [vmem:[#allocation5 + $0xb18] sm:$0xff]  ;;  %v2883_v19 = vpack.c.bf16 %v77_v11, %v59_v9 }
 0x108   :  { %2752 = vmatpush1.bf16.msra.mxu1 %v2751_v27  ;;  %v830_v27 = vld [vmem:[#allocation5 + $0x1868] sm:$0xff]  ;;  %v511_v6 = vld [vmem:[#allocation5 + $0xe70] sm:$0xff] }
 0x109   :  { %2880 = vmatpush1.bf16.msra.mxu0 %v2879_v29  ;;  %2754 = vmatprep.subr.bf16.mxu1 %v2753_v30  ;;  %v242_v29 = vld [vmem:[#allocation5 + $0x608] sm:$0xff]  ;;  %v260_v30 = vld [vmem:[#allocation5 + $0x698] sm:$0xff]  ;;  %v2773_v33 = vpack.c.bf16 %v830_v27, %v812_v26  ;;  %v95_v26 = vld [vmem:[#allocation5 + $0x170] sm:$0xff] }
 0x10a   :  { %2978 = vmatprep.subr.bf16.mxu0 %v2977_v34  ;;  %v811_v34 = vld [vmem:[#allocation5 + $0x17d0] sm:$0xff]  ;;  %v2997_v37 = vpack.c.bf16 %v260_v30, %v242_v29  ;;  %v113_v27 = vld [vmem:[#allocation5 + $0x200] sm:$0xff]  ;;  %v3013_v30 = vpack.c.bf16 %v404_v18, %v386_v17  ;;  %v276_v18 = vld [vmem:[#allocation5 + $0x718] sm:$0xff] }
 0x10b   :  { %1452 = vmatmul.mubr.f32.vlgmr.msra.gmra.mrb[8].mxu1 %v3535_v10  ;;  %v2775_v41 = vpack.c.bf16 %v829_v35, %v811_v34  ;;  %v385_v29 = vld [vmem:[#allocation5 + $0xa80] sm:$0xff]  ;;  %v422_v34 = vld [vmem:[#allocation5 + $0xba8] sm:$0xff]  ;;  %v440_v35 = vld [vmem:[#allocation5 + $0xc38] sm:$0xff]  ;;  %v2887_v36 = vpack.c.bf16 %v113_v27, %v95_v26  ;;  %v3565_v27 = vpop.permute.xlu0 %917 }
 0x10c   :  { %1683 = vmatmul.mubr.f32.vlgmr.msra.gmra.mrb[8].mxu0 %v3527_v23  ;;  %2756 = vmatpush1.bf16.msra.mxu1 %v2755_v39  ;;  %v866_v39 = vld [vmem:[#allocation5 + $0x1988] sm:$0xff]  ;;  %v547_v17 = vld [vmem:[#allocation5 + $0xf90] sm:$0xff] }
 0x10d   :  { %2980 = vmatpush1.bf16.msra.mxu0 %v2979_v28  ;;  %2758 = vmatprep.subr.bf16.mxu1 %v2757_v40  ;;  %v278_v28 = vld [vmem:[#allocation5 + $0x728] sm:$0xff]  ;;  %v296_v40 = vld [vmem:[#allocation5 + $0x7b8] sm:$0xff]  ;;  %v2777_v43 = vpack.c.bf16 %v866_v39, %v848_v38  ;;  %v131_v38 = vld [vmem:[#allocation5 + $0x290] sm:$0xff] }
 0x10e   :  { %2982 = vmatprep.subr.bf16.mxu0 %v2981_v44  ;;  %1457 = vmatprep.mubr.f32.mxu1 %v3543_v61  ;;  %v847_v44 = vld [vmem:[#allocation5 + $0x18f0] sm:$0xff]  ;;  %v3001_v47 = vpack.c.bf16 %v296_v40, %v278_v28  ;;  %v149_v39 = vld [vmem:[#allocation5 + $0x320] sm:$0xff]  ;;  %v3017_v40 = vpack.c.bf16 %v440_v35, %v422_v34 }
 0x10f   :  { %1688 = vmatprep.mubr.f32.mxu0 %v3437_v0  ;;  %1458 = vmatmul.mubr.f32.gmra.mrb[10].mxu1 %v3547_v1  ;;  %v2779_v56 = vpack.c.bf16 %v865_v45, %v847_v44  ;;  %v421_v28 = vld [vmem:[#allocation5 + $0xba0] sm:$0xff]  ;;  %v476_v44 = vld [vmem:[#allocation5 + $0xd58] sm:$0xff]  ;;  %v2891_v45 = vpack.c.bf16 %v149_v39, %v131_v38  ;;  %v330_v39 = vld [vmem:[#allocation5 + $0x8c8] sm:$0xff] }
 0x110   :  { %2760 = vmatpush1.bf16.msra.mxu1 %v2759_v52  ;;  %1689 = vmatmul.mubr.f32.gmra.mrb[10].mxu0 %v3550_v3  ;;  %v902_v52 = vld [vmem:[#allocation5 + $0x1aa8] sm:$0xff]  ;;  %v293_v34 = vld [vmem:[#allocation5 + $0x7a0] sm:$0xff]  ;;  %v312_v38 = vld [vmem:[#allocation5 + $0x838] sm:$0xff] }
 0x111   :  { %2984 = vmatpush1.bf16.msra.mxu0 %v2983_v53  ;;  %2762 = vmatprep.subr.bf16.mxu1 %v2761_v54  ;;  %v314_v53 = vld [vmem:[#allocation5 + $0x848] sm:$0xff]  ;;  %v332_v54 = vld [vmem:[#allocation5 + $0x8d8] sm:$0xff]  ;;  %v2781_v59 = vpack.c.bf16 %v902_v52, %v884_v49  ;;  %v185_v49 = vld [vmem:[#allocation5 + $0x440] sm:$0xff] }
 0x112   :  { %2986 = vmatprep.subr.bf16.mxu0 %v2985_v58  ;;  %1528 = vmatprep.mubr.f32.mxu1 %v3437_v0  ;;  %v3003_v58 = vpack.c.bf16 %v295_v48, %v277_v46  ;;  %v3005_v63 = vpack.c.bf16 %v332_v54, %v314_v53  ;;  %v167_v48 = vld [vmem:[#allocation5 + $0x3b0] sm:$0xff]  ;;  %v457_v52 = vld [vmem:[#allocation5 + $0xcc0] sm:$0xff] }
 0x113   :  { %1913 = vmatprep.mubr.f32.mxu0 %v3532_v51  ;;  %v475_v54 = vld [vmem:[#allocation5 + $0xd50] sm:$0xff]  ;;  %v2895_v60 = vpack.c.bf16 %v185_v49, %v167_v48  ;;  %v565_v35 = vld [vmem:[#allocation5 + $0x1020] sm:$0xff] }
 0x114   :  { %2764 = vmatpush1.bf16.msra.mxu1 %v2763_v2  ;;  %v331_v2 = vld [vmem:[#allocation5 + $0x8d0] sm:$0xff]  ;;  %v329_v48 = vld [vmem:[#allocation5 + $0x8c0] sm:$0xff] }
 0x115   :  { %2988 = vmatpush1.bf16.msra.mxu0 %v2987_v4  ;;  %2766 = vmatprep.subr.bf16.mxu1 %v2765_v5  ;;  %v60_v4 = vld [vmem:[#allocation5 + $0x58] sm:$0xff]  ;;  %v78_v5 = vld [vmem:[#allocation5 + $0xe8] sm:$0xff]  ;;  %v601_v49 = vld [vmem:[#allocation5 + $0x1140] sm:$0xff] }
 0x116   :  { %2990 = vmatprep.subr.bf16.mxu0 %v2989_v50  ;;  %v3007_v50 = vpack.c.bf16 %v331_v2, %v313_v62  ;;  %v2881_v8 = vpack.c.bf16 %v78_v5, %v60_v4  ;;  %v3023_v62 = vpack.c.bf16 %v475_v54, %v457_v52  ;;  %v221_v2 = vld [vmem:[#allocation5 + $0x560] sm:$0xff]  ;;  %v619_v54 = vld [vmem:[#allocation5 + $0x11d0] sm:$0xff] }
 0x117   :  { %v493_v4 = vld [vmem:[#allocation5 + $0xde0] sm:$0xff] }
 0x118   :  { %2768 = vmatpush1.bf16.msra.mxu1 %v2767_v14  ;;  %v367_v14 = vld [vmem:[#allocation5 + $0x9f0] sm:$0xff]  ;;  %v3027_v11 = vpack.c.bf16 %v511_v6, %v493_v4  ;;  %v365_v4 = vld [vmem:[#allocation5 + $0x9e0] sm:$0xff] }
 0x119   :  { %2992 = vmatpush1.bf16.msra.mxu0 %v2991_v15  ;;  %2770 = vmatprep.subr.bf16.mxu1 %v2769_v16  ;;  %v96_v15 = vld [vmem:[#allocation5 + $0x178] sm:$0xff]  ;;  %v114_v16 = vld [vmem:[#allocation5 + $0x208] sm:$0xff]  ;;  %v655_v6 = vld [vmem:[#allocation5 + $0x12f0] sm:$0xff] }
 0x11a   :  { %2994 = vmatprep.subr.bf16.mxu0 %v2993_v20  ;;  %v3011_v20 = vpack.c.bf16 %v367_v14, %v349_v12  ;;  %v2885_v25 = vpack.c.bf16 %v114_v16, %v96_v15  ;;  %v257_v14 = vld [vmem:[#allocation5 + $0x680] sm:$0xff] }
 0x11b   :  { %v529_v15 = vld [vmem:[#allocation5 + $0xf00] sm:$0xff] }
 0x11c   :  { %2772 = vmatpush1.bf16.msra.mxu1 %v2771_v31  ;;  %v403_v31 = vld [vmem:[#allocation5 + $0xb10] sm:$0xff] }
 0x11d   :  { %2996 = vmatpush1.bf16.msra.mxu0 %v2995_v32  ;;  %2774 = vmatprep.subr.bf16.mxu1 %v2773_v33  ;;  %v132_v32 = vld [vmem:[#allocation5 + $0x298] sm:$0xff]  ;;  %v150_v33 = vld [vmem:[#allocation5 + $0x328] sm:$0xff] }
 0x11e   :  { %2998 = vmatprep.subr.bf16.mxu0 %v2997_v37  ;;  %v3015_v37 = vpack.c.bf16 %v403_v31, %v385_v29  ;;  %v2889_v21 = vpack.c.bf16 %v150_v33, %v132_v32  ;;  %v3031_v31 = vpack.c.bf16 %v547_v17, %v529_v15  ;;  %v275_v33 = vld [vmem:[#allocation5 + $0x710] sm:$0xff]  ;;  %v673_v15 = vld [vmem:[#allocation5 + $0x1380] sm:$0xff] }
 0x11f   :  { %v3555_v55 = vpop.f32.mrb[0].mxu0  ;;  %v691_v17 = vld [vmem:[#allocation5 + $0x1410] sm:$0xff] }
 0x120   :  { %2776 = vmatpush1.bf16.msra.mxu1 %v2775_v41  ;;  %v3557_v57 = vpop.f32.mrb[1].mxu0  ;;  %v439_v41 = vld [vmem:[#allocation5 + $0xc30] sm:$0xff] }
 0x121   :  { %3000 = vmatpush1.bf16.msra.mxu0 %v2999_v42  ;;  %2778 = vmatprep.subr.bf16.mxu1 %v2777_v43  ;;  %v168_v42 = vld [vmem:[#allocation5 + $0x3b8] sm:$0xff]  ;;  %v186_v43 = vld [vmem:[#allocation5 + $0x448] sm:$0xff]  ;;  %v3019_v46 = vpack.c.bf16 %v439_v41, %v421_v28 }
 0x122   :  { %3002 = vmatprep.subr.bf16.mxu0 %v3001_v47  ;;  %v2893_v47 = vpack.c.bf16 %v186_v43, %v168_v42  ;;  %v602_v41 = vld [vmem:[#allocation5 + $0x1148] sm:$0xff]  ;;  %v620_v42 = vld [vmem:[#allocation5 + $0x11d8] sm:$0xff] }
 0x124   :  { %2780 = vmatpush1.bf16.msra.mxu1 %v2779_v56  ;;  %v204_v56 = vld [vmem:[#allocation5 + $0x4d8] sm:$0xff] }
 0x125   :  { %3004 = vmatpush1.bf16.msra.mxu0 %v3003_v58  ;;  %2782 = vmatprep.subr.bf16.mxu1 %v2781_v59  ;;  %v222_v58 = vld [vmem:[#allocation5 + $0x568] sm:$0xff] }
 0x126   :  { %3006 = vmatprep.subr.bf16.mxu0 %v3005_v63  ;;  %v494_v59 = vld [vmem:[#allocation5 + $0xde8] sm:$0xff]  ;;  %v203_v63 = vld [vmem:[#allocation5 + $0x4d0] sm:$0xff] }
 0x127   :  { %v3025_v5 = vpack.c.bf16 %v512_v22, %v494_v59  ;;  %v2899_v9 = vpack.c.bf16 %v221_v2, %v203_v63  ;;  %v638_v22 = vld [vmem:[#allocation5 + $0x1268] sm:$0xff]  ;;  %v347_v2 = vld [vmem:[#allocation5 + $0x950] sm:$0xff] }
 0x128   :  { %2784 = vmatpush1.bf16.msra.mxu1 %v2783_v7  ;;  %v258_v7 = vld [vmem:[#allocation5 + $0x688] sm:$0xff] }
 0x129   :  { %3008 = vmatpush1.bf16.msra.mxu0 %v3007_v50  ;;  %2882 = vmatprep.subr.bf16.mxu1 %v2881_v8  ;;  %v530_v50 = vld [vmem:[#allocation5 + $0xf08] sm:$0xff]  ;;  %v548_v8 = vld [vmem:[#allocation5 + $0xf98] sm:$0xff]  ;;  %v2901_v12 = vpack.c.bf16 %v258_v7, %v240_v24 }
 0x12a   :  { %3010 = vmatprep.subr.bf16.mxu0 %v3009_v13  ;;  %v239_v13 = vld [vmem:[#allocation5 + $0x5f0] sm:$0xff]  ;;  %v3029_v16 = vpack.c.bf16 %v548_v8, %v530_v50  ;;  %v3563_v26 = vpop.f32.mrb[2].mxu0  ;;  %v384_v24 = vld [vmem:[#allocation5 + $0xa78] sm:$0xff]  ;;  %v402_v7 = vld [vmem:[#allocation5 + $0xb08] sm:$0xff] }
 0x12b   :  { %1529 = vmatmul.mubr.f32.vlgmr.msra.gmra.mrb[8].mxu1 %v3527_v23  ;;  %v458_v23 = vld [vmem:[#allocation5 + $0xcc8] sm:$0xff]  ;;  %v2903_v29 = vpack.c.bf16 %v257_v14, %v239_v13  ;;  %v692_v8 = vld [vmem:[#allocation5 + $0x1418] sm:$0xff]  ;;  %v383_v13 = vld [vmem:[#allocation5 + $0xa70] sm:$0xff] }
 0x12c   :  { %2884 = vmatpush1.bf16.msra.mxu1 %v2883_v19  ;;  %1534 = vmatprep.mubr.f32.mxu1 %v3437_v0  ;;  %v3021_v53 = vpack.c.bf16 %v476_v44, %v458_v23  ;;  %v294_v19 = vld [vmem:[#allocation5 + $0x7a8] sm:$0xff]  ;;  %v2907_v23 = vpack.c.bf16 %v293_v34, %v275_v33  ;;  %v401_v14 = vld [vmem:[#allocation5 + $0xb00] sm:$0xff]  ;;  %v419_v33 = vld [vmem:[#allocation5 + $0xb90] sm:$0xff] }
 0x12d   :  { %3012 = vmatpush1.bf16.msra.mxu0 %v3011_v20  ;;  %2886 = vmatprep.subr.bf16.mxu1 %v2885_v25  ;;  %v566_v20 = vld [vmem:[#allocation5 + $0x1028] sm:$0xff]  ;;  %v584_v25 = vld [vmem:[#allocation5 + $0x10b8] sm:$0xff]  ;;  %v2905_v32 = vpack.c.bf16 %v294_v19, %v276_v18  ;;  %v437_v34 = vld [vmem:[#allocation5 + $0xc20] sm:$0xff] }
 0x12e   :  { %3014 = vmatprep.subr.bf16.mxu0 %v3013_v30  ;;  %v3567_v30 = vpop.f32.mrb[3].mxu0  ;;  %v674_v50 = vld [vmem:[#allocation5 + $0x1388] sm:$0xff]  ;;  %v420_v18 = vld [vmem:[#allocation5 + $0xb98] sm:$0xff] }
 0x12f   :  { %1535 = vmatmul.mubr.f32.gmra.mrb[10].mxu1 %v3550_v3  ;;  %v438_v19 = vld [vmem:[#allocation5 + $0xc28] sm:$0xff] }
 0x130   :  { %2888 = vmatpush1.bf16.msra.mxu1 %v2887_v36  ;;  %1759 = vmatprep.mubr.f32.mxu1 %v3532_v51  ;;  %v2897_v51 = vpack.c.bf16 %v222_v58, %v204_v56  ;;  %v348_v56 = vld [vmem:[#allocation5 + $0x958] sm:$0xff]  ;;  %v366_v58 = vld [vmem:[#allocation5 + $0x9e8] sm:$0xff] }
 0x131   :  { %3016 = vmatpush1.bf16.msra.mxu0 %v3015_v37  ;;  %2890 = vmatprep.subr.bf16.mxu1 %v2889_v21  ;;  %v3033_v37 = vpack.c.bf16 %v584_v25, %v566_v20  ;;  %v583_v21 = vld [vmem:[#allocation5 + $0x10b0] sm:$0xff]  ;;  %v2913_v63 = vpack.c.bf16 %v366_v58, %v348_v56  ;;  %v710_v20 = vld [vmem:[#allocation5 + $0x14a8] sm:$0xff]  ;;  %v728_v25 = vld [vmem:[#allocation5 + $0x1538] sm:$0xff] }
 0x132   :  { %3018 = vmatprep.subr.bf16.mxu0 %v3017_v40  ;;  %v800_v56 = vld [vmem:[#allocation5 + $0x1778] sm:$0xff] }
 0x134   :  { %2892 = vmatpush1.bf16.msra.mxu1 %v2891_v45  ;;  %v3035_v45 = vpack.c.bf16 %v583_v21, %v565_v35  ;;  %v709_v35 = vld [vmem:[#allocation5 + $0x14a0] sm:$0xff]  ;;  %v456_v21 = vld [vmem:[#allocation5 + $0xcb8] sm:$0xff] }
 0x135   :  { %3020 = vmatpush1.bf16.msra.mxu0 %v3019_v46  ;;  %2894 = vmatprep.subr.bf16.mxu1 %v2893_v47  ;;  %v2909_v46 = vpack.c.bf16 %v330_v39, %v312_v38  ;;  %v311_v47 = vld [vmem:[#allocation5 + $0x830] sm:$0xff]  ;;  %v474_v38 = vld [vmem:[#allocation5 + $0xd48] sm:$0xff] }
 0x136   :  { %3022 = vmatprep.subr.bf16.mxu0 %v3021_v53  ;;  %v3037_v53 = vpack.c.bf16 %v620_v42, %v602_v41  ;;  %v746_v39 = vld [vmem:[#allocation5 + $0x15c8] sm:$0xff]  ;;  %v2925_v42 = vpack.c.bf16 %v474_v38, %v456_v21  ;;  %v908_v38 = vld [vmem:[#allocation5 + $0x1ad8] sm:$0xff] }
 0x137   :  { %v890_v21 = vld [vmem:[#allocation5 + $0x1a48] sm:$0xff] }
 0x138   :  { %2896 = vmatpush1.bf16.msra.mxu1 %v2895_v60  ;;  %v656_v60 = vld [vmem:[#allocation5 + $0x12f8] sm:$0xff] }
 0x139   :  { %3024 = vmatpush1.bf16.msra.mxu0 %v3023_v62  ;;  %2898 = vmatprep.subr.bf16.mxu1 %v2897_v51  ;;  %v3039_v51 = vpack.c.bf16 %v619_v54, %v601_v49  ;;  %v510_v49 = vld [vmem:[#allocation5 + $0xe68] sm:$0xff] }
 0x13a   :  { %3026 = vmatprep.subr.bf16.mxu0 %v3025_v5  ;;  %v637_v5 = vld [vmem:[#allocation5 + $0x1260] sm:$0xff]  ;;  %v782_v54 = vld [vmem:[#allocation5 + $0x16e8] sm:$0xff] }
 0x13c   :  { %2900 = vmatpush1.bf16.msra.mxu1 %v2899_v9  ;;  %v2915_v9 = vpack.c.bf16 %v365_v4, %v347_v2  ;;  %v3057_v4 = vpack.c.bf16 %v800_v56, %v782_v54  ;;  %v635_v54 = vld [vmem:[#allocation5 + $0x1250] sm:$0xff]  ;;  %v653_v56 = vld [vmem:[#allocation5 + $0x12e0] sm:$0xff] }
 0x13d   :  { %3028 = vmatpush1.bf16.msra.mxu0 %v3027_v11  ;;  %2902 = vmatprep.subr.bf16.mxu1 %v2901_v12  ;;  %v3043_v11 = vpack.c.bf16 %v655_v6, %v637_v5  ;;  %v2917_v12 = vpack.c.bf16 %v402_v7, %v384_v24  ;;  %v799_v5 = vld [vmem:[#allocation5 + $0x1770] sm:$0xff]  ;;  %v546_v6 = vld [vmem:[#allocation5 + $0xf88] sm:$0xff] }
 0x13e   :  { %v991_v36 = vpop.f32.mrb[0].mxu1  ;;  %3030 = vmatprep.subr.bf16.mxu0 %v3029_v16  ;;  %v3045_v16 = vpack.c.bf16 %v692_v8, %v674_v50  ;;  %v818_v7 = vld [vmem:[#allocation5 + $0x1808] sm:$0xff]  ;;  %v836_v50 = vld [vmem:[#allocation5 + $0x1898] sm:$0xff] }
 0x13f   :  { %v992_v28 = vadd.f32 %v991_v36, %v3565_v27  ;;  %v993_v40 = vpop.f32.mrb[1].mxu1  ;;  %v3049_v36 = vpack.c.bf16 %v728_v25, %v710_v20 }
 0x140   :  { %v994_v43 = vadd.f32 %v993_v40, %v3565_v27  ;;  %2904 = vmatpush1.bf16.msra.mxu1 %v2903_v29  ;;  %v2919_v29 = vpack.c.bf16 %v401_v14, %v383_v13  ;;  %v3575_v40 = vpop.permute.xlu0 %922  ;;  %v545_v13 = vld [vmem:[#allocation5 + $0xf80] sm:$0xff] }
 0x141   :  { %v1069_v44 = vadd.f32 %v3555_v55, %v992_v28  ;;  %3032 = vmatpush1.bf16.msra.mxu0 %v3031_v31  ;;  %2906 = vmatprep.subr.bf16.mxu1 %v2905_v32  ;;  %v2911_v55 = vpack.c.bf16 %v329_v48, %v311_v47  ;;  %v3047_v31 = vpack.c.bf16 %v691_v17, %v673_v15  ;;  %v764_v28 = vld [vmem:[#allocation5 + $0x1658] sm:$0xff]  ;;  %v763_v47 = vld [vmem:[#allocation5 + $0x1650] sm:$0xff]  ;;  %v817_v14 = vld [vmem:[#allocation5 + $0x1800] sm:$0xff] }
 0x142   :  { %v1071_v52 = vadd.f32 %v3557_v57, %v994_v43  ;;  %3034 = vmatprep.subr.bf16.mxu0 %v3033_v37  ;;  %v3041_v57 = vpack.c.bf16 %v656_v60, %v638_v22  ;;  %v2921_v32 = vpack.c.bf16 %v438_v19, %v420_v18  ;;  %v727_v37 = vld [vmem:[#allocation5 + $0x1530] sm:$0xff]  ;;  %v492_v48 = vld [vmem:[#allocation5 + $0xdd8] sm:$0xff]  ;;  %v582_v17 = vld [vmem:[#allocation5 + $0x10a8] sm:$0xff] }
 0x143   :  { %v2311_v59 = vmax.f32 %v1069_v44, 0.0  ;;  %v3051_v41 = vpack.c.bf16 %v727_v37, %v709_v35  ;;  %v455_v43 = vld [vmem:[#allocation5 + $0xcb0] sm:$0xff]  ;;  %v745_v44 = vld [vmem:[#allocation5 + $0x15c0] sm:$0xff]  ;;  %v854_v18 = vld [vmem:[#allocation5 + $0x1928] sm:$0xff] }
 0x144   :  { %v2312_v62 = vmax.f32 %v1071_v52, 0.0  ;;  %2908 = vmatpush1.bf16.msra.mxu1 %v2907_v23  ;;  %v473_v23 = vld [vmem:[#allocation5 + $0xd40] sm:$0xff]  ;;  %v3055_v60 = vpack.c.bf16 %v763_v47, %v745_v44  ;;  %v835_v15 = vld [vmem:[#allocation5 + $0x1890] sm:$0xff]  ;;  %v872_v19 = vld [vmem:[#allocation5 + $0x19b8] sm:$0xff] }
 0x145   :  { %2347 = vst [vmem:[#allocation7] sm:$0xff] %v2311_v59  ;;  %3036 = vmatpush1.bf16.msra.mxu0 %v3035_v45  ;;  %2910 = vmatprep.subr.bf16.mxu1 %v2909_v46  ;;  %v997_v45 = vpop.f32.mrb[2].mxu1  ;;  %v3053_v46 = vpack.c.bf16 %v764_v28, %v746_v39  ;;  %v2927_v59 = vpack.c.bf16 %v473_v23, %v455_v43  ;;  %v871_v35 = vld [vmem:[#allocation5 + $0x19b0] sm:$0xff]  ;;  %v618_v37 = vld [vmem:[#allocation5 + $0x11c8] sm:$0xff]  ;;  %v889_v43 = vld [vmem:[#allocation5 + $0x1a40] sm:$0xff] }
 0x146   :  { %2348 = vst [vmem:[#allocation7 + $0x8] sm:$0xff] %v2312_v62  ;;  %3038 = vmatprep.subr.bf16.mxu0 %v3037_v53  ;;  %v999_v52 = vpop.f32.mrb[3].mxu1  ;;  %v998_v53 = vadd.f32 %v997_v45, %v3575_v40  ;;  %v2929_v62 = vpack.c.bf16 %v510_v49, %v492_v48  ;;  %v3063_v25 = vpack.c.bf16 %v835_v15, %v817_v14  ;;  %v907_v44 = vld [vmem:[#allocation5 + $0x1ad0] sm:$0xff]  ;;  %v636_v45 = vld [vmem:[#allocation5 + $0x1258] sm:$0xff]  ;;  %v66_v47 = vld [vmem:[#allocation5 + $0x88] sm:$0xff] }
 0x147   :  { %v1000_v58 = vadd.f32 %v999_v52, %v3575_v40  ;;  %v3069_v23 = vpack.c.bf16 %v908_v38, %v890_v21  ;;  %v84_v48 = vld [vmem:[#allocation5 + $0x118] sm:$0xff]  ;;  %v3071_v52 = vpack.c.bf16 %v907_v44, %v889_v43  ;;  %v707_v15 = vld [vmem:[#allocation5 + $0x1490] sm:$0xff]  ;;  %v209_v44 = vld [vmem:[#allocation5 + $0x500] sm:$0xff] }
 0x148   :  { %2912 = vmatpush1.bf16.msra.mxu1 %v2911_v55  ;;  %v1075_v22 = vadd.f32 %v3563_v26, %v998_v53  ;;  %v491_v55 = vld [vmem:[#allocation5 + $0xdd0] sm:$0xff]  ;;  %v780_v38 = vld [vmem:[#allocation5 + $0x16d8] sm:$0xff] }
 0x149   :  { %3040 = vmatpush1.bf16.msra.mxu0 %v3039_v51  ;;  %2914 = vmatprep.subr.bf16.mxu1 %v2913_v63  ;;  %v509_v51 = vld [vmem:[#allocation5 + $0xe60] sm:$0xff]  ;;  %v1077_v2 = vadd.f32 %v3567_v30, %v1000_v58  ;;  %v3061_v30 = vpack.c.bf16 %v836_v50, %v818_v7  ;;  %v119_v7 = vld [vmem:[#allocation5 + $0x230] sm:$0xff]  ;;  %v708_v50 = vld [vmem:[#allocation5 + $0x1498] sm:$0xff] }
 0x14a   :  { %3042 = vmatprep.subr.bf16.mxu0 %v3041_v57  ;;  %v781_v63 = vld [vmem:[#allocation5 + $0x16e0] sm:$0xff]  ;;  %v528_v57 = vld [vmem:[#allocation5 + $0xef8] sm:$0xff]  ;;  %v2329_v24 = vmax.f32 %v1075_v22, 0.0  ;;  %v2931_v26 = vpack.c.bf16 %v509_v51, %v491_v55  ;;  %v83_v22 = vld [vmem:[#allocation5 + $0x110] sm:$0xff] }
 0x14b   :  { %v2330_v8 = vmax.f32 %v1077_v2, 0.0  ;;  %v65_v58 = vld [vmem:[#allocation5 + $0x80] sm:$0xff]  ;;  %v102_v55 = vld [vmem:[#allocation5 + $0x1a8] sm:$0xff]  ;;  %v120_v51 = vld [vmem:[#allocation5 + $0x238] sm:$0xff] }
 0x14c   :  { %2916 = vmatpush1.bf16.msra.mxu1 %v2915_v9  ;;  %1914 = vmatmul.mubr.f32.vlgmr.msra.gmra.mrb[12].mxu0 %v3535_v10  ;;  %v2923_v10 = vpack.c.bf16 %v437_v34, %v419_v33  ;;  %2365 = vst [vmem:[#allocation7 + $0x90] sm:$0xff] %v2329_v24  ;;  %v3059_v9 = vpack.c.bf16 %v799_v5, %v781_v63  ;;  %v853_v33 = vld [vmem:[#allocation5 + $0x1920] sm:$0xff]  ;;  %v671_v5 = vld [vmem:[#allocation5 + $0x1370] sm:$0xff] }
 0x14d   :  { %3044 = vmatpush1.bf16.msra.mxu0 %v3043_v11  ;;  %2918 = vmatprep.subr.bf16.mxu1 %v2917_v12  ;;  %v2933_v11 = vpack.c.bf16 %v546_v6, %v528_v57  ;;  %v527_v12 = vld [vmem:[#allocation5 + $0xef0] sm:$0xff]  ;;  %2366 = vst [vmem:[#allocation7 + $0x98] sm:$0xff] %v2330_v8  ;;  %v3065_v34 = vpack.c.bf16 %v872_v19, %v854_v18  ;;  %v689_v57 = vld [vmem:[#allocation5 + $0x1400] sm:$0xff]  ;;  %v726_v8 = vld [vmem:[#allocation5 + $0x1528] sm:$0xff] }
 0x14e   :  { %3046 = vmatprep.subr.bf16.mxu0 %v3045_v16  ;;  %1919 = vmatprep.mubr.f32.mxu0 %v3543_v61  ;;  %v564_v16 = vld [vmem:[#allocation5 + $0x1018] sm:$0xff]  ;;  %v2935_v20 = vpack.c.bf16 %v545_v13, %v527_v12  ;;  %v3067_v28 = vpack.c.bf16 %v871_v35, %v853_v33  ;;  %v2947_v63 = vpack.c.bf16 %v653_v56, %v635_v54  ;;  %v101_v6 = vld [vmem:[#allocation5 + $0x1a0] sm:$0xff]  ;;  %v155_v19 = vld [vmem:[#allocation5 + $0x350] sm:$0xff] }
 0x14f   :  { %v3171_v2 = vpack.c.bf16 %v83_v22, %v65_v58  ;;  %v3173_v24 = vpack.c.bf16 %v120_v51, %v102_v55  ;;  %v3586_v12 = vld [vmem:[#allocation2 + $0x10] sm:$0xff]  ;;  %v2951_v13 = vpack.c.bf16 %v689_v57, %v671_v5  ;;  %v3175_v14 = vpack.c.bf16 %v119_v7, %v101_v6  ;;  %v743_v35 = vld [vmem:[#allocation5 + $0x15b0] sm:$0xff]  ;;  %v852_v55 = vld [vmem:[#allocation5 + $0x1918] sm:$0xff] }
 0x150   :  { %2920 = vmatpush1.bf16.msra.mxu1 %v2919_v29  ;;  %1920 = vmatmul.mubr.f32.gmra.mrb[14].mxu0 %v3547_v1  ;;  %v2937_v29 = vpack.c.bf16 %v582_v17, %v564_v16  ;;  %v725_v16 = vld [vmem:[#allocation5 + $0x1520] sm:$0xff]  ;;  %v779_v43 = vld [vmem:[#allocation5 + $0x16d0] sm:$0xff]  ;;  %v870_v51 = vld [vmem:[#allocation5 + $0x19a8] sm:$0xff] }
 0x151   :  { %3048 = vmatpush1.bf16.msra.mxu0 %v3047_v31  ;;  %2922 = vmatprep.subr.bf16.mxu1 %v2921_v32  ;;  %v563_v31 = vld [vmem:[#allocation5 + $0x1010] sm:$0xff]  ;;  %v581_v32 = vld [vmem:[#allocation5 + $0x10a0] sm:$0xff]  ;;  %v2969_v57 = vpack.c.bf16 %v870_v51, %v852_v55 }
 0x152   :  { %3050 = vmatprep.subr.bf16.mxu0 %v3049_v36  ;;  %1990 = vmatprep.mubr.f32.mxu0 %v3437_v0  ;;  %v600_v36 = vld [vmem:[#allocation5 + $0x1138] sm:$0xff]  ;;  %v2939_v39 = vpack.c.bf16 %v581_v32, %v563_v31  ;;  %v137_v17 = vld [vmem:[#allocation5 + $0x2c0] sm:$0xff]  ;;  %v2955_v32 = vpack.c.bf16 %v725_v16, %v707_v15  ;;  %v815_v58 = vld [vmem:[#allocation5 + $0x17f0] sm:$0xff] }
 0x153   :  { %v192_v31 = vld [vmem:[#allocation5 + $0x478] sm:$0xff]  ;;  %v3179_v33 = vpack.c.bf16 %v155_v19, %v137_v17  ;;  %v245_v22 = vld [vmem:[#allocation5 + $0x620] sm:$0xff]  ;;  %v851_v6 = vld [vmem:[#allocation5 + $0x1910] sm:$0xff] }
 0x154   :  { %2924 = vmatpush1.bf16.msra.mxu1 %v2923_v10  ;;  %v2941_v10 = vpack.c.bf16 %v618_v37, %v600_v36  ;;  %v761_v36 = vld [vmem:[#allocation5 + $0x1640] sm:$0xff]  ;;  %v407_v51 = vld [vmem:[#allocation5 + $0xb30] sm:$0xff] }
 0x155   :  { %3052 = vmatpush1.bf16.msra.mxu0 %v3051_v41  ;;  %2926 = vmatprep.subr.bf16.mxu1 %v2925_v42  ;;  %v599_v41 = vld [vmem:[#allocation5 + $0x1130] sm:$0xff]  ;;  %v617_v42 = vld [vmem:[#allocation5 + $0x11c0] sm:$0xff] }
 0x156   :  { %3054 = vmatprep.subr.bf16.mxu0 %v3053_v46  ;;  %v654_v46 = vld [vmem:[#allocation5 + $0x12e8] sm:$0xff]  ;;  %v2943_v49 = vpack.c.bf16 %v617_v42, %v599_v41  ;;  %v173_v37 = vld [vmem:[#allocation5 + $0x3e0] sm:$0xff] }
 0x157   :  { %v2945_v53 = vpack.c.bf16 %v654_v46, %v636_v45  ;;  %v227_v46 = vld [vmem:[#allocation5 + $0x590] sm:$0xff]  ;;  %v281_v7 = vld [vmem:[#allocation5 + $0x740] sm:$0xff] }
 0x158   :  { %2928 = vmatpush1.bf16.msra.mxu1 %v2927_v59  ;;  %v3169_v59 = vpack.c.bf16 %v84_v48, %v66_v47  ;;  %v816_v47 = vld [vmem:[#allocation5 + $0x17f8] sm:$0xff]  ;;  %v834_v48 = vld [vmem:[#allocation5 + $0x1888] sm:$0xff]  ;;  %v3187_v54 = vpack.c.bf16 %v227_v46, %v209_v44  ;;  %v371_v46 = vld [vmem:[#allocation5 + $0xa10] sm:$0xff] }
 0x159   :  { %3056 = vmatpush1.bf16.msra.mxu0 %v3055_v60  ;;  %2930 = vmatprep.subr.bf16.mxu1 %v2929_v62  ;;  %v672_v60 = vld [vmem:[#allocation5 + $0x1378] sm:$0xff]  ;;  %v690_v62 = vld [vmem:[#allocation5 + $0x1408] sm:$0xff]  ;;  %v2965_v56 = vpack.c.bf16 %v834_v48, %v816_v47 }
 0x15a   :  { %3058 = vmatprep.subr.bf16.mxu0 %v3057_v4  ;;  %v2949_v4 = vpack.c.bf16 %v690_v62, %v672_v60  ;;  %v263_v62 = vld [vmem:[#allocation5 + $0x6b0] sm:$0xff]  ;;  %v100_v47 = vld [vmem:[#allocation5 + $0x198] sm:$0xff]  ;;  %v118_v48 = vld [vmem:[#allocation5 + $0x228] sm:$0xff] }
 0x15b   :  { %v3191_v5 = vpack.c.bf16 %v263_v62, %v245_v22  ;;  %v99_v22 = vld [vmem:[#allocation5 + $0x190] sm:$0xff]  ;;  %v389_v62 = vld [vmem:[#allocation5 + $0xaa0] sm:$0xff] }
 0x15c   :  { %2932 = vmatpush1.bf16.msra.mxu1 %v2931_v26  ;;  %v3583_v26 = vld [vmem:[#allocation2] sm:$0xff] }
 0x15d   :  { %3060 = vmatpush1.bf16.msra.mxu0 %v3059_v9  ;;  %2934 = vmatprep.subr.bf16.mxu1 %v2933_v11  ;;  %v138_v9 = vld [vmem:[#allocation5 + $0x2c8] sm:$0xff]  ;;  %v156_v11 = vld [vmem:[#allocation5 + $0x358] sm:$0xff] }
 0x15e   :  { %3062 = vmatprep.subr.bf16.mxu0 %v3061_v30  ;;  %v2953_v30 = vpack.c.bf16 %v726_v8, %v708_v50  ;;  %v3177_v18 = vpack.c.bf16 %v156_v11, %v138_v9  ;;  %v299_v8 = vld [vmem:[#allocation5 + $0x7d0] sm:$0xff]  ;;  %v888_v9 = vld [vmem:[#allocation5 + $0x1a38] sm:$0xff]  ;;  %v906_v11 = vld [vmem:[#allocation5 + $0x1ac8] sm:$0xff] }
 0x15f   :  { %v3195_v19 = vpack.c.bf16 %v299_v8, %v281_v7  ;;  %v135_v7 = vld [vmem:[#allocation5 + $0x2b0] sm:$0xff]  ;;  %v425_v8 = vld [vmem:[#allocation5 + $0xbc0] sm:$0xff] }
 0x160   :  { %2936 = vmatpush1.bf16.msra.mxu1 %v2935_v20  ;;  %v744_v20 = vld [vmem:[#allocation5 + $0x15b8] sm:$0xff] }
 0x161   :  { %3064 = vmatpush1.bf16.msra.mxu0 %v3063_v25  ;;  %2938 = vmatprep.subr.bf16.mxu1 %v2937_v29  ;;  %v762_v25 = vld [vmem:[#allocation5 + $0x1648] sm:$0xff] }
 0x162   :  { %3066 = vmatprep.subr.bf16.mxu0 %v3065_v34  ;;  %v174_v29 = vld [vmem:[#allocation5 + $0x3e8] sm:$0xff]  ;;  %v2957_v34 = vpack.c.bf16 %v762_v25, %v744_v20  ;;  %v2973_v20 = vpack.c.bf16 %v906_v11, %v888_v9  ;;  %v887_v25 = vld [vmem:[#allocation5 + $0x1a30] sm:$0xff] }
 0x163   :  { %v3181_v21 = vpack.c.bf16 %v192_v31, %v174_v29  ;;  %v905_v29 = vld [vmem:[#allocation5 + $0x1ac0] sm:$0xff]  ;;  %v443_v11 = vld [vmem:[#allocation5 + $0xc50] sm:$0xff] }
 0x164   :  { %2940 = vmatpush1.bf16.msra.mxu1 %v2939_v39  ;;  %v798_v39 = vld [vmem:[#allocation5 + $0x1768] sm:$0xff]  ;;  %v317_v31 = vld [vmem:[#allocation5 + $0x860] sm:$0xff] }
 0x165   :  { %3068 = vmatpush1.bf16.msra.mxu0 %v3067_v28  ;;  %2942 = vmatprep.subr.bf16.mxu1 %v2941_v10  ;;  %v210_v28 = vld [vmem:[#allocation5 + $0x508] sm:$0xff]  ;;  %v3594_v10 = vld [vmem:[#allocation2 + $0x8] sm:$0xff]  ;;  %v2961_v42 = vpack.c.bf16 %v798_v39, %v780_v38  ;;  %v2975_v39 = vpack.c.bf16 %v905_v29, %v887_v25  ;;  %v189_v25 = vld [vmem:[#allocation5 + $0x460] sm:$0xff] }
 0x166   :  { %3070 = vmatprep.subr.bf16.mxu0 %v3069_v23  ;;  %v797_v23 = vld [vmem:[#allocation5 + $0x1760] sm:$0xff] }
 0x167   :  { %v461_v29 = vld [vmem:[#allocation5 + $0xce0] sm:$0xff] }
 0x168   :  { %2944 = vmatpush1.bf16.msra.mxu1 %v2943_v49  ;;  %v246_v49 = vld [vmem:[#allocation5 + $0x628] sm:$0xff] }
 0x169   :  { %3072 = vmatpush1.bf16.msra.mxu0 %v3071_v52  ;;  %2946 = vmatprep.subr.bf16.mxu1 %v2945_v53  ;;  %v264_v52 = vld [vmem:[#allocation5 + $0x6b8] sm:$0xff]  ;;  %v2963_v53 = vpack.c.bf16 %v797_v23, %v779_v43  ;;  %v81_v43 = vld [vmem:[#allocation5 + $0x100] sm:$0xff] }
 0x16a   :  { %3170 = vmatprep.subr.bf16.mxu0 %v3169_v59  ;;  %v833_v59 = vld [vmem:[#allocation5 + $0x1880] sm:$0xff]  ;;  %v3189_v60 = vpack.c.bf16 %v264_v52, %v246_v49  ;;  %v390_v52 = vld [vmem:[#allocation5 + $0xaa8] sm:$0xff] }
 0x16b   :  { %1760 = vmatmul.mubr.f32.vlgmr.msra.gmra.mrb[12].mxu1 %v3583_v26  ;;  %v353_v23 = vld [vmem:[#allocation5 + $0x980] sm:$0xff] }
 0x16c   :  { %1991 = vmatmul.mubr.f32.vlgmr.msra.gmra.mrb[12].mxu0 %v3586_v12  ;;  %2948 = vmatpush1.bf16.msra.mxu1 %v2947_v63  ;;  %v282_v63 = vld [vmem:[#allocation5 + $0x748] sm:$0xff] }
 0x16d   :  { %3172 = vmatpush1.bf16.msra.mxu0 %v3171_v2  ;;  %2950 = vmatprep.subr.bf16.mxu1 %v2949_v4  ;;  %v300_v2 = vld [vmem:[#allocation5 + $0x7d8] sm:$0xff]  ;;  %v2967_v4 = vpack.c.bf16 %v833_v59, %v815_v58  ;;  %v3203_v58 = vpack.c.bf16 %v371_v46, %v353_v23  ;;  %v3077_v59 = vpack.c.bf16 %v118_v48, %v100_v47  ;;  %v243_v46 = vld [vmem:[#allocation5 + $0x610] sm:$0xff]  ;;  %v261_v47 = vld [vmem:[#allocation5 + $0x6a0] sm:$0xff] }
 0x16e   :  { %3174 = vmatprep.subr.bf16.mxu0 %v3173_v24  ;;  %1765 = vmatprep.mubr.f32.mxu1 %v3543_v61  ;;  %v191_v61 = vld [vmem:[#allocation5 + $0x470] sm:$0xff]  ;;  %v869_v24 = vld [vmem:[#allocation5 + $0x19a0] sm:$0xff]  ;;  %v3193_v50 = vpack.c.bf16 %v300_v2, %v282_v63  ;;  %v136_v63 = vld [vmem:[#allocation5 + $0x2b8] sm:$0xff] }
 0x16f   :  { %1996 = vmatprep.mubr.f32.mxu0 %v3437_v0  ;;  %1766 = vmatmul.mubr.f32.gmra.mrb[14].mxu1 %v3547_v1  ;;  %v228_v1 = vld [vmem:[#allocation5 + $0x598] sm:$0xff]  ;;  %v3183_v41 = vpack.c.bf16 %v191_v61, %v173_v37  ;;  %v2971_v17 = vpack.c.bf16 %v869_v24, %v851_v6  ;;  %v154_v2 = vld [vmem:[#allocation5 + $0x348] sm:$0xff]  ;;  %v3207_v6 = vpack.c.bf16 %v407_v51, %v389_v62  ;;  %v533_v48 = vld [vmem:[#allocation5 + $0xf20] sm:$0xff] }
 0x170   :  { %2952 = vmatpush1.bf16.msra.mxu1 %v2951_v13  ;;  %1997 = vmatmul.mubr.f32.gmra.mrb[14].mxu0 %v3550_v3  ;;  %v2959_v3 = vpack.c.bf16 %v761_v36, %v743_v35  ;;  %v3185_v45 = vpack.c.bf16 %v228_v1, %v210_v28  ;;  %v64_v35 = vld [vmem:[#allocation5 + $0x78] sm:$0xff]  ;;  %v82_v36 = vld [vmem:[#allocation5 + $0x108] sm:$0xff]  ;;  %v3081_v24 = vpack.c.bf16 %v154_v2, %v136_v63  ;;  %v279_v62 = vld [vmem:[#allocation5 + $0x730] sm:$0xff] }
 0x171   :  { %3176 = vmatpush1.bf16.msra.mxu0 %v3175_v14  ;;  %2954 = vmatprep.subr.bf16.mxu1 %v2953_v30  ;;  %v318_v14 = vld [vmem:[#allocation5 + $0x868] sm:$0xff]  ;;  %v336_v30 = vld [vmem:[#allocation5 + $0x8f8] sm:$0xff]  ;;  %v569_v51 = vld [vmem:[#allocation5 + $0x1040] sm:$0xff] }
 0x172   :  { %3178 = vmatprep.subr.bf16.mxu0 %v3177_v18  ;;  %1836 = vmatprep.mubr.f32.mxu1 %v3437_v0  ;;  %v372_v61 = vld [vmem:[#allocation5 + $0xa18] sm:$0xff] }
 0x173   :  { %2221 = vmatprep.mubr.f32.mxu0 %v3594_v10 }
 0x174   :  { %2956 = vmatpush1.bf16.msra.mxu1 %v2955_v32 }
 0x175   :  { %3180 = vmatpush1.bf16.msra.mxu0 %v3179_v33  ;;  %2958 = vmatprep.subr.bf16.mxu1 %v2957_v34  ;;  %v3197_v33 = vpack.c.bf16 %v336_v30, %v318_v14  ;;  %v335_v34 = vld [vmem:[#allocation5 + $0x8f0] sm:$0xff]  ;;  %v190_v14 = vld [vmem:[#allocation5 + $0x468] sm:$0xff]  ;;  %v3603_v30 = vld [vmem:[#allocation2 + $0x28] sm:$0xff] }
 0x176   :  { %3182 = vmatprep.subr.bf16.mxu0 %v3181_v21  ;;  %v354_v21 = vld [vmem:[#allocation5 + $0x988] sm:$0xff] }
 0x178   :  { %2960 = vmatpush1.bf16.msra.mxu1 %v2959_v3  ;;  %v3199_v3 = vpack.c.bf16 %v335_v34, %v317_v31  ;;  %v226_v34 = vld [vmem:[#allocation5 + $0x588] sm:$0xff] }
 0x179   :  { %3184 = vmatpush1.bf16.msra.mxu0 %v3183_v41  ;;  %2962 = vmatprep.subr.bf16.mxu1 %v2961_v42  ;;  %v3073_v41 = vpack.c.bf16 %v82_v36, %v64_v35  ;;  %v63_v42 = vld [vmem:[#allocation5 + $0x70] sm:$0xff]  ;;  %v498_v35 = vld [vmem:[#allocation5 + $0xe08] sm:$0xff]  ;;  %v516_v36 = vld [vmem:[#allocation5 + $0xe98] sm:$0xff] }
 0x17a   :  { %3186 = vmatprep.subr.bf16.mxu0 %v3185_v45  ;;  %v3201_v45 = vpack.c.bf16 %v372_v61, %v354_v21  ;;  %v207_v61 = vld [vmem:[#allocation5 + $0x4f0] sm:$0xff] }
 0x17c   :  { %2964 = vmatpush1.bf16.msra.mxu1 %v2963_v53  ;;  %v408_v53 = vld [vmem:[#allocation5 + $0xb38] sm:$0xff] }
 0x17d   :  { %3188 = vmatpush1.bf16.msra.mxu0 %v3187_v54  ;;  %2966 = vmatprep.subr.bf16.mxu1 %v2965_v56  ;;  %v3075_v56 = vpack.c.bf16 %v81_v43, %v63_v42  ;;  %v3205_v55 = vpack.c.bf16 %v408_v53, %v390_v52  ;;  %v534_v42 = vld [vmem:[#allocation5 + $0xf28] sm:$0xff]  ;;  %v552_v43 = vld [vmem:[#allocation5 + $0xfb8] sm:$0xff]  ;;  %v551_v52 = vld [vmem:[#allocation5 + $0xfb0] sm:$0xff] }
 0x17e   :  { %3190 = vmatprep.subr.bf16.mxu0 %v3189_v60  ;;  %v117_v60 = vld [vmem:[#allocation5 + $0x220] sm:$0xff]  ;;  %v280_v53 = vld [vmem:[#allocation5 + $0x738] sm:$0xff] }
 0x17f   :  { %v1376_v13 = vpop.f32.mrb[4].mxu0 }
 0x180   :  { %v3277_v15 = vadd.f32 %v1376_v13, %v3565_v27  ;;  %v1378_v16 = vpop.f32.mrb[5].mxu0  ;;  %2968 = vmatpush1.bf16.msra.mxu1 %v2967_v4  ;;  %v426_v4 = vld [vmem:[#allocation5 + $0xbc8] sm:$0xff]  ;;  %v172_v13 = vld [vmem:[#allocation5 + $0x3d8] sm:$0xff] }
 0x181   :  { %v3278_v18 = vadd.f32 %v1378_v16, %v3565_v27  ;;  %3192 = vmatpush1.bf16.msra.mxu0 %v3191_v5  ;;  %2970 = vmatprep.subr.bf16.mxu1 %v2969_v57  ;;  %v444_v5 = vld [vmem:[#allocation5 + $0xc58] sm:$0xff]  ;;  %v3079_v57 = vpack.c.bf16 %v117_v60, %v99_v22  ;;  %v3223_v22 = vpack.c.bf16 %v551_v52, %v533_v48  ;;  %v387_v48 = vld [vmem:[#allocation5 + $0xa90] sm:$0xff]  ;;  %v677_v52 = vld [vmem:[#allocation5 + $0x13a0] sm:$0xff] }
 0x182   :  { %v2315_v32 = vmax.f32 %v3277_v15, 0.0  ;;  %3194 = vmatprep.subr.bf16.mxu0 %v3193_v50  ;;  %v153_v50 = vld [vmem:[#allocation5 + $0x340] sm:$0xff]  ;;  %v3209_v9 = vpack.c.bf16 %v444_v5, %v426_v4  ;;  %v462_v15 = vld [vmem:[#allocation5 + $0xce8] sm:$0xff]  ;;  %v480_v16 = vld [vmem:[#allocation5 + $0xd78] sm:$0xff] }
 0x183   :  { %v2316_v37 = vmax.f32 %v3278_v18, 0.0  ;;  %v1382_v38 = vpop.f32.mrb[6].mxu0  ;;  %v3211_v18 = vpack.c.bf16 %v443_v11, %v425_v8  ;;  %v3213_v31 = vpack.c.bf16 %v480_v16, %v462_v15  ;;  %v587_v4 = vld [vmem:[#allocation5 + $0x10d0] sm:$0xff]  ;;  %v316_v5 = vld [vmem:[#allocation5 + $0x858] sm:$0xff]  ;;  %v333_v16 = vld [vmem:[#allocation5 + $0x8e0] sm:$0xff] }
 0x184   :  { %2351 = vst [vmem:[#allocation7 + $0x20] sm:$0xff] %v2315_v32  ;;  %2972 = vmatpush1.bf16.msra.mxu1 %v2971_v17  ;;  %v3279_v28 = vadd.f32 %v1382_v38, %v3575_v40  ;;  %v1384_v1 = vpop.f32.mrb[7].mxu0  ;;  %v3083_v17 = vpack.c.bf16 %v153_v50, %v135_v7  ;;  %v479_v32 = vld [vmem:[#allocation5 + $0xd70] sm:$0xff]  ;;  %v225_v38 = vld [vmem:[#allocation5 + $0x580] sm:$0xff]  ;;  %v606_v7 = vld [vmem:[#allocation5 + $0x1168] sm:$0xff] }
 0x185   :  { %2352 = vst [vmem:[#allocation7 + $0x28] sm:$0xff] %v2316_v37  ;;  %3196 = vmatpush1.bf16.msra.mxu0 %v3195_v19  ;;  %2974 = vmatprep.subr.bf16.mxu1 %v2973_v20  ;;  %v3280_v44 = vadd.f32 %v1384_v1, %v3575_v40  ;;  %v3085_v19 = vpack.c.bf16 %v190_v14, %v172_v13  ;;  %v171_v20 = vld [vmem:[#allocation5 + $0x3d0] sm:$0xff]  ;;  %v624_v50 = vld [vmem:[#allocation5 + $0x11f8] sm:$0xff] }
 0x186   :  { %3198 = vmatprep.subr.bf16.mxu0 %v3197_v33  ;;  %v2333_v49 = vmax.f32 %v3279_v28, 0.0  ;;  %v208_v33 = vld [vmem:[#allocation5 + $0x4f8] sm:$0xff]  ;;  %v3087_v37 = vpack.c.bf16 %v189_v25, %v171_v20  ;;  %v3215_v21 = vpack.c.bf16 %v479_v32, %v461_v29  ;;  %v3217_v28 = vpack.c.bf16 %v516_v36, %v498_v35  ;;  %v515_v1 = vld [vmem:[#allocation5 + $0xe90] sm:$0xff] }
 0x187   :  { %v2334_v54 = vmax.f32 %v3280_v44, 0.0  ;;  %v3091_v23 = vpack.c.bf16 %v225_v38, %v207_v61  ;;  %v3227_v13 = vpack.c.bf16 %v587_v4, %v569_v51  ;;  %v315_v15 = vld [vmem:[#allocation5 + $0x850] sm:$0xff]  ;;  %v3229_v20 = vpack.c.bf16 %v624_v50, %v606_v7  ;;  %v352_v29 = vld [vmem:[#allocation5 + $0x978] sm:$0xff]  ;;  %v750_v7 = vld [vmem:[#allocation5 + $0x15e8] sm:$0xff] }
 0x188   :  { %2976 = vmatpush1.bf16.msra.mxu1 %v2975_v39  ;;  %2369 = vst [vmem:[#allocation7 + $0xb0] sm:$0xff] %v2333_v49  ;;  %v497_v39 = vld [vmem:[#allocation5 + $0xe00] sm:$0xff]  ;;  %v3221_v49 = vpack.c.bf16 %v552_v43, %v534_v42  ;;  %v623_v25 = vld [vmem:[#allocation5 + $0x11f0] sm:$0xff]  ;;  %v660_v35 = vld [vmem:[#allocation5 + $0x1318] sm:$0xff] }
 0x189   :  { %3200 = vmatpush1.bf16.msra.mxu0 %v3199_v3  ;;  %3074 = vmatprep.subr.bf16.mxu1 %v3073_v41  ;;  %2370 = vst [vmem:[#allocation7 + $0xb8] sm:$0xff] %v2334_v54  ;;  %v244_v3 = vld [vmem:[#allocation5 + $0x618] sm:$0xff]  ;;  %v262_v41 = vld [vmem:[#allocation5 + $0x6a8] sm:$0xff]  ;;  %v3219_v44 = vpack.c.bf16 %v515_v1, %v497_v39  ;;  %v351_v38 = vld [vmem:[#allocation5 + $0x970] sm:$0xff] }
 0x18a   :  { %3202 = vmatprep.subr.bf16.mxu0 %v3201_v45  ;;  %v3093_v45 = vpack.c.bf16 %v262_v41, %v244_v3  ;;  %v298_v54 = vld [vmem:[#allocation5 + $0x7c8] sm:$0xff]  ;;  %v369_v39 = vld [vmem:[#allocation5 + $0xa00] sm:$0xff]  ;;  %v659_v41 = vld [vmem:[#allocation5 + $0x1310] sm:$0xff] }
 0x18b   :  { %1837 = vmatmul.mubr.f32.vlgmr.msra.gmra.mrb[12].mxu1 %v3586_v12  ;;  %v3097_v60 = vpack.c.bf16 %v298_v54, %v280_v53  ;;  %v388_v42 = vld [vmem:[#allocation5 + $0xa98] sm:$0xff]  ;;  %v406_v43 = vld [vmem:[#allocation5 + $0xb28] sm:$0xff]  ;;  %v695_v54 = vld [vmem:[#allocation5 + $0x1430] sm:$0xff] }
 0x18c   :  { %3076 = vmatpush1.bf16.msra.mxu1 %v3075_v56  ;;  %1842 = vmatprep.mubr.f32.mxu1 %v3437_v0  ;;  %v570_v56 = vld [vmem:[#allocation5 + $0x1048] sm:$0xff]  ;;  %v423_v51 = vld [vmem:[#allocation5 + $0xbb0] sm:$0xff]  ;;  %v768_v50 = vld [vmem:[#allocation5 + $0x1678] sm:$0xff] }
 0x18d   :  { %3204 = vmatpush1.bf16.msra.mxu0 %v3203_v58  ;;  %3078 = vmatprep.subr.bf16.mxu1 %v3077_v59  ;;  %v588_v58 = vld [vmem:[#allocation5 + $0x10d8] sm:$0xff]  ;;  %v3095_v59 = vpack.c.bf16 %v261_v47, %v243_v46  ;;  %v3109_v47 = vpack.c.bf16 %v406_v43, %v388_v42  ;;  %v549_v42 = vld [vmem:[#allocation5 + $0xfa0] sm:$0xff] }
 0x18e   :  { %3206 = vmatprep.subr.bf16.mxu0 %v3205_v55  ;;  %v297_v55 = vld [vmem:[#allocation5 + $0x7c0] sm:$0xff]  ;;  %v3225_v2 = vpack.c.bf16 %v588_v58, %v570_v56  ;;  %v424_v56 = vld [vmem:[#allocation5 + $0xbb8] sm:$0xff]  ;;  %v442_v58 = vld [vmem:[#allocation5 + $0xc48] sm:$0xff] }
 0x18f   :  { %1843 = vmatmul.mubr.f32.gmra.mrb[14].mxu1 %v3603_v30  ;;  %v821_v43 = vld [vmem:[#allocation5 + $0x1820] sm:$0xff] }
 0x190   :  { %3080 = vmatpush1.bf16.msra.mxu1 %v3079_v57  ;;  %2067 = vmatprep.mubr.f32.mxu1 %v3594_v10  ;;  %v3089_v10 = vpack.c.bf16 %v226_v34, %v208_v33  ;;  %v334_v57 = vld [vmem:[#allocation5 + $0x8e8] sm:$0xff] }
 0x191   :  { %3208 = vmatpush1.bf16.msra.mxu0 %v3207_v6  ;;  %3082 = vmatprep.subr.bf16.mxu1 %v3081_v24  ;;  %v3101_v14 = vpack.c.bf16 %v334_v57, %v316_v5  ;;  %v642_v34 = vld [vmem:[#allocation5 + $0x1288] sm:$0xff]  ;;  %v731_v5 = vld [vmem:[#allocation5 + $0x1550] sm:$0xff]  ;;  %v460_v57 = vld [vmem:[#allocation5 + $0xcd8] sm:$0xff] }
 0x192   :  { %3210 = vmatprep.subr.bf16.mxu0 %v3209_v9  ;;  %v3099_v9 = vpack.c.bf16 %v297_v55, %v279_v62  ;;  %v3233_v3 = vpack.c.bf16 %v660_v35, %v642_v34  ;;  %v3239_v62 = vpack.c.bf16 %v695_v54, %v677_v52  ;;  %v3113_v55 = vpack.c.bf16 %v442_v58, %v424_v56  ;;  %v495_v34 = vld [vmem:[#allocation5 + $0xdf0] sm:$0xff]  ;;  %v513_v35 = vld [vmem:[#allocation5 + $0xe80] sm:$0xff] }
 0x193   :  { %v567_v54 = vld [vmem:[#allocation5 + $0x1030] sm:$0xff]  ;;  %v585_v56 = vld [vmem:[#allocation5 + $0x10c0] sm:$0xff] }
 0x194   :  { %3084 = vmatpush1.bf16.msra.mxu1 %v3083_v17  ;;  %v605_v17 = vld [vmem:[#allocation5 + $0x1160] sm:$0xff] }
 0x195   :  { %3212 = vmatpush1.bf16.msra.mxu0 %v3211_v18  ;;  %3086 = vmatprep.subr.bf16.mxu1 %v3085_v19  ;;  %v857_v58 = vld [vmem:[#allocation5 + $0x1940] sm:$0xff] }
 0x196   :  { %3214 = vmatprep.subr.bf16.mxu0 %v3213_v31  ;;  %v370_v31 = vld [vmem:[#allocation5 + $0xa08] sm:$0xff] }
 0x197   :  { %v3105_v61 = vpack.c.bf16 %v370_v31, %v352_v29  ;;  %v804_v29 = vld [vmem:[#allocation5 + $0x1798] sm:$0xff] }
 0x198   :  { %3088 = vmatpush1.bf16.msra.mxu1 %v3087_v37  ;;  %v3103_v37 = vpack.c.bf16 %v333_v16, %v315_v15  ;;  %v477_v15 = vld [vmem:[#allocation5 + $0xd60] sm:$0xff] }
 0x199   :  { %3216 = vmatpush1.bf16.msra.mxu0 %v3215_v21  ;;  %3090 = vmatprep.subr.bf16.mxu1 %v3089_v10  ;;  %v3231_v10 = vpack.c.bf16 %v623_v25, %v605_v17  ;;  %v749_v16 = vld [vmem:[#allocation5 + $0x15e0] sm:$0xff]  ;;  %v3245_v17 = vpack.c.bf16 %v768_v50, %v750_v7  ;;  %v786_v25 = vld [vmem:[#allocation5 + $0x1708] sm:$0xff]  ;;  %v911_v50 = vld [vmem:[#allocation5 + $0x1af0] sm:$0xff] }
 0x19a   :  { %3218 = vmatprep.subr.bf16.mxu0 %v3217_v28  ;;  %v641_v28 = vld [vmem:[#allocation5 + $0x1280] sm:$0xff] }
 0x19b   :  { %v3235_v46 = vpack.c.bf16 %v659_v41, %v641_v28  ;;  %v3123_v28 = vpack.c.bf16 %v513_v35, %v495_v34  ;;  %v531_v41 = vld [vmem:[#allocation5 + $0xf10] sm:$0xff] }
 0x19c   :  { %3092 = vmatpush1.bf16.msra.mxu1 %v3091_v23  ;;  %v678_v23 = vld [vmem:[#allocation5 + $0x13a8] sm:$0xff] }
 0x19d   :  { %3220 = vmatpush1.bf16.msra.mxu0 %v3219_v44  ;;  %3094 = vmatprep.subr.bf16.mxu1 %v3093_v45  ;;  %v696_v44 = vld [vmem:[#allocation5 + $0x1438] sm:$0xff]  ;;  %v3107_v45 = vpack.c.bf16 %v369_v39, %v351_v38  ;;  %v822_v38 = vld [vmem:[#allocation5 + $0x1828] sm:$0xff] }
 0x19e   :  { %v1222_v63 = vpop.f32.mrb[4].mxu1  ;;  %3222 = vmatprep.subr.bf16.mxu0 %v3221_v49  ;;  %v405_v49 = vld [vmem:[#allocation5 + $0xb20] sm:$0xff]  ;;  %v3237_v53 = vpack.c.bf16 %v696_v44, %v678_v23  ;;  %v840_v39 = vld [vmem:[#allocation5 + $0x18b8] sm:$0xff]  ;;  %v839_v44 = vld [vmem:[#allocation5 + $0x18b0] sm:$0xff] }
 0x19f   :  { %v3273_v6 = vadd.f32 %v1222_v63, %v3565_v27  ;;  %v1224_v24 = vpop.f32.mrb[5].mxu1  ;;  %v441_v63 = vld [vmem:[#allocation5 + $0xc40] sm:$0xff]  ;;  %v3253_v23 = vpack.c.bf16 %v840_v39, %v822_v38  ;;  %v3255_v52 = vpack.c.bf16 %v839_v44, %v821_v43  ;;  %v747_v38 = vld [vmem:[#allocation5 + $0x15d0] sm:$0xff]  ;;  %v820_v43 = vld [vmem:[#allocation5 + $0x1818] sm:$0xff] }
 0x1a0   :  { %v3274_v8 = vadd.f32 %v1224_v24, %v3565_v27  ;;  %3096 = vmatpush1.bf16.msra.mxu1 %v3095_v59  ;;  %v714_v59 = vld [vmem:[#allocation5 + $0x14c8] sm:$0xff]  ;;  %v3612_v24 = vld [vmem:[#allocation2 + $0x20] sm:$0xff]  ;;  %v765_v39 = vld [vmem:[#allocation5 + $0x1660] sm:$0xff] }
 0x1a1   :  { %v2313_v11 = vmax.f32 %v3273_v6, 0.0  ;;  %3224 = vmatpush1.bf16.msra.mxu0 %v3223_v22  ;;  %3098 = vmatprep.subr.bf16.mxu1 %v3097_v60  ;;  %v732_v22 = vld [vmem:[#allocation5 + $0x1558] sm:$0xff]  ;;  %v3111_v60 = vpack.c.bf16 %v405_v49, %v387_v48  ;;  %v478_v6 = vld [vmem:[#allocation5 + $0xd68] sm:$0xff]  ;;  %v3127_v49 = vpack.c.bf16 %v549_v42, %v531_v41  ;;  %v783_v42 = vld [vmem:[#allocation5 + $0x16f0] sm:$0xff] }
 0x1a2   :  { %v2314_v18 = vmax.f32 %v3274_v8, 0.0  ;;  %v1228_v19 = vpop.f32.mrb[6].mxu1  ;;  %3226 = vmatprep.subr.bf16.mxu0 %v3225_v2  ;;  %v713_v2 = vld [vmem:[#allocation5 + $0x14c0] sm:$0xff]  ;;  %v3241_v4 = vpack.c.bf16 %v732_v22, %v714_v59  ;;  %v3115_v8 = vpack.c.bf16 %v441_v63, %v423_v51  ;;  %v876_v48 = vld [vmem:[#allocation5 + $0x19d8] sm:$0xff]  ;;  %v875_v22 = vld [vmem:[#allocation5 + $0x19d0] sm:$0xff]  ;;  %v3131_v63 = vpack.c.bf16 %v585_v56, %v567_v54 }
 0x1a3   :  { %2349 = vst [vmem:[#allocation7 + $0x10] sm:$0xff] %v2313_v11  ;;  %v3275_v32 = vadd.f32 %v1228_v19, %v3575_v40  ;;  %v1230_v33 = vpop.f32.mrb[7].mxu1  ;;  %v3243_v11 = vpack.c.bf16 %v731_v5, %v713_v2  ;;  %v496_v19 = vld [vmem:[#allocation5 + $0xdf8] sm:$0xff]  ;;  %v3259_v2 = vpack.c.bf16 %v875_v22, %v857_v58  ;;  %v603_v5 = vld [vmem:[#allocation5 + $0x1150] sm:$0xff]  ;;  %v873_v54 = vld [vmem:[#allocation5 + $0x19c0] sm:$0xff] }
 0x1a4   :  { %2350 = vst [vmem:[#allocation7 + $0x18] sm:$0xff] %v2314_v18  ;;  %v3276_v36 = vadd.f32 %v1230_v33, %v3575_v40  ;;  %3100 = vmatpush1.bf16.msra.mxu1 %v3099_v9  ;;  %v3615_v9 = vld [vmem:[#allocation2 + $0x18] sm:$0xff]  ;;  %v767_v18 = vld [vmem:[#allocation5 + $0x1670] sm:$0xff]  ;;  %v912_v51 = vld [vmem:[#allocation5 + $0x1af8] sm:$0xff] }
 0x1a5   :  { %v2331_v21 = vmax.f32 %v3275_v32, 0.0  ;;  %3228 = vmatpush1.bf16.msra.mxu0 %v3227_v13  ;;  %3102 = vmatprep.subr.bf16.mxu1 %v3101_v14  ;;  %v3117_v13 = vpack.c.bf16 %v478_v6, %v460_v57  ;;  %v459_v14 = vld [vmem:[#allocation5 + $0xcd0] sm:$0xff]  ;;  %v3247_v32 = vpack.c.bf16 %v767_v18, %v749_v16  ;;  %v621_v57 = vld [vmem:[#allocation5 + $0x11e0] sm:$0xff]  ;;  %v676_v18 = vld [vmem:[#allocation5 + $0x1398] sm:$0xff] }
 0x1a6   :  { %v2332_v1 = vmax.f32 %v3276_v36, 0.0  ;;  %3230 = vmatprep.subr.bf16.mxu0 %v3229_v20  ;;  %v514_v20 = vld [vmem:[#allocation5 + $0xe88] sm:$0xff]  ;;  %v3119_v31 = vpack.c.bf16 %v477_v15, %v459_v14  ;;  %v785_v36 = vld [vmem:[#allocation5 + $0x1700] sm:$0xff]  ;;  %v639_v16 = vld [vmem:[#allocation5 + $0x1270] sm:$0xff] }
 0x1a7   :  { %2367 = vst [vmem:[#allocation7 + $0xa0] sm:$0xff] %v2331_v21  ;;  %v3121_v33 = vpack.c.bf16 %v514_v20, %v496_v19  ;;  %v803_v21 = vld [vmem:[#allocation5 + $0x1790] sm:$0xff]  ;;  %v893_v6 = vld [vmem:[#allocation5 + $0x1a60] sm:$0xff]  ;;  %v694_v19 = vld [vmem:[#allocation5 + $0x1428] sm:$0xff] }
 0x1a8   :  { %2368 = vst [vmem:[#allocation7 + $0xa8] sm:$0xff] %v2332_v1  ;;  %3104 = vmatpush1.bf16.msra.mxu1 %v3103_v37  ;;  %v3249_v37 = vpack.c.bf16 %v804_v29, %v786_v25  ;;  %v3251_v1 = vpack.c.bf16 %v803_v21, %v785_v36  ;;  %v3263_v14 = vpack.c.bf16 %v911_v50, %v893_v6  ;;  %v675_v29 = vld [vmem:[#allocation5 + $0x1390] sm:$0xff]  ;;  %v748_v21 = vld [vmem:[#allocation5 + $0x15d8] sm:$0xff]  ;;  %v910_v58 = vld [vmem:[#allocation5 + $0x1ae8] sm:$0xff] }
 0x1a9   :  { %3232 = vmatpush1.bf16.msra.mxu0 %v3231_v10  ;;  %3106 = vmatprep.subr.bf16.mxu1 %v3105_v61  ;;  %v532_v10 = vld [vmem:[#allocation5 + $0xf18] sm:$0xff]  ;;  %v550_v61 = vld [vmem:[#allocation5 + $0xfa8] sm:$0xff]  ;;  %v3141_v25 = vpack.c.bf16 %v694_v19, %v676_v18  ;;  %v711_v36 = vld [vmem:[#allocation5 + $0x14b0] sm:$0xff] }
 0x1aa   :  { %3234 = vmatprep.subr.bf16.mxu0 %v3233_v3  ;;  %v3125_v3 = vpack.c.bf16 %v550_v61, %v532_v10  ;;  %v766_v10 = vld [vmem:[#allocation5 + $0x1668] sm:$0xff]  ;;  %v892_v56 = vld [vmem:[#allocation5 + $0x1a58] sm:$0xff] }
 0x1ac   :  { %3108 = vmatpush1.bf16.msra.mxu1 %v3107_v45  ;;  %2222 = vmatmul.mubr.f32.vlgmr.msra.gmra.mrb[16].mxu0 %v3583_v26  ;;  %v568_v45 = vld [vmem:[#allocation5 + $0x1038] sm:$0xff] }
 0x1ad   :  { %3236 = vmatpush1.bf16.msra.mxu0 %v3235_v46  ;;  %3110 = vmatprep.subr.bf16.mxu1 %v3109_v47  ;;  %v586_v46 = vld [vmem:[#allocation5 + $0x10c8] sm:$0xff] }
 0x1ae   :  { %3238 = vmatprep.subr.bf16.mxu0 %v3237_v53  ;;  %2227 = vmatprep.mubr.f32.mxu0 %v3612_v24  ;;  %v858_v47 = vld [vmem:[#allocation5 + $0x1948] sm:$0xff]  ;;  %v3129_v53 = vpack.c.bf16 %v586_v46, %v568_v45  ;;  %v819_v45 = vld [vmem:[#allocation5 + $0x1810] sm:$0xff]  ;;  %v837_v46 = vld [vmem:[#allocation5 + $0x18a0] sm:$0xff] }
 0x1af   :  { %v3257_v59 = vpack.c.bf16 %v876_v48, %v858_v47  ;;  %v856_v47 = vld [vmem:[#allocation5 + $0x1938] sm:$0xff]  ;;  %v874_v48 = vld [vmem:[#allocation5 + $0x19c8] sm:$0xff] }
 0x1b0   :  { %3112 = vmatpush1.bf16.msra.mxu1 %v3111_v60  ;;  %2228 = vmatmul.mubr.f32.gmra.mrb[18].mxu0 %v3615_v9  ;;  %v604_v60 = vld [vmem:[#allocation5 + $0x1158] sm:$0xff] }
 0x1b1   :  { %3240 = vmatpush1.bf16.msra.mxu0 %v3239_v62  ;;  %3114 = vmatprep.subr.bf16.mxu1 %v3113_v55  ;;  %v622_v62 = vld [vmem:[#allocation5 + $0x11e8] sm:$0xff] }
 0x1b2   :  { %3242 = vmatprep.subr.bf16.mxu0 %v3241_v4  ;;  %2298 = vmatprep.mubr.f32.mxu0 %v3437_v0  ;;  %v894_v55 = vld [vmem:[#allocation5 + $0x1a68] sm:$0xff]  ;;  %v3133_v4 = vpack.c.bf16 %v622_v62, %v604_v60 }
 0x1b3   :  { %v3261_v7 = vpack.c.bf16 %v912_v51, %v894_v55  ;;  %v3165_v51 = vpack.c.bf16 %v910_v58, %v892_v56 }
 0x1b4   :  { %3116 = vmatpush1.bf16.msra.mxu1 %v3115_v8  ;;  %v640_v8 = vld [vmem:[#allocation5 + $0x1278] sm:$0xff] }
 0x1b5   :  { %3244 = vmatpush1.bf16.msra.mxu0 %v3243_v11  ;;  %3118 = vmatprep.subr.bf16.mxu1 %v3117_v13  ;;  %v658_v11 = vld [vmem:[#allocation5 + $0x1308] sm:$0xff]  ;;  %v3135_v13 = vpack.c.bf16 %v621_v57, %v603_v5 }
 0x1b6   :  { %3246 = vmatprep.subr.bf16.mxu0 %v3245_v17  ;;  %v3137_v15 = vpack.c.bf16 %v658_v11, %v640_v8  ;;  %v657_v17 = vld [vmem:[#allocation5 + $0x1300] sm:$0xff] }
 0x1b7   :  { %v3139_v20 = vpack.c.bf16 %v657_v17, %v639_v16 }
 0x1b8   :  { %3120 = vmatpush1.bf16.msra.mxu1 %v3119_v31  ;;  %v693_v31 = vld [vmem:[#allocation5 + $0x1420] sm:$0xff] }
 0x1b9   :  { %3248 = vmatpush1.bf16.msra.mxu0 %v3247_v32  ;;  %3122 = vmatprep.subr.bf16.mxu1 %v3121_v33  ;;  %v712_v32 = vld [vmem:[#allocation5 + $0x14b8] sm:$0xff]  ;;  %v730_v33 = vld [vmem:[#allocation5 + $0x1548] sm:$0xff]  ;;  %v3143_v34 = vpack.c.bf16 %v693_v31, %v675_v29 }
 0x1ba   :  { %3250 = vmatprep.subr.bf16.mxu0 %v3249_v37  ;;  %v3145_v35 = vpack.c.bf16 %v730_v33, %v712_v32  ;;  %v729_v37 = vld [vmem:[#allocation5 + $0x1540] sm:$0xff] }
 0x1bb   :  { %v3147_v61 = vpack.c.bf16 %v729_v37, %v711_v36 }
 0x1bc   :  { %3124 = vmatpush1.bf16.msra.mxu1 %v3123_v28  ;;  %v784_v28 = vld [vmem:[#allocation5 + $0x16f8] sm:$0xff] }
 0x1bd   :  { %3252 = vmatpush1.bf16.msra.mxu0 %v3251_v1  ;;  %3126 = vmatprep.subr.bf16.mxu1 %v3125_v3  ;;  %v802_v1 = vld [vmem:[#allocation5 + $0x1788] sm:$0xff]  ;;  %v3151_v3 = vpack.c.bf16 %v765_v39, %v747_v38 }
 0x1be   :  { %3254 = vmatprep.subr.bf16.mxu0 %v3253_v23  ;;  %v3153_v41 = vpack.c.bf16 %v802_v1, %v784_v28 }
 0x1c0   :  { %3128 = vmatpush1.bf16.msra.mxu1 %v3127_v49  ;;  %v3159_v49 = vpack.c.bf16 %v837_v46, %v819_v45 }
 0x1c1   :  { %3256 = vmatpush1.bf16.msra.mxu0 %v3255_v52  ;;  %3130 = vmatprep.subr.bf16.mxu1 %v3129_v53  ;;  %v3161_v52 = vpack.c.bf16 %v874_v48, %v856_v47  ;;  %v855_v53 = vld [vmem:[#allocation5 + $0x1930] sm:$0xff] }
 0x1c2   :  { %3258 = vmatprep.subr.bf16.mxu0 %v3257_v59  ;;  %v3163_v62 = vpack.c.bf16 %v873_v54, %v855_v53 }
 0x1c4   :  { %3132 = vmatpush1.bf16.msra.mxu1 %v3131_v63  ;;  %v891_v63 = vld [vmem:[#allocation5 + $0x1a50] sm:$0xff] }
 0x1c5   :  { %3260 = vmatpush1.bf16.msra.mxu0 %v3259_v2  ;;  %3134 = vmatprep.subr.bf16.mxu1 %v3133_v4  ;;  %v909_v2 = vld [vmem:[#allocation5 + $0x1ae0] sm:$0xff] }
 0x1c6   :  { %3262 = vmatprep.subr.bf16.mxu0 %v3261_v7  ;;  %v3167_v6 = vpack.c.bf16 %v909_v2, %v891_v63 }
 0x1c8   :  { %3136 = vmatpush1.bf16.msra.mxu1 %v3135_v13 }
 0x1c9   :  { %3264 = vmatpush1.bf16.msra.mxu0 %v3263_v14  ;;  %3138 = vmatprep.subr.bf16.mxu1 %v3137_v15 }
 0x1cb   :  { %2068 = vmatmul.mubr.f32.vlgmr.msra.gmra.mrb[16].mxu1 %v3583_v26  ;;  %v3149_v26 = vpack.c.bf16 %v766_v10, %v748_v21 }
 0x1cc   :  { %2299 = vmatmul.mubr.f32.vlgmr.msra.gmra.mrb[16].mxu0 %v3586_v12  ;;  %3140 = vmatpush1.bf16.msra.mxu1 %v3139_v20 }
 0x1cd   :  { %3142 = vmatprep.subr.bf16.mxu1 %v3141_v25  ;;  %2304 = vmatprep.mubr.f32.mxu0 %v3437_v0 }
 0x1ce   :  { %2073 = vmatprep.mubr.f32.mxu1 %v3612_v24  ;;  %v801_v24 = vld [vmem:[#allocation5 + $0x1780] sm:$0xff] }
 0x1cf   :  { %2074 = vmatmul.mubr.f32.gmra.mrb[18].mxu1 %v3615_v9  ;;  %v838_v9 = vld [vmem:[#allocation5 + $0x18a8] sm:$0xff]  ;;  %v3155_v23 = vpack.c.bf16 %v801_v24, %v783_v42 }
 0x1d0   :  { %3144 = vmatpush1.bf16.msra.mxu1 %v3143_v34  ;;  %2305 = vmatmul.mubr.f32.gmra.mrb[18].mxu0 %v3603_v30  ;;  %v3157_v44 = vpack.c.bf16 %v838_v9, %v820_v43 }
 0x1d1   :  { %3146 = vmatprep.subr.bf16.mxu1 %v3145_v35  ;;  %2144 = vmatprep.mubr.f32.mxu1 %v3437_v0 }
 0x1d4   :  { %3148 = vmatpush1.bf16.msra.mxu1 %v3147_v61 }
 0x1d5   :  { %3150 = vmatprep.subr.bf16.mxu1 %v3149_v26 }
 0x1d8   :  { %3152 = vmatpush1.bf16.msra.mxu1 %v3151_v3 }
 0x1d9   :  { %3154 = vmatprep.subr.bf16.mxu1 %v3153_v41 }
 0x1dc   :  { %3156 = vmatpush1.bf16.msra.mxu1 %v3155_v23 }
 0x1dd   :  { %3158 = vmatprep.subr.bf16.mxu1 %v3157_v44 }
 0x1df   :  { %v1684_v59 = vpop.f32.mrb[8].mxu0 }
 0x1e0   :  { %v3285_v22 = vadd.f32 %v1684_v59, %v3565_v27  ;;  %v1686_v60 = vpop.f32.mrb[9].mxu0  ;;  %3160 = vmatpush1.bf16.msra.mxu1 %v3159_v49 }
 0x1e1   :  { %v3286_v55 = vadd.f32 %v1686_v60, %v3565_v27  ;;  %3162 = vmatprep.subr.bf16.mxu1 %v3161_v52 }
 0x1e2   :  { %v2319_v4 = vmax.f32 %v3285_v22, 0.0 }
 0x1e3   :  { %v2320_v5 = vmax.f32 %v3286_v55, 0.0  ;;  %v1690_v57 = vpop.f32.mrb[10].mxu0 }
 0x1e4   :  { %2355 = vst [vmem:[#allocation7 + $0x40] sm:$0xff] %v2319_v4  ;;  %3164 = vmatpush1.bf16.msra.mxu1 %v3163_v62  ;;  %v3287_v7 = vadd.f32 %v1690_v57, %v3575_v40  ;;  %v1692_v50 = vpop.f32.mrb[11].mxu0 }
 0x1e5   :  { %2356 = vst [vmem:[#allocation7 + $0x48] sm:$0xff] %v2320_v5  ;;  %3166 = vmatprep.subr.bf16.mxu1 %v3165_v51  ;;  %v3288_v8 = vadd.f32 %v1692_v50, %v3575_v40 }
 0x1e6   :  { %v2337_v11 = vmax.f32 %v3287_v7, 0.0 }
 0x1e7   :  { %v2338_v13 = vmax.f32 %v3288_v8, 0.0 }
 0x1e8   :  { %3168 = vmatpush1.bf16.msra.mxu1 %v3167_v6  ;;  %2373 = vst [vmem:[#allocation7 + $0xd0] sm:$0xff] %v2337_v11 }
 0x1e9   :  { %2374 = vst [vmem:[#allocation7 + $0xd8] sm:$0xff] %v2338_v13 }
 0x1eb   :  { %2145 = vmatmul.mubr.f32.vlgmr.msra.gmra.mrb[16].mxu1 %v3586_v12 }
 0x1ec   :  { %2150 = vmatprep.mubr.f32.mxu1 %v3437_v0 }
 0x1ef   :  { %2151 = vmatmul.mubr.f32.gmra.mrb[18].mxu1 %v3603_v30 }
 0x1fe   :  { %v1530_v14 = vpop.f32.mrb[8].mxu1 }
 0x1ff   :  { %v3281_v15 = vadd.f32 %v1530_v14, %v3565_v27  ;;  %v1532_v16 = vpop.f32.mrb[9].mxu1 }
 0x200   :  { %v3282_v17 = vadd.f32 %v1532_v16, %v3565_v27 }
 0x201   :  { %v2317_v18 = vmax.f32 %v3281_v15, 0.0 }
 0x202   :  { %v2318_v19 = vmax.f32 %v3282_v17, 0.0  ;;  %v1536_v20 = vpop.f32.mrb[10].mxu1 }
 0x203   :  { %2353 = vst [vmem:[#allocation7 + $0x30] sm:$0xff] %v2317_v18  ;;  %v3283_v25 = vadd.f32 %v1536_v20, %v3575_v40  ;;  %v1538_v29 = vpop.f32.mrb[11].mxu1 }
 0x204   :  { %2354 = vst [vmem:[#allocation7 + $0x38] sm:$0xff] %v2318_v19  ;;  %v3284_v12 = vadd.f32 %v1538_v29, %v3575_v40 }
 0x205   :  { %v2335_v31 = vmax.f32 %v3283_v25, 0.0 }
 0x206   :  { %v2336_v0 = vmax.f32 %v3284_v12, 0.0 }
 0x207   :  { %2371 = vst [vmem:[#allocation7 + $0xc0] sm:$0xff] %v2335_v31 }
 0x208   :  { %2372 = vst [vmem:[#allocation7 + $0xc8] sm:$0xff] %v2336_v0 }
 0x23f   :  { %v1992_v30 = vpop.f32.mrb[12].mxu0 }
 0x240   :  { %v3293_v32 = vadd.f32 %v1992_v30, %v3565_v27  ;;  %v1994_v33 = vpop.f32.mrb[13].mxu0 }
 0x241   :  { %v3294_v34 = vadd.f32 %v1994_v33, %v3565_v27 }
 0x242   :  { %v2323_v35 = vmax.f32 %v3293_v32, 0.0 }
 0x243   :  { %v2324_v36 = vmax.f32 %v3294_v34, 0.0  ;;  %v1998_v37 = vpop.f32.mrb[14].mxu0 }
 0x244   :  { %2359 = vst [vmem:[#allocation7 + $0x60] sm:$0xff] %v2323_v35  ;;  %v3295_v21 = vadd.f32 %v1998_v37, %v3575_v40  ;;  %v2000_v10 = vpop.f32.mrb[15].mxu0 }
 0x245   :  { %2360 = vst [vmem:[#allocation7 + $0x68] sm:$0xff] %v2324_v36  ;;  %v3296_v61 = vadd.f32 %v2000_v10, %v3575_v40 }
 0x246   :  { %v2341_v26 = vmax.f32 %v3295_v21, 0.0 }
 0x247   :  { %v2342_v38 = vmax.f32 %v3296_v61, 0.0 }
 0x248   :  { %2377 = vst [vmem:[#allocation7 + $0xf0] sm:$0xff] %v2341_v26 }
 0x249   :  { %2378 = vst [vmem:[#allocation7 + $0xf8] sm:$0xff] %v2342_v38 }
 0x25e   :  { %v1838_v39 = vpop.f32.mrb[12].mxu1 }
 0x25f   :  { %v3289_v28 = vadd.f32 %v1838_v39, %v3565_v27  ;;  %v1840_v1 = vpop.f32.mrb[13].mxu1 }
 0x260   :  { %v3290_v3 = vadd.f32 %v1840_v1, %v3565_v27 }
 0x261   :  { %v2321_v41 = vmax.f32 %v3289_v28, 0.0 }
 0x262   :  { %v2322_v42 = vmax.f32 %v3290_v3, 0.0  ;;  %v1844_v24 = vpop.f32.mrb[14].mxu1 }
 0x263   :  { %2357 = vst [vmem:[#allocation7 + $0x50] sm:$0xff] %v2321_v41  ;;  %v3291_v43 = vadd.f32 %v1844_v24, %v3575_v40  ;;  %v1846_v9 = vpop.f32.mrb[15].mxu1 }
 0x264   :  { %2358 = vst [vmem:[#allocation7 + $0x58] sm:$0xff] %v2322_v42  ;;  %v3292_v23 = vadd.f32 %v1846_v9, %v3575_v40 }
 0x265   :  { %v2339_v44 = vmax.f32 %v3291_v43, 0.0 }
 0x266   :  { %v2340_v45 = vmax.f32 %v3292_v23, 0.0 }
 0x267   :  { %2375 = vst [vmem:[#allocation7 + $0xe0] sm:$0xff] %v2339_v44 }
 0x268   :  { %2376 = vst [vmem:[#allocation7 + $0xe8] sm:$0xff] %v2340_v45 }
 0x29f   :  { %v2300_v46 = vpop.f32.mrb[16].mxu0 }
 0x2a0   :  { %v3301_v47 = vadd.f32 %v2300_v46, %v3565_v27  ;;  %v2302_v48 = vpop.f32.mrb[17].mxu0 }
 0x2a1   :  { %v3302_v49 = vadd.f32 %v2302_v48, %v3565_v27 }
 0x2a2   :  { %v2327_v52 = vmax.f32 %v3301_v47, 0.0 }
 0x2a3   :  { %v2328_v53 = vmax.f32 %v3302_v49, 0.0  ;;  %v2306_v54 = vpop.f32.mrb[18].mxu0 }
 0x2a4   :  { %2363 = vst [vmem:[#allocation7 + $0x80] sm:$0xff] %v2327_v52  ;;  %v3303_v56 = vadd.f32 %v2306_v54, %v3575_v40  ;;  %v2308_v58 = vpop.f32.mrb[19].mxu0 }
 0x2a5   :  { %2364 = vst [vmem:[#allocation7 + $0x88] sm:$0xff] %v2328_v53  ;;  %v3304_v59 = vadd.f32 %v2308_v58, %v3575_v40 }
 0x2a6   :  { %v2345_v22 = vmax.f32 %v3303_v56, 0.0 }
 0x2a7   :  { %v2346_v60 = vmax.f32 %v3304_v59, 0.0 }
 0x2a8   :  { %2381 = vst [vmem:[#allocation7 + $0x110] sm:$0xff] %v2345_v22 }
 0x2a9   :  { %2382 = vst [vmem:[#allocation7 + $0x118] sm:$0xff] %v2346_v60 }
 0x2be   :  { %v2146_v62 = vpop.f32.mrb[16].mxu1 }
 0x2bf   :  { %v3297_v55 = vadd.f32 %v2146_v62, %v3565_v27  ;;  %v2148_v51 = vpop.f32.mrb[17].mxu1 }
 0x2c0   :  { %v3298_v63 = vadd.f32 %v2148_v51, %v3565_v27 }
 0x2c1   :  { %v2325_v2 = vmax.f32 %v3297_v55, 0.0 }
 0x2c2   :  { %v2326_v4 = vmax.f32 %v3298_v63, 0.0  ;;  %v2152_v5 = vpop.f32.mrb[18].mxu1 }
 0x2c3   :  { %2361 = vst [vmem:[#allocation7 + $0x70] sm:$0xff] %v2325_v2  ;;  %v3299_v57 = vadd.f32 %v2152_v5, %v3575_v40  ;;  %v2154_v6 = vpop.f32.mrb[19].mxu1 }
 0x2c4   :  { %2362 = vst [vmem:[#allocation7 + $0x78] sm:$0xff] %v2326_v4  ;;  %v3300_v7 = vadd.f32 %v2154_v6, %v3575_v40 }
 0x2c5   :  { %v2343_v50 = vmax.f32 %v3299_v57, 0.0 }
 0x2c6   :  { %v2344_v8 = vmax.f32 %v3300_v7, 0.0 }
 0x2c7   :  { %2379 = vst [vmem:[#allocation7 + $0x100] sm:$0xff] %v2343_v50 }
 0x2c8   :  { %2380 = vst [vmem:[#allocation7 + $0x108] sm:$0xff] %v2344_v8 }
 0x2c9   :  { %3414 = shalt.err (!%p3411_p6)
}
 0x2ca   :  { %s3415_s19 = scalar_lea.hbm %s3671_s3, 4608 }
 0x2cb   :  { %p3416_p7 = scmp.ne.s32.totalorder %s3671_s3, %s3415_s19  ;;  %p3419_p8 = scmp.lt.u32.totalorder %s3415_s19, %s3671_s3 }
 0x2cd   :  { %p3421_p9 = pnand %p3419_p8, %p3416_p7 }
 0x2cf   :  { %3424 = shalt.err (!%p3421_p9)
}
 0x2d0   :  { %2394 = dma.vmem_to_hbm [thread:$0]  %s2389_s15, 4608, %s3671_s3, [#allocation4], %s3435_s0, %s3435_s0, %s3436_s9  }
 0x2d1   :  { %3429 = dma.done.wait [#allocation4], 4608  }
 0x2d2   :  { %3430 = vsyncadd [#allocation4], 4294962688 }
 0x2d3   :  { %2398 = vsyncpa [#allocation3], 1 }
 0x2d4   :  { %2399 = vsyncpa [#allocation6], 1 }
 0x2d5   :  { %2400 = vsyncpa [#allocation4], 1 }

</bundles_post_ra>
